<compile_context>
chip_gen: v7x
topology: tpu7x:2x2x1
jax: 0.10.0
libtpu: 0.0.40
codegen_flags: <defaults>
</compile_context>

<pallas_src>
import functools

import jax
import jax.numpy as jnp
from jax.experimental import pallas as pl
from jax.experimental.pallas import tpu as pltpu


# ----------------------------------------------------------------------------
# Fused forward kernel
# ----------------------------------------------------------------------------
def _fused_forward_kernel(
    adj_t2p_ref, adj_p2t_ref,          # (Np, Nt), (Nt, Np)  row-normalized
    x_t_ref, x_p_ref,                  # (Nt, Ft_pad), (Np, Fp_pad)
    w_t_ref, b_t_ref,                  # (Ft_pad, H), (1, H)
    w_p_ref, b_p_ref,                  # (Fp_pad, H), (1, H)
    wl_t2p_ref, bl_t2p_ref, wr_t2p_ref,  # (3,H,H), (3,1,H), (3,H,H)
    wl_p2t_ref, bl_p2t_ref, wr_p2t_ref,  # (3,H,H), (3,1,H), (3,H,H)
    g_t_ref, g_p_ref,                  # (E_pad, Nt), (E_pad, Np) one-hot gather
    o_ref,                             # (E_pad, 1)
):
    f32 = jnp.float32

    # node_lin projections (weights pre-transposed to (F, H), no in-kernel .T)
    h_t = jnp.dot(x_t_ref[...], w_t_ref[...],
                  preferred_element_type=f32) + b_t_ref[...]
    h_p = jnp.dot(x_p_ref[...], w_p_ref[...],
                  preferred_element_type=f32) + b_p_ref[...]

    adj_t2p = adj_t2p_ref[...]
    adj_p2t = adj_p2t_ref[...]

    def sage(adj, xs, xd, wl, bl, wr, normalize, act):
        # mean aggregation + lin_l + bias + lin_r (root, no bias)
        agg = jnp.dot(adj, xs, preferred_element_type=f32)
        out = jnp.dot(agg, wl, preferred_element_type=f32) + bl
        out = out + jnp.dot(xd, wr, preferred_element_type=f32)
        if normalize:  # F.normalize(out, p=2, dim=-1): x / max(||x||, 1e-12)
            sum_sq = jnp.sum(out * out, axis=-1, keepdims=True)
            out = out * jax.lax.rsqrt(jnp.maximum(sum_sq, 1e-24))
        if act:        # leaky_relu, negative_slope=0.1
            out = jnp.where(out >= 0, out, 0.1 * out)
        return out

    # 3 hetero SAGE layers; conv1/conv2: normalize + leaky_relu, conv3: plain.
    for layer, (normalize, act) in enumerate(
            ((True, True), (True, True), (False, False))):
        new_p = sage(adj_t2p, h_t, h_p,
                     wl_t2p_ref[layer], bl_t2p_ref[layer], wr_t2p_ref[layer],
                     normalize, act)
        new_t = sage(adj_p2t, h_p, h_t,
                     wl_p2t_ref[layer], bl_p2t_ref[layer], wr_p2t_ref[layer],
                     normalize, act)
        h_t, h_p = new_t, new_p

    # LinkPredictor: one-hot gather via MXU + row-wise dot.
    t_emb = jnp.dot(g_t_ref[...], h_t, preferred_element_type=f32)
    p_emb = jnp.dot(g_p_ref[...], h_p, preferred_element_type=f32)
    o_ref[...] = jnp.sum(t_emb * p_emb, axis=-1, keepdims=True)


_VMEM = pl.BlockSpec(memory_space=pltpu.MemorySpace.VMEM)


# ----------------------------------------------------------------------------
# Glue (plain JAX): padding, dense adjacency, one-hot gather matrices
# ----------------------------------------------------------------------------
def _round_up(x, m):
    return ((x + m - 1) // m) * m


def xavier_uniform(key, shape):
    fan_out, fan_in = shape
    bound = jnp.sqrt(6.0 / (fan_in + fan_out))
    return jax.random.uniform(key, shape, jnp.float32, -bound, bound)


def init_params(key, hidden, feat_dims):
    """Weights stored pre-transposed & zero-padded for the fused kernel."""
    params = {}
    for node_type, f in feat_dims.items():
        f_pad = _round_up(f, 128)
        key, k1 = jax.random.split(key)
        w = xavier_uniform(k1, (hidden, f))                  # nn.Linear layout
        params[f"lin_{node_type}_w"] = (
            jnp.zeros((f_pad, hidden), jnp.float32).at[:f, :].set(w.T))
        params[f"lin_{node_type}_b"] = jnp.zeros((1, hidden), jnp.float32)
    # 3 SAGEConv layers x 2 edge types (to_hetero duplicates weights per type)
    for et in ("t2p", "p2t"):
        wls, bls, wrs = [], [], []
        for _ in range(3):
            key, k1, k2 = jax.random.split(key, 3)
            wls.append(xavier_uniform(k1, (hidden, hidden)).T)   # (H_in, H_out)
            bls.append(jnp.zeros((1, hidden), jnp.float32))
            wrs.append(xavier_uniform(k2, (hidden, hidden)).T)
        params[f"wl_{et}"] = jnp.stack(wls)
        params[f"bl_{et}"] = jnp.stack(bls)
        params[f"wr_{et}"] = jnp.stack(wrs)
    return params


def _mean_adjacency(dst_idx, src_idx, n_dst, n_src):
    """Dense row-normalized A[dst, src] so that A @ x_src == scatter-mean."""
    a = jnp.zeros((n_dst, n_src), jnp.float32).at[dst_idx, src_idx].add(1.0)
    deg = jnp.sum(a, axis=1, keepdims=True)
    return a / jnp.maximum(deg, 1.0)


def hetero_model_forward(params, x_track, x_playlist, edge_index_t2p,
                         edge_label_index):
    n_t, f_t = x_track.shape
    n_p, f_p = x_playlist.shape
    e = edge_label_index.shape[1]

    nt_pad = _round_up(n_t, 128)          # lane-dense node counts
    np_pad = _round_up(n_p, 128)
    e_pad = _round_up(e, 8)

    ft_pad = params["lin_track_w"].shape[0]
    fp_pad = params["lin_playlist_w"].shape[0]

    x_t = jnp.zeros((nt_pad, ft_pad), jnp.float32).at[:n_t, :f_t].set(x_track)
    x_p = jnp.zeros((np_pad, fp_pad), jnp.float32).at[:n_p, :f_p].set(x_playlist)

    src, dst = edge_index_t2p[0], edge_index_t2p[1]
    adj_t2p = _mean_adjacency(dst, src, np_pad, nt_pad)   # playlist <- track
    adj_p2t = _mean_adjacency(src, dst, nt_pad, np_pad)   # track <- playlist

    rows = jnp.arange(e)
    g_t = jnp.zeros((e_pad, nt_pad), jnp.float32).at[
        rows, edge_label_index[0]].set(1.0)
    g_p = jnp.zeros((e_pad, np_pad), jnp.float32).at[
        rows, edge_label_index[1]].set(1.0)

    scores = pl.pallas_call(
        _fused_forward_kernel,
        out_shape=jax.ShapeDtypeStruct((e_pad, 1), jnp.float32),
        in_specs=[_VMEM] * 16,
        out_specs=_VMEM,
    )(adj_t2p, adj_p2t, x_t, x_p,
      params["lin_track_w"], params["lin_track_b"],
      params["lin_playlist_w"], params["lin_playlist_b"],
      params["wl_t2p"], params["bl_t2p"], params["wr_t2p"],
      params["wl_p2t"], params["bl_p2t"], params["wr_p2t"],
      g_t, g_p)

    return scores[:e, 0]


# ----------------------------------------------------------------------------
if __name__ == "__main__":
    HIDDEN = 128
    N_TRACK, N_PLAYLIST = 64, 32
    F_TRACK, F_PLAYLIST = 32, 16
    N_EDGES, N_LABEL = 96, 16

    key = jax.random.PRNGKey(0)
    key, kx1, kx2, ke1, ke2, ke3, ke4, kp = jax.random.split(key, 8)

    x_track = jax.random.normal(kx1, (N_TRACK, F_TRACK), jnp.float32)
    x_playlist = jax.random.normal(kx2, (N_PLAYLIST, F_PLAYLIST), jnp.float32)
    edge_index_t2p = jnp.stack([
        jax.random.randint(ke1, (N_EDGES,), 0, N_TRACK),
        jax.random.randint(ke2, (N_EDGES,), 0, N_PLAYLIST),
    ])
    edge_label_index = jnp.stack([
        jax.random.randint(ke3, (N_LABEL,), 0, N_TRACK),
        jax.random.randint(ke4, (N_LABEL,), 0, N_PLAYLIST),
    ])

    params = init_params(kp, HIDDEN,
                         {"track": F_TRACK, "playlist": F_PLAYLIST})

    fwd = jax.jit(functools.partial(hetero_model_forward, params))
    pred = fwd(x_track, x_playlist, edge_index_t2p, edge_label_index)
    jax.block_until_ready(pred)
    assert pred.shape == (N_LABEL,) and pred.dtype == jnp.float32
    print("KERNEL_OK")
</pallas_src>

<mosaic_0001>
module attributes {stable_mosaic.version = 11 : i64} {
  func.func private @main(%arg0: i32) attributes {dimension_semantics = [#tpu.dimension_semantics<core_parallel>], iteration_bounds = array<i64: 2>, tpu.core_type = #tpu.core_type<sc_scalar_subcore>, window_params = []} {
    return
  }
}

module attributes {stable_mosaic.version = 11 : i64} {
  func.func private @main(%arg0: i32) attributes {dimension_semantics = [#tpu.dimension_semantics<core_parallel>], iteration_bounds = array<i64: 2>, tpu.core_type = #tpu.core_type<sc_scalar_subcore>, window_params = []} {
    return
  }
}

module attributes {stable_mosaic.version = 11 : i64} {
  func.func @_fused_forward_kernel(%arg0: memref<128x128xf32, #tpu.memory_space<vmem>>, %arg1: memref<128x128xf32, #tpu.memory_space<vmem>>, %arg2: memref<128x128xf32, #tpu.memory_space<vmem>>, %arg3: memref<128x128xf32, #tpu.memory_space<vmem>>, %arg4: memref<128x128xf32, #tpu.memory_space<vmem>>, %arg5: memref<1x128xf32, #tpu.memory_space<vmem>>, %arg6: memref<128x128xf32, #tpu.memory_space<vmem>>, %arg7: memref<1x128xf32, #tpu.memory_space<vmem>>, %arg8: memref<3x128x128xf32, #tpu.memory_space<vmem>>, %arg9: memref<3x1x128xf32, #tpu.memory_space<vmem>>, %arg10: memref<3x128x128xf32, #tpu.memory_space<vmem>>, %arg11: memref<3x128x128xf32, #tpu.memory_space<vmem>>, %arg12: memref<3x1x128xf32, #tpu.memory_space<vmem>>, %arg13: memref<3x128x128xf32, #tpu.memory_space<vmem>>, %arg14: memref<16x128xf32, #tpu.memory_space<vmem>>, %arg15: memref<16x128xf32, #tpu.memory_space<vmem>>, %arg16: memref<16x1xf32, #tpu.memory_space<vmem>>) attributes {dimension_semantics = [], scalar_prefetch = 0 : i64, scratch_operands = 0 : i64, tpu.core_type = #tpu.core_type<tc>} {
    %c0 = arith.constant 0 : index
    %c0_0 = arith.constant 0 : index
    %0 = vector.load %arg2[%c0, %c0_0] : memref<128x128xf32, #tpu.memory_space<vmem>>, vector<128x128xf32>
    %c0_1 = arith.constant 0 : index
    %c0_2 = arith.constant 0 : index
    %1 = vector.load %arg4[%c0_1, %c0_2] : memref<128x128xf32, #tpu.memory_space<vmem>>, vector<128x128xf32>
    %cst = arith.constant dense<0.000000e+00> : vector<128x128xf32>
    %2 = tpu.matmul %0, %1, %cst {dimension_numbers = #tpu.dot_dimension_numbers<[1], [0], [0], [1], [0, 0, 1, 1], [], []>} : vector<128x128xf32>, vector<128x128xf32>, vector<128x128xf32> -> vector<128x128xf32>
    %c0_3 = arith.constant 0 : index
    %c0_4 = arith.constant 0 : index
    %3 = vector.load %arg5[%c0_3, %c0_4] : memref<1x128xf32, #tpu.memory_space<vmem>>, vector<1x128xf32>
    %4 = vector.broadcast %3 : vector<1x128xf32> to vector<128x128xf32>
    %5 = arith.addf %2, %4 : vector<128x128xf32>
    %c0_5 = arith.constant 0 : index
    %c0_6 = arith.constant 0 : index
    %6 = vector.load %arg3[%c0_5, %c0_6] : memref<128x128xf32, #tpu.memory_space<vmem>>, vector<128x128xf32>
    %c0_7 = arith.constant 0 : index
    %c0_8 = arith.constant 0 : index
    %7 = vector.load %arg6[%c0_7, %c0_8] : memref<128x128xf32, #tpu.memory_space<vmem>>, vector<128x128xf32>
    %cst_9 = arith.constant dense<0.000000e+00> : vector<128x128xf32>
    %8 = tpu.matmul %6, %7, %cst_9 {dimension_numbers = #tpu.dot_dimension_numbers<[1], [0], [0], [1], [0, 0, 1, 1], [], []>} : vector<128x128xf32>, vector<128x128xf32>, vector<128x128xf32> -> vector<128x128xf32>
    %c0_10 = arith.constant 0 : index
    %c0_11 = arith.constant 0 : index
    %9 = vector.load %arg7[%c0_10, %c0_11] : memref<1x128xf32, #tpu.memory_space<vmem>>, vector<1x128xf32>
    %10 = vector.broadcast %9 : vector<1x128xf32> to vector<128x128xf32>
    %11 = arith.addf %8, %10 : vector<128x128xf32>
    %c0_12 = arith.constant 0 : index
    %c0_13 = arith.constant 0 : index
    %12 = vector.load %arg0[%c0_12, %c0_13] : memref<128x128xf32, #tpu.memory_space<vmem>>, vector<128x128xf32>
    %c0_14 = arith.constant 0 : index
    %c0_15 = arith.constant 0 : index
    %13 = vector.load %arg1[%c0_14, %c0_15] : memref<128x128xf32, #tpu.memory_space<vmem>>, vector<128x128xf32>
    %c0_16 = arith.constant 0 : index
    %c0_17 = arith.constant 0 : index
    %c0_18 = arith.constant 0 : index
    %14 = vector.load %arg8[%c0_16, %c0_17, %c0_18] : memref<3x128x128xf32, #tpu.memory_space<vmem>>, vector<1x128x128xf32>
    %15 = vector.shape_cast %14 : vector<1x128x128xf32> to vector<128x128xf32>
    %c0_19 = arith.constant 0 : index
    %c0_20 = arith.constant 0 : index
    %c0_21 = arith.constant 0 : index
    %16 = vector.load %arg9[%c0_19, %c0_20, %c0_21] : memref<3x1x128xf32, #tpu.memory_space<vmem>>, vector<1x1x128xf32>
    %17 = vector.shape_cast %16 : vector<1x1x128xf32> to vector<1x128xf32>
    %c0_22 = arith.constant 0 : index
    %c0_23 = arith.constant 0 : index
    %c0_24 = arith.constant 0 : index
    %18 = vector.load %arg10[%c0_22, %c0_23, %c0_24] : memref<3x128x128xf32, #tpu.memory_space<vmem>>, vector<1x128x128xf32>
    %19 = vector.shape_cast %18 : vector<1x128x128xf32> to vector<128x128xf32>
    %cst_25 = arith.constant dense<0.000000e+00> : vector<128x128xf32>
    %20 = tpu.matmul %12, %5, %cst_25 {dimension_numbers = #tpu.dot_dimension_numbers<[1], [0], [0], [1], [0, 0, 1, 1], [], []>} : vector<128x128xf32>, vector<128x128xf32>, vector<128x128xf32> -> vector<128x128xf32>
    %cst_26 = arith.constant dense<0.000000e+00> : vector<128x128xf32>
    %21 = tpu.matmul %20, %15, %cst_26 {dimension_numbers = #tpu.dot_dimension_numbers<[1], [0], [0], [1], [0, 0, 1, 1], [], []>} : vector<128x128xf32>, vector<128x128xf32>, vector<128x128xf32> -> vector<128x128xf32>
    %22 = vector.broadcast %17 : vector<1x128xf32> to vector<128x128xf32>
    %23 = arith.addf %21, %22 : vector<128x128xf32>
    %cst_27 = arith.constant dense<0.000000e+00> : vector<128x128xf32>
    %24 = tpu.matmul %11, %19, %cst_27 {dimension_numbers = #tpu.dot_dimension_numbers<[1], [0], [0], [1], [0, 0, 1, 1], [], []>} : vector<128x128xf32>, vector<128x128xf32>, vector<128x128xf32> -> vector<128x128xf32>
    %25 = arith.addf %23, %24 : vector<128x128xf32>
    %26 = arith.mulf %25, %25 : vector<128x128xf32>
    %cst_28 = arith.constant dense<0.000000e+00> : vector<128xf32>
    %27 = vector.multi_reduction <add>, %26, %cst_28 [1] : vector<128x128xf32> to vector<128xf32>
    %28 = vector.shape_cast %27 : vector<128xf32> to vector<128x1xf32>
    %cst_29 = arith.constant 1.000000e-24 : f32
    %29 = vector.broadcast %cst_29 : f32 to vector<128x1xf32>
    %30 = arith.maximumf %28, %29 : vector<128x1xf32>
    %31 = math.rsqrt %30 : vector<128x1xf32>
    %32 = vector.broadcast %31 : vector<128x1xf32> to vector<128x128xf32>
    %33 = arith.mulf %25, %32 : vector<128x128xf32>
    %cst_30 = arith.constant 0.000000e+00 : f32
    %34 = vector.broadcast %cst_30 : f32 to vector<128x128xf32>
    %35 = arith.cmpf oge, %33, %34 : vector<128x128xf32>
    %cst_31 = arith.constant 1.000000e-01 : f32
    %36 = vector.broadcast %cst_31 : f32 to vector<128x128xf32>
    %37 = arith.mulf %36, %33 : vector<128x128xf32>
    %38 = arith.select %35, %33, %37 : vector<128x128xi1>, vector<128x128xf32>
    %c0_32 = arith.constant 0 : index
    %c0_33 = arith.constant 0 : index
    %c0_34 = arith.constant 0 : index
    %39 = vector.load %arg11[%c0_32, %c0_33, %c0_34] : memref<3x128x128xf32, #tpu.memory_space<vmem>>, vector<1x128x128xf32>
    %40 = vector.shape_cast %39 : vector<1x128x128xf32> to vector<128x128xf32>
    %c0_35 = arith.constant 0 : index
    %c0_36 = arith.constant 0 : index
    %c0_37 = arith.constant 0 : index
    %41 = vector.load %arg12[%c0_35, %c0_36, %c0_37] : memref<3x1x128xf32, #tpu.memory_space<vmem>>, vector<1x1x128xf32>
    %42 = vector.shape_cast %41 : vector<1x1x128xf32> to vector<1x128xf32>
    %c0_38 = arith.constant 0 : index
    %c0_39 = arith.constant 0 : index
    %c0_40 = arith.constant 0 : index
    %43 = vector.load %arg13[%c0_38, %c0_39, %c0_40] : memref<3x128x128xf32, #tpu.memory_space<vmem>>, vector<1x128x128xf32>
    %44 = vector.shape_cast %43 : vector<1x128x128xf32> to vector<128x128xf32>
    %cst_41 = arith.constant dense<0.000000e+00> : vector<128x128xf32>
    %45 = tpu.matmul %13, %11, %cst_41 {dimension_numbers = #tpu.dot_dimension_numbers<[1], [0], [0], [1], [0, 0, 1, 1], [], []>} : vector<128x128xf32>, vector<128x128xf32>, vector<128x128xf32> -> vector<128x128xf32>
    %cst_42 = arith.constant dense<0.000000e+00> : vector<128x128xf32>
    %46 = tpu.matmul %45, %40, %cst_42 {dimension_numbers = #tpu.dot_dimension_numbers<[1], [0], [0], [1], [0, 0, 1, 1], [], []>} : vector<128x128xf32>, vector<128x128xf32>, vector<128x128xf32> -> vector<128x128xf32>
    %47 = vector.broadcast %42 : vector<1x128xf32> to vector<128x128xf32>
    %48 = arith.addf %46, %47 : vector<128x128xf32>
    %cst_43 = arith.constant dense<0.000000e+00> : vector<128x128xf32>
    %49 = tpu.matmul %5, %44, %cst_43 {dimension_numbers = #tpu.dot_dimension_numbers<[1], [0], [0], [1], [0, 0, 1, 1], [], []>} : vector<128x128xf32>, vector<128x128xf32>, vector<128x128xf32> -> vector<128x128xf32>
    %50 = arith.addf %48, %49 : vector<128x128xf32>
    %51 = arith.mulf %50, %50 : vector<128x128xf32>
    %cst_44 = arith.constant dense<0.000000e+00> : vector<128xf32>
    %52 = vector.multi_reduction <add>, %51, %cst_44 [1] : vector<128x128xf32> to vector<128xf32>
    %53 = vector.shape_cast %52 : vector<128xf32> to vector<128x1xf32>
    %cst_45 = arith.constant 1.000000e-24 : f32
    %54 = vector.broadcast %cst_45 : f32 to vector<128x1xf32>
    %55 = arith.maximumf %53, %54 : vector<128x1xf32>
    %56 = math.rsqrt %55 : vector<128x1xf32>
    %57 = vector.broadcast %56 : vector<128x1xf32> to vector<128x128xf32>
    %58 = arith.mulf %50, %57 : vector<128x128xf32>
    %cst_46 = arith.constant 0.000000e+00 : f32
    %59 = vector.broadcast %cst_46 : f32 to vector<128x128xf32>
    %60 = arith.cmpf oge, %58, %59 : vector<128x128xf32>
    %cst_47 = arith.constant 1.000000e-01 : f32
    %61 = vector.broadcast %cst_47 : f32 to vector<128x128xf32>
    %62 = arith.mulf %61, %58 : vector<128x128xf32>
    %63 = arith.select %60, %58, %62 : vector<128x128xi1>, vector<128x128xf32>
    %c1 = arith.constant 1 : index
    %c0_48 = arith.constant 0 : index
    %c0_49 = arith.constant 0 : index
    %64 = vector.load %arg8[%c1, %c0_48, %c0_49] : memref<3x128x128xf32, #tpu.memory_space<vmem>>, vector<1x128x128xf32>
    %65 = vector.shape_cast %64 : vector<1x128x128xf32> to vector<128x128xf32>
    %c1_50 = arith.constant 1 : index
    %c0_51 = arith.constant 0 : index
    %c0_52 = arith.constant 0 : index
    %66 = vector.load %arg9[%c1_50, %c0_51, %c0_52] : memref<3x1x128xf32, #tpu.memory_space<vmem>>, vector<1x1x128xf32>
    %67 = vector.shape_cast %66 : vector<1x1x128xf32> to vector<1x128xf32>
    %c1_53 = arith.constant 1 : index
    %c0_54 = arith.constant 0 : index
    %c0_55 = arith.constant 0 : index
    %68 = vector.load %arg10[%c1_53, %c0_54, %c0_55] : memref<3x128x128xf32, #tpu.memory_space<vmem>>, vector<1x128x128xf32>
    %69 = vector.shape_cast %68 : vector<1x128x128xf32> to vector<128x128xf32>
    %cst_56 = arith.constant dense<0.000000e+00> : vector<128x128xf32>
    %70 = tpu.matmul %12, %63, %cst_56 {dimension_numbers = #tpu.dot_dimension_numbers<[1], [0], [0], [1], [0, 0, 1, 1], [], []>} : vector<128x128xf32>, vector<128x128xf32>, vector<128x128xf32> -> vector<128x128xf32>
    %cst_57 = arith.constant dense<0.000000e+00> : vector<128x128xf32>
    %71 = tpu.matmul %70, %65, %cst_57 {dimension_numbers = #tpu.dot_dimension_numbers<[1], [0], [0], [1], [0, 0, 1, 1], [], []>} : vector<128x128xf32>, vector<128x128xf32>, vector<128x128xf32> -> vector<128x128xf32>
    %72 = vector.broadcast %67 : vector<1x128xf32> to vector<128x128xf32>
    %73 = arith.addf %71, %72 : vector<128x128xf32>
    %cst_58 = arith.constant dense<0.000000e+00> : vector<128x128xf32>
    %74 = tpu.matmul %38, %69, %cst_58 {dimension_numbers = #tpu.dot_dimension_numbers<[1], [0], [0], [1], [0, 0, 1, 1], [], []>} : vector<128x128xf32>, vector<128x128xf32>, vector<128x128xf32> -> vector<128x128xf32>
    %75 = arith.addf %73, %74 : vector<128x128xf32>
    %76 = arith.mulf %75, %75 : vector<128x128xf32>
    %cst_59 = arith.constant dense<0.000000e+00> : vector<128xf32>
    %77 = vector.multi_reduction <add>, %76, %cst_59 [1] : vector<128x128xf32> to vector<128xf32>
    %78 = vector.shape_cast %77 : vector<128xf32> to vector<128x1xf32>
    %cst_60 = arith.constant 1.000000e-24 : f32
    %79 = vector.broadcast %cst_60 : f32 to vector<128x1xf32>
    %80 = arith.maximumf %78, %79 : vector<128x1xf32>
    %81 = math.rsqrt %80 : vector<128x1xf32>
    %82 = vector.broadcast %81 : vector<128x1xf32> to vector<128x128xf32>
    %83 = arith.mulf %75, %82 : vector<128x128xf32>
    %cst_61 = arith.constant 0.000000e+00 : f32
    %84 = vector.broadcast %cst_61 : f32 to vector<128x128xf32>
    %85 = arith.cmpf oge, %83, %84 : vector<128x128xf32>
    %cst_62 = arith.constant 1.000000e-01 : f32
    %86 = vector.broadcast %cst_62 : f32 to vector<128x128xf32>
    %87 = arith.mulf %86, %83 : vector<128x128xf32>
    %88 = arith.select %85, %83, %87 : vector<128x128xi1>, vector<128x128xf32>
    %c1_63 = arith.constant 1 : index
    %c0_64 = arith.constant 0 : index
    %c0_65 = arith.constant 0 : index
    %89 = vector.load %arg11[%c1_63, %c0_64, %c0_65] : memref<3x128x128xf32, #tpu.memory_space<vmem>>, vector<1x128x128xf32>
    %90 = vector.shape_cast %89 : vector<1x128x128xf32> to vector<128x128xf32>
    %c1_66 = arith.constant 1 : index
    %c0_67 = arith.constant 0 : index
    %c0_68 = arith.constant 0 : index
    %91 = vector.load %arg12[%c1_66, %c0_67, %c0_68] : memref<3x1x128xf32, #tpu.memory_space<vmem>>, vector<1x1x128xf32>
    %92 = vector.shape_cast %91 : vector<1x1x128xf32> to vector<1x128xf32>
    %c1_69 = arith.constant 1 : index
    %c0_70 = arith.constant 0 : index
    %c0_71 = arith.constant 0 : index
    %93 = vector.load %arg13[%c1_69, %c0_70, %c0_71] : memref<3x128x128xf32, #tpu.memory_space<vmem>>, vector<1x128x128xf32>
    %94 = vector.shape_cast %93 : vector<1x128x128xf32> to vector<128x128xf32>
    %cst_72 = arith.constant dense<0.000000e+00> : vector<128x128xf32>
    %95 = tpu.matmul %13, %38, %cst_72 {dimension_numbers = #tpu.dot_dimension_numbers<[1], [0], [0], [1], [0, 0, 1, 1], [], []>} : vector<128x128xf32>, vector<128x128xf32>, vector<128x128xf32> -> vector<128x128xf32>
    %cst_73 = arith.constant dense<0.000000e+00> : vector<128x128xf32>
    %96 = tpu.matmul %95, %90, %cst_73 {dimension_numbers = #tpu.dot_dimension_numbers<[1], [0], [0], [1], [0, 0, 1, 1], [], []>} : vector<128x128xf32>, vector<128x128xf32>, vector<128x128xf32> -> vector<128x128xf32>
    %97 = vector.broadcast %92 : vector<1x128xf32> to vector<128x128xf32>
    %98 = arith.addf %96, %97 : vector<128x128xf32>
    %cst_74 = arith.constant dense<0.000000e+00> : vector<128x128xf32>
    %99 = tpu.matmul %63, %94, %cst_74 {dimension_numbers = #tpu.dot_dimension_numbers<[1], [0], [0], [1], [0, 0, 1, 1], [], []>} : vector<128x128xf32>, vector<128x128xf32>, vector<128x128xf32> -> vector<128x128xf32>
    %100 = arith.addf %98, %99 : vector<128x128xf32>
    %101 = arith.mulf %100, %100 : vector<128x128xf32>
    %cst_75 = arith.constant dense<0.000000e+00> : vector<128xf32>
    %102 = vector.multi_reduction <add>, %101, %cst_75 [1] : vector<128x128xf32> to vector<128xf32>
    %103 = vector.shape_cast %102 : vector<128xf32> to vector<128x1xf32>
    %cst_76 = arith.constant 1.000000e-24 : f32
    %104 = vector.broadcast %cst_76 : f32 to vector<128x1xf32>
    %105 = arith.maximumf %103, %104 : vector<128x1xf32>
    %106 = math.rsqrt %105 : vector<128x1xf32>
    %107 = vector.broadcast %106 : vector<128x1xf32> to vector<128x128xf32>
    %108 = arith.mulf %100, %107 : vector<128x128xf32>
    %cst_77 = arith.constant 0.000000e+00 : f32
    %109 = vector.broadcast %cst_77 : f32 to vector<128x128xf32>
    %110 = arith.cmpf oge, %108, %109 : vector<128x128xf32>
    %cst_78 = arith.constant 1.000000e-01 : f32
    %111 = vector.broadcast %cst_78 : f32 to vector<128x128xf32>
    %112 = arith.mulf %111, %108 : vector<128x128xf32>
    %113 = arith.select %110, %108, %112 : vector<128x128xi1>, vector<128x128xf32>
    %c2 = arith.constant 2 : index
    %c0_79 = arith.constant 0 : index
    %c0_80 = arith.constant 0 : index
    %114 = vector.load %arg8[%c2, %c0_79, %c0_80] : memref<3x128x128xf32, #tpu.memory_space<vmem>>, vector<1x128x128xf32>
    %115 = vector.shape_cast %114 : vector<1x128x128xf32> to vector<128x128xf32>
    %c2_81 = arith.constant 2 : index
    %c0_82 = arith.constant 0 : index
    %c0_83 = arith.constant 0 : index
    %116 = vector.load %arg9[%c2_81, %c0_82, %c0_83] : memref<3x1x128xf32, #tpu.memory_space<vmem>>, vector<1x1x128xf32>
    %117 = vector.shape_cast %116 : vector<1x1x128xf32> to vector<1x128xf32>
    %c2_84 = arith.constant 2 : index
    %c0_85 = arith.constant 0 : index
    %c0_86 = arith.constant 0 : index
    %118 = vector.load %arg10[%c2_84, %c0_85, %c0_86] : memref<3x128x128xf32, #tpu.memory_space<vmem>>, vector<1x128x128xf32>
    %119 = vector.shape_cast %118 : vector<1x128x128xf32> to vector<128x128xf32>
    %cst_87 = arith.constant dense<0.000000e+00> : vector<128x128xf32>
    %120 = tpu.matmul %12, %113, %cst_87 {dimension_numbers = #tpu.dot_dimension_numbers<[1], [0], [0], [1], [0, 0, 1, 1], [], []>} : vector<128x128xf32>, vector<128x128xf32>, vector<128x128xf32> -> vector<128x128xf32>
    %cst_88 = arith.constant dense<0.000000e+00> : vector<128x128xf32>
    %121 = tpu.matmul %120, %115, %cst_88 {dimension_numbers = #tpu.dot_dimension_numbers<[1], [0], [0], [1], [0, 0, 1, 1], [], []>} : vector<128x128xf32>, vector<128x128xf32>, vector<128x128xf32> -> vector<128x128xf32>
    %122 = vector.broadcast %117 : vector<1x128xf32> to vector<128x128xf32>
    %123 = arith.addf %121, %122 : vector<128x128xf32>
    %cst_89 = arith.constant dense<0.000000e+00> : vector<128x128xf32>
    %124 = tpu.matmul %88, %119, %cst_89 {dimension_numbers = #tpu.dot_dimension_numbers<[1], [0], [0], [1], [0, 0, 1, 1], [], []>} : vector<128x128xf32>, vector<128x128xf32>, vector<128x128xf32> -> vector<128x128xf32>
    %125 = arith.addf %123, %124 : vector<128x128xf32>
    %c2_90 = arith.constant 2 : index
    %c0_91 = arith.constant 0 : index
    %c0_92 = arith.constant 0 : index
    %126 = vector.load %arg11[%c2_90, %c0_91, %c0_92] : memref<3x128x128xf32, #tpu.memory_space<vmem>>, vector<1x128x128xf32>
    %127 = vector.shape_cast %126 : vector<1x128x128xf32> to vector<128x128xf32>
    %c2_93 = arith.constant 2 : index
    %c0_94 = arith.constant 0 : index
    %c0_95 = arith.constant 0 : index
    %128 = vector.load %arg12[%c2_93, %c0_94, %c0_95] : memref<3x1x128xf32, #tpu.memory_space<vmem>>, vector<1x1x128xf32>
    %129 = vector.shape_cast %128 : vector<1x1x128xf32> to vector<1x128xf32>
    %c2_96 = arith.constant 2 : index
    %c0_97 = arith.constant 0 : index
    %c0_98 = arith.constant 0 : index
    %130 = vector.load %arg13[%c2_96, %c0_97, %c0_98] : memref<3x128x128xf32, #tpu.memory_space<vmem>>, vector<1x128x128xf32>
    %131 = vector.shape_cast %130 : vector<1x128x128xf32> to vector<128x128xf32>
    %cst_99 = arith.constant dense<0.000000e+00> : vector<128x128xf32>
    %132 = tpu.matmul %13, %88, %cst_99 {dimension_numbers = #tpu.dot_dimension_numbers<[1], [0], [0], [1], [0, 0, 1, 1], [], []>} : vector<128x128xf32>, vector<128x128xf32>, vector<128x128xf32> -> vector<128x128xf32>
    %cst_100 = arith.constant dense<0.000000e+00> : vector<128x128xf32>
    %133 = tpu.matmul %132, %127, %cst_100 {dimension_numbers = #tpu.dot_dimension_numbers<[1], [0], [0], [1], [0, 0, 1, 1], [], []>} : vector<128x128xf32>, vector<128x128xf32>, vector<128x128xf32> -> vector<128x128xf32>
    %134 = vector.broadcast %129 : vector<1x128xf32> to vector<128x128xf32>
    %135 = arith.addf %133, %134 : vector<128x128xf32>
    %cst_101 = arith.constant dense<0.000000e+00> : vector<128x128xf32>
    %136 = tpu.matmul %113, %131, %cst_101 {dimension_numbers = #tpu.dot_dimension_numbers<[1], [0], [0], [1], [0, 0, 1, 1], [], []>} : vector<128x128xf32>, vector<128x128xf32>, vector<128x128xf32> -> vector<128x128xf32>
    %137 = arith.addf %135, %136 : vector<128x128xf32>
    %c0_102 = arith.constant 0 : index
    %c0_103 = arith.constant 0 : index
    %138 = vector.load %arg14[%c0_102, %c0_103] : memref<16x128xf32, #tpu.memory_space<vmem>>, vector<16x128xf32>
    %cst_104 = arith.constant dense<0.000000e+00> : vector<16x128xf32>
    %139 = tpu.matmul %138, %137, %cst_104 {dimension_numbers = #tpu.dot_dimension_numbers<[1], [0], [0], [1], [0, 0, 1, 1], [], []>} : vector<16x128xf32>, vector<128x128xf32>, vector<16x128xf32> -> vector<16x128xf32>
    %c0_105 = arith.constant 0 : index
    %c0_106 = arith.constant 0 : index
    %140 = vector.load %arg15[%c0_105, %c0_106] : memref<16x128xf32, #tpu.memory_space<vmem>>, vector<16x128xf32>
    %cst_107 = arith.constant dense<0.000000e+00> : vector<16x128xf32>
    %141 = tpu.matmul %140, %125, %cst_107 {dimension_numbers = #tpu.dot_dimension_numbers<[1], [0], [0], [1], [0, 0, 1, 1], [], []>} : vector<16x128xf32>, vector<128x128xf32>, vector<16x128xf32> -> vector<16x128xf32>
    %142 = arith.mulf %139, %141 : vector<16x128xf32>
    %cst_108 = arith.constant dense<0.000000e+00> : vector<16xf32>
    %143 = vector.multi_reduction <add>, %142, %cst_108 [1] : vector<16x128xf32> to vector<16xf32>
    %144 = vector.shape_cast %143 : vector<16xf32> to vector<16x1xf32>
    %c0_109 = arith.constant 0 : index
    %c0_110 = arith.constant 0 : index
    %145 = vector.load %arg16[%c0_109, %c0_110] : memref<16x1xf32, #tpu.memory_space<vmem>>, vector<16x1xf32>
    tpu.vector_store %arg16[%c0_109, %c0_110], %144 {strides = array<i32>} : memref<16x1xf32, #tpu.memory_space<vmem>>, vector<16x1xf32>,
    return
  }
}

</mosaic_0001>

<bundles_post_ra>
// kernel: hetero_model_forward.1
= control target key start
LH: loop header
LB: loop body
LE: loop exit
PB: predicated region body
PF: predicated region fallthrough
CT: control target
= control target key end

     0   :  { %s9250_s4 = inlined_call_operand.vmem [shape: f32[128,128], index: 4, kind: input, shape index: {}]   ;;  %s9251_s2 = inlined_call_operand.vmem [shape: f32[128,128], index: 2, kind: input, shape index: {}]   ;;  %s9252_s6 = inlined_call_operand.vmem [shape: f32[128,128], index: 6, kind: input, shape index: {}]   ;;  %s9253_s3 = inlined_call_operand.vmem [shape: f32[128,128], index: 3, kind: input, shape index: {}]   ;;  %s9254_s0 = inlined_call_operand.vmem [shape: f32[128,128], index: 0, kind: input, shape index: {}]   ;;  %s9255_s8 = inlined_call_operand.vmem [shape: f32[3,128,128], index: 8, kind: input, shape index: {}]   ;;  %s9256_s5 = inlined_call_operand.vmem [shape: f32[1,128], index: 5, kind: input, shape index: {}, may-alias: {5,7}]   ;;  %s9257_s7 = inlined_call_operand.vmem [shape: f32[1,128], index: 7, kind: input, shape index: {}, may-alias: {5,7}]   ;;  %s9258_s1 = inlined_call_operand.vmem [shape: f32[128,128], index: 1, kind: input, shape index: {}]   ;;  %s9259_s10 = inlined_call_operand.vmem [shape: f32[3,128,128], index: 10, kind: input, shape index: {}]   ;;  %s9260_s11 = inlined_call_operand.vmem [shape: f32[3,128,128], index: 11, kind: input, shape index: {}]   ;;  %s9261_s13 = inlined_call_operand.vmem [shape: f32[3,128,128], index: 13, kind: input, shape index: {}]   ;;  %s9262_s12 = inlined_call_operand.vmem [shape: f32[3,1,128], index: 12, kind: input, shape index: {}, may-alias: {9,12}]   ;;  %s9263_s9 = inlined_call_operand.vmem [shape: f32[3,1,128], index: 9, kind: input, shape index: {}, may-alias: {9,12}]   ;;  %s9264_s14 = inlined_call_operand.vmem [shape: f32[16,128], index: 14, kind: input, shape index: {}]   ;;  %s9265_s15 = inlined_call_operand.vmem [shape: f32[16,128], index: 15, kind: input, shape index: {}]   ;;  %s9266_s16 = inlined_call_operand.vmem [shape: f32[16,1], index: 16, kind: output, shape index: {}]  }
   0x1   :  { %9268 = sst [smem:[#allocation2_spill]] %s9250_s4  ;;  %v53_v9 = vld [vmem:[%s9251_s2] sm:$0xff]  ;;  %v254_v13 = vld [vmem:[%s9252_s6 + $0x8] sm:$0xff]  ;;  %v255_v15 = vld [vmem:[%s9252_s6 + $0x10] sm:$0xff] }
   0x2   :  { %s9269_s23 = sld [smem:[#allocation2_spill]]  ;;  %v253_v10 = vld [vmem:[%s9252_s6] sm:$0xff]  ;;  %4996 = vmatprep.mubr.f32.mxu0 %v53_v9  ;;  %v256_v16 = vld [vmem:[%s9252_s6 + $0x18] sm:$0xff]  ;;  %v258_v19 = vld [vmem:[%s9252_s6 + $0x28] sm:$0xff] }
   0x3   :  { %v6186_v14 = vpack.c.bf16 %v254_v13, %v253_v10  ;;  %v6190_v17 = vpack.c.bf16 %v256_v16, %v255_v15  ;;  %v257_v18 = vld [vmem:[%s9252_s6 + $0x20] sm:$0xff]  ;;  %v259_v24 = vld [vmem:[%s9252_s6 + $0x30] sm:$0xff]  ;;  %v260_v25 = vld [vmem:[%s9252_s6 + $0x38] sm:$0xff] }
   0x4   :  { %v6194_v23 = vpack.c.bf16 %v258_v19, %v257_v18  ;;  %v6198_v29 = vpack.c.bf16 %v260_v25, %v259_v24  ;;  %v261_v30 = vld [vmem:[%s9252_s6 + $0x40] sm:$0xff]  ;;  %v262_v31 = vld [vmem:[%s9252_s6 + $0x48] sm:$0xff]  ;;  %v263_v37 = vld [vmem:[%s9252_s6 + $0x50] sm:$0xff] }
   0x5   :  { %6187 = vmatprep.subr.bf16.mxu1 %v6186_v14  ;;  %v237_v32 = vld [vmem:[%s9253_s3] sm:$0xff]  ;;  %v6202_v36 = vpack.c.bf16 %v262_v31, %v261_v30  ;;  %v264_v38 = vld [vmem:[%s9252_s6 + $0x58] sm:$0xff]  ;;  %v266_v44 = vld [vmem:[%s9252_s6 + $0x68] sm:$0xff] }
   0x6   :  { %6189 = vmatpush3.bf16.msra.mxu1 %v6186_v14  ;;  %5052 = vmatprep.mubr.f32.mxu1 %v237_v32  ;;  %v6206_v42 = vpack.c.bf16 %v264_v38, %v263_v37  ;;  %v265_v43 = vld [vmem:[%s9252_s6 + $0x60] sm:$0xff]  ;;  %v267_v47 = vld [vmem:[%s9252_s6 + $0x70] sm:$0xff]  ;;  %v268_v48 = vld [vmem:[%s9252_s6 + $0x78] sm:$0xff] }
   0x7   :  { %6191 = vmatprep.subr.bf16.mxu1 %v6190_v17  ;;  %v6210_v46 = vpack.c.bf16 %v266_v44, %v265_v43  ;;  %v6214_v49 = vpack.c.bf16 %v268_v48, %v267_v47  ;;  %v54_v50 = vld [vmem:[%s9251_s2 + $0x8] sm:$0xff]  ;;  %v55_v51 = vld [vmem:[%s9251_s2 + $0x10] sm:$0xff]  ;;  %v56_v52 = vld [vmem:[%s9251_s2 + $0x18] sm:$0xff] }
   0x8   :  { %v69_v0 = vld [vmem:[%s9269_s23] sm:$0xff]  ;;  %v70_v1 = vld [vmem:[%s9269_s23 + $0x8] sm:$0xff]  ;;  %v71_v2 = vld [vmem:[%s9269_s23 + $0x10] sm:$0xff] }
   0x9   :  { %v6154_v3 = vpack.c.bf16 %v70_v1, %v69_v0  ;;  %v72_v4 = vld [vmem:[%s9269_s23 + $0x18] sm:$0xff]  ;;  %v73_v6 = vld [vmem:[%s9269_s23 + $0x20] sm:$0xff]  ;;  %v74_v7 = vld [vmem:[%s9269_s23 + $0x28] sm:$0xff] }
   0xa   :  { %v6158_v5 = vpack.c.bf16 %v72_v4, %v71_v2  ;;  %v6162_v8 = vpack.c.bf16 %v74_v7, %v73_v6  ;;  %v75_v11 = vld [vmem:[%s9269_s23 + $0x30] sm:$0xff]  ;;  %v76_v12 = vld [vmem:[%s9269_s23 + $0x38] sm:$0xff]  ;;  %v77_v21 = vld [vmem:[%s9269_s23 + $0x40] sm:$0xff]  ;;  %6193 = vmatpush3.bf16.msra.mxu1 %v6190_v17 }
   0xb   :  { %6155 = vmatprep.subr.bf16.mxu0 %v6154_v3  ;;  %v6166_v20 = vpack.c.bf16 %v76_v12, %v75_v11  ;;  %v78_v22 = vld [vmem:[%s9269_s23 + $0x48] sm:$0xff]  ;;  %v79_v27 = vld [vmem:[%s9269_s23 + $0x50] sm:$0xff]  ;;  %v80_v28 = vld [vmem:[%s9269_s23 + $0x58] sm:$0xff]  ;;  %6195 = vmatprep.subr.bf16.mxu1 %v6194_v23 }
   0xc   :  { %6157 = vmatpush3.bf16.msra.mxu0 %v6154_v3  ;;  %v6170_v26 = vpack.c.bf16 %v78_v22, %v77_v21  ;;  %v6174_v33 = vpack.c.bf16 %v80_v28, %v79_v27  ;;  %v81_v34 = vld [vmem:[%s9269_s23 + $0x60] sm:$0xff]  ;;  %v82_v35 = vld [vmem:[%s9269_s23 + $0x68] sm:$0xff]  ;;  %v83_v40 = vld [vmem:[%s9269_s23 + $0x70] sm:$0xff] }
   0xd   :  { %6159 = vmatprep.subr.bf16.mxu0 %v6158_v5  ;;  %v6178_v39 = vpack.c.bf16 %v82_v35, %v81_v34  ;;  %v84_v41 = vld [vmem:[%s9269_s23 + $0x78] sm:$0xff]  ;;  %v57_v53 = vld [vmem:[%s9251_s2 + $0x20] sm:$0xff]  ;;  %v238_v54 = vld [vmem:[%s9253_s3 + $0x8] sm:$0xff] }
   0xe   :  { %6197 = vmatpush3.bf16.msra.mxu1 %v6194_v23  ;;  %v6182_v45 = vpack.c.bf16 %v84_v41, %v83_v40  ;;  %v239_v55 = vld [vmem:[%s9253_s3 + $0x10] sm:$0xff]  ;;  %v58_v56 = vld [vmem:[%s9251_s2 + $0x28] sm:$0xff]  ;;  %v240_v58 = vld [vmem:[%s9253_s3 + $0x18] sm:$0xff] }
   0xf   :  { %6199 = vmatprep.subr.bf16.mxu1 %v6198_v29  ;;  %v59_v57 = vld [vmem:[%s9251_s2 + $0x30] sm:$0xff]  ;;  %v241_v59 = vld [vmem:[%s9253_s3 + $0x20] sm:$0xff]  ;;  %v60_v60 = vld [vmem:[%s9251_s2 + $0x38] sm:$0xff] }
  0x10   :  { %6161 = vmatpush3.bf16.msra.mxu0 %v6158_v5  ;;  %v61_v61 = vld [vmem:[%s9251_s2 + $0x40] sm:$0xff]  ;;  %v242_v62 = vld [vmem:[%s9253_s3 + $0x28] sm:$0xff]  ;;  %v243_v63 = vld [vmem:[%s9253_s3 + $0x30] sm:$0xff] }
  0x11   :  { %6163 = vmatprep.subr.bf16.mxu0 %v6162_v8  ;;  %v62_v0 = vld [vmem:[%s9251_s2 + $0x48] sm:$0xff]  ;;  %v63_v1 = vld [vmem:[%s9251_s2 + $0x50] sm:$0xff]  ;;  %v244_v2 = vld [vmem:[%s9253_s3 + $0x38] sm:$0xff] }
  0x12   :  { %6201 = vmatpush3.bf16.msra.mxu1 %v6198_v29  ;;  %v245_v3 = vld [vmem:[%s9253_s3 + $0x40] sm:$0xff]  ;;  %v64_v4 = vld [vmem:[%s9251_s2 + $0x58] sm:$0xff]  ;;  %v246_v6 = vld [vmem:[%s9253_s3 + $0x48] sm:$0xff] }
  0x13   :  { %6203 = vmatprep.subr.bf16.mxu1 %v6202_v36  ;;  %v65_v5 = vld [vmem:[%s9251_s2 + $0x60] sm:$0xff]  ;;  %v247_v7 = vld [vmem:[%s9253_s3 + $0x50] sm:$0xff]  ;;  %v248_v10 = vld [vmem:[%s9253_s3 + $0x58] sm:$0xff] }
  0x14   :  { %6165 = vmatpush3.bf16.msra.mxu0 %v6162_v8  ;;  %v66_v8 = vld [vmem:[%s9251_s2 + $0x68] sm:$0xff]  ;;  %v67_v9 = vld [vmem:[%s9251_s2 + $0x70] sm:$0xff]  ;;  %v249_v11 = vld [vmem:[%s9253_s3 + $0x60] sm:$0xff] }
  0x15   :  { %6167 = vmatprep.subr.bf16.mxu0 %v6166_v20  ;;  %v68_v12 = vld [vmem:[%s9251_s2 + $0x78] sm:$0xff]  ;;  %v250_v13 = vld [vmem:[%s9253_s3 + $0x68] sm:$0xff]  ;;  %v251_v14 = vld [vmem:[%s9253_s3 + $0x70] sm:$0xff] }
  0x16   :  { %6205 = vmatpush3.bf16.msra.mxu1 %v6202_v36  ;;  %v252_v15 = vld [vmem:[%s9253_s3 + $0x78] sm:$0xff]  ;;  %v7520_v16 = vld [vmem:[%s9254_s0] sm:$0xff]  ;;  %v454_v18 = vld [vmem:[%s9255_s8 + $0x8] sm:$0xff] }
  0x17   :  { %6207 = vmatprep.subr.bf16.mxu1 %v6206_v42  ;;  %v453_v17 = vld [vmem:[%s9255_s8] sm:$0xff]  ;;  %v455_v19 = vld [vmem:[%s9255_s8 + $0x10] sm:$0xff]  ;;  %v456_v21 = vld [vmem:[%s9255_s8 + $0x18] sm:$0xff] }
  0x18   :  { %6169 = vmatpush3.bf16.msra.mxu0 %v6166_v20  ;;  %v6250_v20 = vpack.c.bf16 %v454_v18, %v453_v17  ;;  %v6254_v22 = vpack.c.bf16 %v456_v21, %v455_v19  ;;  %v457_v23 = vld [vmem:[%s9255_s8 + $0x20] sm:$0xff]  ;;  %v458_v24 = vld [vmem:[%s9255_s8 + $0x28] sm:$0xff]  ;;  %v460_v27 = vld [vmem:[%s9255_s8 + $0x38] sm:$0xff] }
  0x19   :  { %6171 = vmatprep.subr.bf16.mxu0 %v6170_v26  ;;  %v6258_v25 = vpack.c.bf16 %v458_v24, %v457_v23  ;;  %v461_v29 = vld [vmem:[%s9255_s8 + $0x40] sm:$0xff]  ;;  %v462_v30 = vld [vmem:[%s9255_s8 + $0x48] sm:$0xff]  ;;  %v463_v32 = vld [vmem:[%s9255_s8 + $0x50] sm:$0xff] }
  0x1a   :  { %6209 = vmatpush3.bf16.msra.mxu1 %v6206_v42  ;;  %v6266_v31 = vpack.c.bf16 %v462_v30, %v461_v29  ;;  %v465_v35 = vld [vmem:[%s9255_s8 + $0x60] sm:$0xff]  ;;  %v466_v36 = vld [vmem:[%s9255_s8 + $0x68] sm:$0xff]  ;;  %v467_v38 = vld [vmem:[%s9255_s8 + $0x70] sm:$0xff] }
  0x1b   :  { %6211 = vmatprep.subr.bf16.mxu1 %v6210_v46  ;;  %v6274_v37 = vpack.c.bf16 %v466_v36, %v465_v35  ;;  %v7574_v41 = vld [vmem:[%s9256_s5] ss:$0 sm:$0xff] }
  0x1c   :  { %6173 = vmatpush3.bf16.msra.mxu0 %v6170_v26  ;;  %v459_v26 = vld [vmem:[%s9255_s8 + $0x30] sm:$0xff] }
  0x1d   :  { %6175 = vmatprep.subr.bf16.mxu0 %v6174_v33  ;;  %v6262_v28 = vpack.c.bf16 %v460_v27, %v459_v26 }
  0x1e   :  { %6213 = vmatpush3.bf16.msra.mxu1 %v6210_v46 }
  0x1f   :  { %6215 = vmatprep.subr.bf16.mxu1 %v6214_v49 }
  0x20   :  { %6177 = vmatpush3.bf16.msra.mxu0 %v6174_v33  ;;  %v464_v33 = vld [vmem:[%s9255_s8 + $0x58] sm:$0xff] }
  0x21   :  { %6179 = vmatprep.subr.bf16.mxu0 %v6178_v39  ;;  %v6270_v34 = vpack.c.bf16 %v464_v33, %v463_v32 }
  0x22   :  { %6217 = vmatpush3.bf16.msra.mxu1 %v6214_v49 }
  0x23   :  { %6251 = vmatprep.subr.bf16.mxu1 %v6250_v20 }
  0x24   :  { %6181 = vmatpush3.bf16.msra.mxu0 %v6178_v39  ;;  %v468_v39 = vld [vmem:[%s9255_s8 + $0x78] sm:$0xff] }
  0x25   :  { %6183 = vmatprep.subr.bf16.mxu0 %v6182_v45  ;;  %5053 = vmatmul.mubr.f32.vlgmr.msra.gmra.mrb[0].mxu1 %v238_v54  ;;  %v6278_v40 = vpack.c.bf16 %v468_v39, %v467_v38 }
  0x26   :  { %5055 = vmatprep.mubr.f32.mxu1 %v239_v55  ;;  %6253 = vmatpush3.bf16.msra.mxu1 %v6250_v20 }
  0x27   :  { %6255 = vmatprep.subr.bf16.mxu1 %v6254_v22 }
  0x28   :  { %6185 = vmatpush3.bf16.msra.mxu0 %v6182_v45 }
  0x29   :  { %5056 = vmatmul.mubr.f32.gmra.mrb[2].mxu1 %v240_v58 }
  0x2a   :  { %5058 = vmatprep.mubr.f32.mxu1 %v241_v59  ;;  %6257 = vmatpush3.bf16.msra.mxu1 %v6254_v22  ;;  %v7630_v22 = vld [vmem:[%s9257_s7] ss:$0 sm:$0xff] }
  0x2b   :  { %4997 = vmatmul.mubr.f32.vlgmr.msra.gmra.mrb[0].mxu0 %v54_v50  ;;  %6259 = vmatprep.subr.bf16.mxu1 %v6258_v25 }
  0x2c   :  { %4999 = vmatprep.mubr.f32.mxu0 %v55_v51 }
  0x2d   :  { %5059 = vmatmul.mubr.f32.gmra.mrb[4].mxu1 %v242_v62 }
  0x2e   :  { %5061 = vmatprep.mubr.f32.mxu1 %v243_v63  ;;  %6261 = vmatpush3.bf16.msra.mxu1 %v6258_v25 }
  0x2f   :  { %5000 = vmatmul.mubr.f32.gmra.mrb[2].mxu0 %v56_v52  ;;  %6263 = vmatprep.subr.bf16.mxu1 %v6262_v28 }
  0x30   :  { %5002 = vmatprep.mubr.f32.mxu0 %v57_v53 }
  0x31   :  { %5062 = vmatmul.mubr.f32.gmra.mrb[6].mxu1 %v244_v2 }
  0x32   :  { %5064 = vmatprep.mubr.f32.mxu1 %v245_v3  ;;  %6265 = vmatpush3.bf16.msra.mxu1 %v6262_v28 }
  0x33   :  { %5003 = vmatmul.mubr.f32.gmra.mrb[4].mxu0 %v58_v56  ;;  %6267 = vmatprep.subr.bf16.mxu1 %v6266_v31 }
  0x34   :  { %5005 = vmatprep.mubr.f32.mxu0 %v59_v57 }
  0x35   :  { %5065 = vmatmul.mubr.f32.gmra.mrb[8].mxu1 %v246_v6 }
  0x36   :  { %5067 = vmatprep.mubr.f32.mxu1 %v247_v7  ;;  %6269 = vmatpush3.bf16.msra.mxu1 %v6266_v31 }
  0x37   :  { %5006 = vmatmul.mubr.f32.gmra.mrb[6].mxu0 %v60_v60  ;;  %6271 = vmatprep.subr.bf16.mxu1 %v6270_v34 }
  0x38   :  { %5008 = vmatprep.mubr.f32.mxu0 %v61_v61 }
  0x39   :  { %5068 = vmatmul.mubr.f32.gmra.mrb[10].mxu1 %v248_v10 }
  0x3a   :  { %5070 = vmatprep.mubr.f32.mxu1 %v249_v11  ;;  %6273 = vmatpush3.bf16.msra.mxu1 %v6270_v34 }
  0x3b   :  { %5009 = vmatmul.mubr.f32.gmra.mrb[8].mxu0 %v62_v0  ;;  %6275 = vmatprep.subr.bf16.mxu1 %v6274_v37 }
  0x3c   :  { %5011 = vmatprep.mubr.f32.mxu0 %v63_v1 }
  0x3d   :  { %5071 = vmatmul.mubr.f32.gmra.mrb[12].mxu1 %v250_v13 }
  0x3e   :  { %5073 = vmatprep.mubr.f32.mxu1 %v251_v14  ;;  %6277 = vmatpush3.bf16.msra.mxu1 %v6274_v37 }
  0x3f   :  { %5012 = vmatmul.mubr.f32.gmra.mrb[10].mxu0 %v64_v4  ;;  %6279 = vmatprep.subr.bf16.mxu1 %v6278_v40 }
  0x40   :  { %5014 = vmatprep.mubr.f32.mxu0 %v65_v5 }
  0x41   :  { %5074 = vmatmul.mubr.f32.gmra.mrb[14].mxu1 %v252_v15 }
  0x42   :  { %6281 = vmatpush3.bf16.msra.mxu1 %v6278_v40  ;;  %v422_v40 = vld [vmem:[%s9254_s0 + $0x8] sm:$0xff] }
  0x43   :  { %5015 = vmatmul.mubr.f32.gmra.mrb[12].mxu0 %v66_v8 }
  0x44   :  { %5017 = vmatprep.mubr.f32.mxu0 %v67_v9 }
  0x47   :  { %5018 = vmatmul.mubr.f32.gmra.mrb[14].mxu0 %v68_v12 }
  0x48   :  { %5108 = vmatprep.mubr.f32.mxu0 %v7520_v16 }
  0xf8   :  { %v5054_v51 = vpop.f32.mrb[0].mxu1 }
  0xf9   :  { %v342_v52 = vpop.f32.mrb[1].mxu1  ;;  %v7638_v28 = vadd.f32 %v5054_v51, %v7630_v22 }
  0xfa   :  { %v7641_v29 = vadd.f32 %v7630_v22, %v342_v52 }
  0xfc   :  { %v5057_v58 = vpop.f32.mrb[2].mxu1  ;;  %v6314_v36 = vpack.c.bf16 %v7638_v28, %v7641_v29 }
  0xfd   :  { %v352_v59 = vpop.f32.mrb[3].mxu1  ;;  %v7654_v37 = vadd.f32 %v5057_v58, %v7630_v22 }
  0xfe   :  { %v4998_v42 = vpop.f32.mrb[0].mxu0  ;;  %v7657_v38 = vadd.f32 %v7630_v22, %v352_v59 }
  0xff   :  { %v7577_v43 = vadd.f32 %v4998_v42, %v7574_v41  ;;  %v158_v44 = vpop.f32.mrb[1].mxu0 }
 0x100   :  { %v7580_v45 = vadd.f32 %v7574_v41, %v158_v44  ;;  %v5060_v1 = vpop.f32.mrb[4].mxu1  ;;  %v6318_v42 = vpack.c.bf16 %v7654_v37, %v7657_v38 }
 0x101   :  { %v362_v2 = vpop.f32.mrb[5].mxu1  ;;  %v7665_v44 = vadd.f32 %v5060_v1, %v7630_v22 }
 0x102   :  { %v6218_v46 = vpack.c.bf16 %v7577_v43, %v7580_v45  ;;  %v5001_v47 = vpop.f32.mrb[2].mxu0 }
 0x103   :  { %v7585_v48 = vadd.f32 %v5001_v47, %v7574_v41  ;;  %v168_v49 = vpop.f32.mrb[3].mxu0  ;;  %v423_v47 = vld [vmem:[%s9254_s0 + $0x10] sm:$0xff] }
 0x104   :  { %v7588_v50 = vadd.f32 %v7574_v41, %v168_v49  ;;  %6219 = vmatprep.subr.bf16.mxu0 %v6218_v46  ;;  %v5063_v8 = vpop.f32.mrb[6].mxu1  ;;  %v424_v49 = vld [vmem:[%s9254_s0 + $0x18] sm:$0xff] }
 0x105   :  { %6221 = vmatpush3.bf16.msra.mxu0 %v6218_v46  ;;  %v372_v9 = vpop.f32.mrb[7].mxu1  ;;  %v7668_v46 = vadd.f32 %v7630_v22, %v362_v2  ;;  %v7679_v52 = vadd.f32 %v5063_v8, %v7630_v22 }
 0x106   :  { %v6222_v53 = vpack.c.bf16 %v7585_v48, %v7588_v50  ;;  %v5004_v54 = vpop.f32.mrb[4].mxu0 }
 0x107   :  { %v7593_v55 = vadd.f32 %v5004_v54, %v7574_v41  ;;  %v178_v56 = vpop.f32.mrb[5].mxu0  ;;  %v6322_v51 = vpack.c.bf16 %v7665_v44, %v7668_v46  ;;  %v425_v54 = vld [vmem:[%s9254_s0 + $0x20] sm:$0xff] }
 0x108   :  { %v7596_v57 = vadd.f32 %v7574_v41, %v178_v56  ;;  %6223 = vmatprep.subr.bf16.mxu0 %v6222_v53  ;;  %v5066_v15 = vpop.f32.mrb[8].mxu1  ;;  %v426_v56 = vld [vmem:[%s9254_s0 + $0x28] sm:$0xff] }
 0x109   :  { %6225 = vmatpush3.bf16.msra.mxu0 %v6222_v53  ;;  %v382_v17 = vpop.f32.mrb[9].mxu1  ;;  %v7682_v53 = vadd.f32 %v7630_v22, %v372_v9  ;;  %v7693_v59 = vadd.f32 %v5066_v15, %v7630_v22 }
 0x10a   :  { %v6226_v60 = vpack.c.bf16 %v7593_v55, %v7596_v57  ;;  %v5007_v61 = vpop.f32.mrb[6].mxu0 }
 0x10b   :  { %v7601_v62 = vadd.f32 %v5007_v61, %v7574_v41  ;;  %v188_v63 = vpop.f32.mrb[7].mxu0  ;;  %v6326_v58 = vpack.c.bf16 %v7679_v52, %v7682_v53  ;;  %v427_v61 = vld [vmem:[%s9254_s0 + $0x30] sm:$0xff] }
 0x10c   :  { %v7604_v0 = vadd.f32 %v7574_v41, %v188_v63  ;;  %6227 = vmatprep.subr.bf16.mxu0 %v6226_v60  ;;  %v5069_v24 = vpop.f32.mrb[10].mxu1  ;;  %v428_v63 = vld [vmem:[%s9254_s0 + $0x38] sm:$0xff] }
 0x10d   :  { %6229 = vmatpush3.bf16.msra.mxu0 %v6226_v60  ;;  %v392_v25 = vpop.f32.mrb[11].mxu1  ;;  %v7696_v60 = vadd.f32 %v7630_v22, %v382_v17  ;;  %v7707_v2 = vadd.f32 %v5069_v24, %v7630_v22 }
 0x10e   :  { %v6230_v3 = vpack.c.bf16 %v7601_v62, %v7604_v0  ;;  %v5010_v4 = vpop.f32.mrb[8].mxu0 }
 0x10f   :  { %v7609_v5 = vadd.f32 %v5010_v4, %v7574_v41  ;;  %v198_v6 = vpop.f32.mrb[9].mxu0  ;;  %v6330_v1 = vpack.c.bf16 %v7693_v59, %v7696_v60  ;;  %v429_v4 = vld [vmem:[%s9254_s0 + $0x40] sm:$0xff] }
 0x110   :  { %v7612_v7 = vadd.f32 %v7574_v41, %v198_v6  ;;  %6231 = vmatprep.subr.bf16.mxu0 %v6230_v3  ;;  %v5072_v33 = vpop.f32.mrb[12].mxu1  ;;  %v430_v6 = vld [vmem:[%s9254_s0 + $0x48] sm:$0xff] }
 0x111   :  { %6233 = vmatpush3.bf16.msra.mxu0 %v6230_v3  ;;  %v402_v34 = vpop.f32.mrb[13].mxu1  ;;  %v7710_v3 = vadd.f32 %v7630_v22, %v392_v25  ;;  %v7721_v9 = vadd.f32 %v5072_v33, %v7630_v22  ;;  %v436_v25 = vld [vmem:[%s9254_s0 + $0x78] sm:$0xff] }
 0x112   :  { %v6234_v10 = vpack.c.bf16 %v7609_v5, %v7612_v7  ;;  %v5013_v11 = vpop.f32.mrb[10].mxu0  ;;  %v440_v33 = vld [vmem:[%s9258_s1 + $0x18] sm:$0xff] }
 0x113   :  { %v7617_v12 = vadd.f32 %v5013_v11, %v7574_v41  ;;  %v208_v13 = vpop.f32.mrb[11].mxu0  ;;  %v6334_v8 = vpack.c.bf16 %v7707_v2, %v7710_v3  ;;  %v431_v11 = vld [vmem:[%s9254_s0 + $0x50] sm:$0xff] }
 0x114   :  { %v7620_v14 = vadd.f32 %v7574_v41, %v208_v13  ;;  %6235 = vmatprep.subr.bf16.mxu0 %v6234_v10  ;;  %v5075_v39 = vpop.f32.mrb[14].mxu1  ;;  %v432_v13 = vld [vmem:[%s9254_s0 + $0x58] sm:$0xff] }
 0x115   :  { %6237 = vmatpush3.bf16.msra.mxu0 %v6234_v10  ;;  %v7724_v10 = vadd.f32 %v7630_v22, %v402_v34  ;;  %v7735_v17 = vadd.f32 %v5075_v39, %v7630_v22  ;;  %v441_v34 = vld [vmem:[%s9258_s1 + $0x20] sm:$0xff]  ;;  %v444_v39 = vld [vmem:[%s9258_s1 + $0x38] sm:$0xff] }
 0x116   :  { %v6238_v18 = vpack.c.bf16 %v7617_v12, %v7620_v14  ;;  %v5016_v19 = vpop.f32.mrb[12].mxu0 }
 0x117   :  { %v7625_v20 = vadd.f32 %v5016_v19, %v7574_v41  ;;  %v218_v21 = vpop.f32.mrb[13].mxu0  ;;  %v6338_v15 = vpack.c.bf16 %v7721_v9, %v7724_v10  ;;  %v433_v19 = vld [vmem:[%s9254_s0 + $0x60] sm:$0xff] }
 0x118   :  { %v7633_v23 = vadd.f32 %v7574_v41, %v218_v21  ;;  %6239 = vmatprep.subr.bf16.mxu0 %v6238_v18  ;;  %v434_v21 = vld [vmem:[%s9254_s0 + $0x68] sm:$0xff] }
 0x119   :  { %6241 = vmatpush3.bf16.msra.mxu0 %v6238_v18 }
 0x11a   :  { %v6242_v26 = vpack.c.bf16 %v7625_v20, %v7633_v23  ;;  %v5019_v27 = vpop.f32.mrb[14].mxu0 }
 0x11b   :  { %v7644_v30 = vadd.f32 %v5019_v27, %v7574_v41  ;;  %v228_v31 = vpop.f32.mrb[15].mxu0  ;;  %v438_v27 = vld [vmem:[%s9258_s1 + $0x8] sm:$0xff] }
 0x11c   :  { %v7647_v32 = vadd.f32 %v7574_v41, %v228_v31  ;;  %6243 = vmatprep.subr.bf16.mxu0 %v6242_v26  ;;  %v412_v41 = vpop.f32.mrb[15].mxu1  ;;  %v439_v31 = vld [vmem:[%s9258_s1 + $0x10] sm:$0xff] }
 0x11d   :  { %6245 = vmatpush3.bf16.msra.mxu0 %v6242_v26  ;;  %v7738_v18 = vadd.f32 %v7630_v22, %v412_v41  ;;  %v435_v22 = vld [vmem:[%s9254_s0 + $0x70] sm:$0xff]  ;;  %v7757_v26 = vld [vmem:[%s9258_s1] sm:$0xff]  ;;  %v446_v41 = vld [vmem:[%s9258_s1 + $0x48] sm:$0xff] }
 0x11e   :  { %v6246_v35 = vpack.c.bf16 %v7644_v30, %v7647_v32 }
 0x11f   :  { %v6342_v24 = vpack.c.bf16 %v7735_v17, %v7738_v18 }
 0x120   :  { %6247 = vmatprep.subr.bf16.mxu0 %v6246_v35 }
 0x121   :  { %6249 = vmatpush3.bf16.msra.mxu0 %v6246_v35  ;;  %v442_v35 = vld [vmem:[%s9258_s1 + $0x28] sm:$0xff] }
 0x122   :  { %6315 = vmatprep.subr.bf16.mxu0 %v6314_v36 }
 0x124   :  { %5109 = vmatmul.mubr.f32.vlgmr.msra.gmra.mrb[16].mxu0 %v422_v40  ;;  %v445_v40 = vld [vmem:[%s9258_s1 + $0x40] sm:$0xff] }
 0x125   :  { %6317 = vmatpush3.bf16.msra.mxu0 %v6314_v36  ;;  %5111 = vmatprep.mubr.f32.mxu0 %v423_v47  ;;  %v443_v36 = vld [vmem:[%s9258_s1 + $0x30] sm:$0xff]  ;;  %v448_v47 = vld [vmem:[%s9258_s1 + $0x58] sm:$0xff] }
 0x126   :  { %6319 = vmatprep.subr.bf16.mxu0 %v6318_v42 }
 0x128   :  { %5112 = vmatmul.mubr.f32.gmra.mrb[18].mxu0 %v424_v49  ;;  %v449_v49 = vld [vmem:[%s9258_s1 + $0x60] sm:$0xff] }
 0x129   :  { %6321 = vmatpush3.bf16.msra.mxu0 %v6318_v42  ;;  %5114 = vmatprep.mubr.f32.mxu0 %v425_v54  ;;  %v447_v42 = vld [vmem:[%s9258_s1 + $0x50] sm:$0xff] }
 0x12a   :  { %6323 = vmatprep.subr.bf16.mxu0 %v6322_v51  ;;  %v451_v54 = vld [vmem:[%s9258_s1 + $0x70] sm:$0xff] }
 0x12c   :  { %5115 = vmatmul.mubr.f32.gmra.mrb[20].mxu0 %v426_v56  ;;  %v452_v56 = vld [vmem:[%s9258_s1 + $0x78] sm:$0xff] }
 0x12d   :  { %6325 = vmatpush3.bf16.msra.mxu0 %v6322_v51  ;;  %5117 = vmatprep.mubr.f32.mxu0 %v427_v61  ;;  %v450_v51 = vld [vmem:[%s9258_s1 + $0x68] sm:$0xff] }
 0x12e   :  { %6327 = vmatprep.subr.bf16.mxu0 %v6326_v58  ;;  %v471_v61 = vld [vmem:[%s9259_s10 + $0x8] sm:$0xff] }
 0x130   :  { %5118 = vmatmul.mubr.f32.gmra.mrb[22].mxu0 %v428_v63  ;;  %v1087_v63 = vld [vmem:[%s9260_s11] sm:$0xff] }
 0x131   :  { %6329 = vmatpush3.bf16.msra.mxu0 %v6326_v58  ;;  %5120 = vmatprep.mubr.f32.mxu0 %v429_v4  ;;  %v470_v58 = vld [vmem:[%s9259_s10] sm:$0xff]  ;;  %v1088_v4 = vld [vmem:[%s9260_s11 + $0x8] sm:$0xff] }
 0x132   :  { %6331 = vmatprep.subr.bf16.mxu0 %v6330_v1 }
 0x134   :  { %5121 = vmatmul.mubr.f32.gmra.mrb[24].mxu0 %v430_v6  ;;  %v6346_v6 = vpack.c.bf16 %v1088_v4, %v1087_v63 }
 0x135   :  { %6333 = vmatpush3.bf16.msra.mxu0 %v6330_v1  ;;  %5123 = vmatprep.mubr.f32.mxu0 %v431_v11  ;;  %v6282_v1 = vpack.c.bf16 %v471_v61, %v470_v58  ;;  %v1090_v11 = vld [vmem:[%s9260_s11 + $0x18] sm:$0xff]  ;;  %v472_v58 = vld [vmem:[%s9259_s10 + $0x10] sm:$0xff] }
 0x136   :  { %6335 = vmatprep.subr.bf16.mxu0 %v6334_v8  ;;  %v473_v61 = vld [vmem:[%s9259_s10 + $0x18] sm:$0xff] }
 0x137   :  { %6283 = vmatprep.subr.bf16.mxu1 %v6282_v1 }
 0x138   :  { %5124 = vmatmul.mubr.f32.gmra.mrb[26].mxu0 %v432_v13 }
 0x139   :  { %6337 = vmatpush3.bf16.msra.mxu0 %v6334_v8  ;;  %5126 = vmatprep.mubr.f32.mxu0 %v433_v19  ;;  %v1089_v8 = vld [vmem:[%s9260_s11 + $0x10] sm:$0xff]  ;;  %v1092_v19 = vld [vmem:[%s9260_s11 + $0x28] sm:$0xff] }
 0x13a   :  { %6339 = vmatprep.subr.bf16.mxu0 %v6338_v15  ;;  %v6350_v13 = vpack.c.bf16 %v1090_v11, %v1089_v8  ;;  %v474_v8 = vld [vmem:[%s9259_s10 + $0x20] sm:$0xff]  ;;  %v475_v11 = vld [vmem:[%s9259_s10 + $0x28] sm:$0xff] }
 0x13c   :  { %5127 = vmatmul.mubr.f32.gmra.mrb[28].mxu0 %v434_v21 }
 0x13d   :  { %6341 = vmatpush3.bf16.msra.mxu0 %v6338_v15  ;;  %5129 = vmatprep.mubr.f32.mxu0 %v435_v22  ;;  %v1091_v15 = vld [vmem:[%s9260_s11 + $0x20] sm:$0xff]  ;;  %v1094_v22 = vld [vmem:[%s9260_s11 + $0x38] sm:$0xff] }
 0x13e   :  { %6343 = vmatprep.subr.bf16.mxu0 %v6342_v24  ;;  %v6354_v21 = vpack.c.bf16 %v1092_v19, %v1091_v15  ;;  %v6290_v19 = vpack.c.bf16 %v475_v11, %v474_v8 }
 0x140   :  { %5130 = vmatmul.mubr.f32.gmra.mrb[30].mxu0 %v436_v25 }
 0x141   :  { %6345 = vmatpush3.bf16.msra.mxu0 %v6342_v24  ;;  %5276 = vmatprep.mubr.f32.mxu0 %v7757_v26  ;;  %v1093_v24 = vld [vmem:[%s9260_s11 + $0x30] sm:$0xff] }
 0x142   :  { %6347 = vmatprep.subr.bf16.mxu0 %v6346_v6  ;;  %v6358_v25 = vpack.c.bf16 %v1094_v22, %v1093_v24  ;;  %v477_v24 = vld [vmem:[%s9259_s10 + $0x38] sm:$0xff] }
 0x144   :  { %5277 = vmatmul.mubr.f32.vlgmr.msra.gmra.mrb[32].mxu0 %v438_v27  ;;  %v1095_v27 = vld [vmem:[%s9260_s11 + $0x40] sm:$0xff] }
 0x145   :  { %5279 = vmatprep.mubr.f32.mxu0 %v439_v31  ;;  %6349 = vmatpush3.bf16.msra.mxu0 %v6346_v6  ;;  %v1096_v31 = vld [vmem:[%s9260_s11 + $0x48] sm:$0xff]  ;;  %v6286_v6 = vpack.c.bf16 %v473_v61, %v472_v58  ;;  %v484_v61 = vld [vmem:[%s9259_s10 + $0x70] sm:$0xff] }
 0x146   :  { %6351 = vmatprep.subr.bf16.mxu0 %v6350_v13 }
 0x148   :  { %5280 = vmatmul.mubr.f32.gmra.mrb[34].mxu0 %v440_v33  ;;  %v6362_v33 = vpack.c.bf16 %v1096_v31, %v1095_v27  ;;  %v479_v31 = vld [vmem:[%s9259_s10 + $0x48] sm:$0xff] }
 0x149   :  { %5282 = vmatprep.mubr.f32.mxu0 %v441_v34  ;;  %6353 = vmatpush3.bf16.msra.mxu0 %v6350_v13  ;;  %v1097_v34 = vld [vmem:[%s9260_s11 + $0x50] sm:$0xff] }
 0x14a   :  { %6355 = vmatprep.subr.bf16.mxu0 %v6354_v21 }
 0x14c   :  { %5283 = vmatmul.mubr.f32.gmra.mrb[36].mxu0 %v442_v35  ;;  %v1098_v35 = vld [vmem:[%s9260_s11 + $0x58] sm:$0xff] }
 0x14d   :  { %5285 = vmatprep.mubr.f32.mxu0 %v443_v36  ;;  %6357 = vmatpush3.bf16.msra.mxu0 %v6354_v21  ;;  %v6366_v36 = vpack.c.bf16 %v1098_v35, %v1097_v34  ;;  %v476_v21 = vld [vmem:[%s9259_s10 + $0x30] sm:$0xff] }
 0x14e   :  { %6359 = vmatprep.subr.bf16.mxu0 %v6358_v25  ;;  %v6294_v27 = vpack.c.bf16 %v477_v24, %v476_v21 }
 0x150   :  { %5286 = vmatmul.mubr.f32.gmra.mrb[38].mxu0 %v444_v39  ;;  %v1099_v39 = vld [vmem:[%s9260_s11 + $0x60] sm:$0xff] }
 0x151   :  { %5288 = vmatprep.mubr.f32.mxu0 %v445_v40  ;;  %6361 = vmatpush3.bf16.msra.mxu0 %v6358_v25  ;;  %v1100_v40 = vld [vmem:[%s9260_s11 + $0x68] sm:$0xff] }
 0x152   :  { %6363 = vmatprep.subr.bf16.mxu0 %v6362_v33 }
 0x154   :  { %5289 = vmatmul.mubr.f32.gmra.mrb[40].mxu0 %v446_v41  ;;  %v6370_v41 = vpack.c.bf16 %v1100_v40, %v1099_v39  ;;  %v481_v39 = vld [vmem:[%s9259_s10 + $0x58] sm:$0xff] }
 0x155   :  { %5291 = vmatprep.mubr.f32.mxu0 %v447_v42  ;;  %6365 = vmatpush3.bf16.msra.mxu0 %v6362_v33  ;;  %v1101_v42 = vld [vmem:[%s9260_s11 + $0x70] sm:$0xff] }
 0x156   :  { %6367 = vmatprep.subr.bf16.mxu0 %v6366_v36 }
 0x158   :  { %5292 = vmatmul.mubr.f32.gmra.mrb[42].mxu0 %v448_v47  ;;  %v1102_v47 = vld [vmem:[%s9260_s11 + $0x78] sm:$0xff] }
 0x159   :  { %5294 = vmatprep.mubr.f32.mxu0 %v449_v49  ;;  %6369 = vmatpush3.bf16.msra.mxu0 %v6366_v36  ;;  %v6374_v49 = vpack.c.bf16 %v1102_v47, %v1101_v42  ;;  %v480_v36 = vld [vmem:[%s9259_s10 + $0x50] sm:$0xff]  ;;  %v482_v47 = vld [vmem:[%s9259_s10 + $0x60] sm:$0xff] }
 0x15a   :  { %6371 = vmatprep.subr.bf16.mxu0 %v6370_v41  ;;  %v6302_v42 = vpack.c.bf16 %v481_v39, %v480_v36  ;;  %v1113_v36 = vld [vmem:[%s9261_s13 + $0x48] sm:$0xff] }
 0x15c   :  { %5295 = vmatmul.mubr.f32.gmra.mrb[44].mxu0 %v450_v51  ;;  %v1104_v51 = vld [vmem:[%s9261_s13] sm:$0xff] }
 0x15d   :  { %5297 = vmatprep.mubr.f32.mxu0 %v451_v54  ;;  %6373 = vmatpush3.bf16.msra.mxu0 %v6370_v41  ;;  %v1105_v54 = vld [vmem:[%s9261_s13 + $0x8] sm:$0xff] }
 0x15e   :  { %6375 = vmatprep.subr.bf16.mxu0 %v6374_v49 }
 0x160   :  { %5298 = vmatmul.mubr.f32.gmra.mrb[46].mxu0 %v452_v56  ;;  %v7865_v56 = vpack.c.bf16 %v1105_v54, %v1104_v51 }
 0x161   :  { %6377 = vmatpush3.bf16.msra.mxu0 %v6374_v49  ;;  %v483_v49 = vld [vmem:[%s9259_s10 + $0x68] sm:$0xff] }
 0x162   :  { %6379 = vmatprep.subr.bf16.mxu0 %v7865_v56  ;;  %v6306_v58 = vpack.c.bf16 %v483_v49, %v482_v47  ;;  %v1116_v47 = vld [vmem:[%s9261_s13 + $0x60] sm:$0xff]  ;;  %v1117_v49 = vld [vmem:[%s9261_s13 + $0x68] sm:$0xff] }
 0x1f7   :  { %v5110_v63 = vpop.f32.mrb[16].mxu0 }
 0x1f8   :  { %v552_v4 = vpop.f32.mrb[17].mxu0 }
 0x1f9   :  { %5164 = vmatprep.mubr.f32.mxu1 %v552_v4 }
 0x1fa   :  { %5165 = vmatmul.mubr.f32.vlgmr.msra.gmra.mrb[16].mxu1 %v5110_v63  ;;  %v485_v63 = vld [vmem:[%s9259_s10 + $0x78] sm:$0xff] }
 0x1fb   :  { %v5113_v13 = vpop.f32.mrb[18].mxu0  ;;  %6285 = vmatpush3.bf16.msra.mxu1 %v6282_v1  ;;  %v478_v1 = vld [vmem:[%s9259_s10 + $0x40] sm:$0xff]  ;;  %v6310_v8 = vpack.c.bf16 %v485_v63, %v484_v61 }
 0x1fc   :  { %v562_v15 = vpop.f32.mrb[19].mxu0  ;;  %6287 = vmatprep.subr.bf16.mxu1 %v6286_v6  ;;  %v6298_v35 = vpack.c.bf16 %v479_v31, %v478_v1 }
 0x1fd   :  { %5167 = vmatprep.mubr.f32.mxu1 %v562_v15  ;;  %v1106_v15 = vld [vmem:[%s9261_s13 + $0x10] sm:$0xff] }
 0x1fe   :  { %5168 = vmatmul.mubr.f32.gmra.mrb[18].mxu1 %v5113_v13 }
 0x1ff   :  { %v5116_v22 = vpop.f32.mrb[20].mxu0  ;;  %6289 = vmatpush3.bf16.msra.mxu1 %v6286_v6 }
 0x200   :  { %v572_v25 = vpop.f32.mrb[21].mxu0  ;;  %6291 = vmatprep.subr.bf16.mxu1 %v6290_v19 }
 0x201   :  { %5170 = vmatprep.mubr.f32.mxu1 %v572_v25  ;;  %v1108_v25 = vld [vmem:[%s9261_s13 + $0x20] sm:$0xff] }
 0x202   :  { %5171 = vmatmul.mubr.f32.gmra.mrb[20].mxu1 %v5116_v22 }
 0x203   :  { %v5119_v33 = vpop.f32.mrb[22].mxu0  ;;  %6293 = vmatpush3.bf16.msra.mxu1 %v6290_v19  ;;  %v1107_v19 = vld [vmem:[%s9261_s13 + $0x18] sm:$0xff] }
 0x204   :  { %v582_v34 = vpop.f32.mrb[23].mxu0  ;;  %6295 = vmatprep.subr.bf16.mxu1 %v6294_v27  ;;  %v6382_v22 = vpack.c.bf16 %v1107_v19, %v1106_v15 }
 0x205   :  { %5173 = vmatprep.mubr.f32.mxu1 %v582_v34  ;;  %v1111_v34 = vld [vmem:[%s9261_s13 + $0x38] sm:$0xff] }
 0x206   :  { %5174 = vmatmul.mubr.f32.gmra.mrb[22].mxu1 %v5119_v33  ;;  %v1110_v33 = vld [vmem:[%s9261_s13 + $0x30] sm:$0xff] }
 0x207   :  { %v5122_v40 = vpop.f32.mrb[24].mxu0  ;;  %6297 = vmatpush3.bf16.msra.mxu1 %v6294_v27  ;;  %v1109_v27 = vld [vmem:[%s9261_s13 + $0x28] sm:$0xff] }
 0x208   :  { %v592_v41 = vpop.f32.mrb[25].mxu0  ;;  %6299 = vmatprep.subr.bf16.mxu1 %v6298_v35  ;;  %v6386_v31 = vpack.c.bf16 %v1109_v27, %v1108_v25 }
 0x209   :  { %5176 = vmatprep.mubr.f32.mxu1 %v592_v41  ;;  %v1115_v41 = vld [vmem:[%s9261_s13 + $0x58] sm:$0xff] }
 0x20a   :  { %5177 = vmatmul.mubr.f32.gmra.mrb[24].mxu1 %v5122_v40  ;;  %v1114_v40 = vld [vmem:[%s9261_s13 + $0x50] sm:$0xff] }
 0x20b   :  { %v5125_v51 = vpop.f32.mrb[26].mxu0  ;;  %6301 = vmatpush3.bf16.msra.mxu1 %v6298_v35  ;;  %v1112_v35 = vld [vmem:[%s9261_s13 + $0x40] sm:$0xff] }
 0x20c   :  { %v602_v54 = vpop.f32.mrb[27].mxu0  ;;  %6303 = vmatprep.subr.bf16.mxu1 %v6302_v42  ;;  %v6394_v39 = vpack.c.bf16 %v1113_v36, %v1112_v35 }
 0x20d   :  { %5179 = vmatprep.mubr.f32.mxu1 %v602_v54  ;;  %v1118_v54 = vld [vmem:[%s9261_s13 + $0x70] sm:$0xff] }
 0x20e   :  { %5180 = vmatmul.mubr.f32.gmra.mrb[26].mxu1 %v5125_v51  ;;  %v6402_v51 = vpack.c.bf16 %v1117_v49, %v1116_v47 }
 0x20f   :  { %v5128_v4 = vpop.f32.mrb[28].mxu0  ;;  %6305 = vmatpush3.bf16.msra.mxu1 %v6302_v42  ;;  %v6398_v42 = vpack.c.bf16 %v1115_v41, %v1114_v40 }
 0x210   :  { %v612_v6 = vpop.f32.mrb[29].mxu0  ;;  %6307 = vmatprep.subr.bf16.mxu1 %v6306_v58 }
 0x211   :  { %5182 = vmatprep.mubr.f32.mxu1 %v612_v6 }
 0x212   :  { %5183 = vmatmul.mubr.f32.gmra.mrb[28].mxu1 %v5128_v4 }
 0x213   :  { %v5131_v11 = vpop.f32.mrb[30].mxu0  ;;  %6309 = vmatpush3.bf16.msra.mxu1 %v6306_v58  ;;  %v1119_v58 = vld [vmem:[%s9261_s13 + $0x78] sm:$0xff] }
 0x214   :  { %v622_v13 = vpop.f32.mrb[31].mxu0  ;;  %6311 = vmatprep.subr.bf16.mxu1 %v6310_v8  ;;  %v6406_v61 = vpack.c.bf16 %v1119_v58, %v1118_v54 }
 0x215   :  { %5185 = vmatprep.mubr.f32.mxu1 %v622_v13 }
 0x216   :  { %5186 = vmatmul.mubr.f32.gmra.mrb[30].mxu1 %v5131_v11 }
 0x217   :  { %6313 = vmatpush3.bf16.msra.mxu1 %v6310_v8  ;;  %5220 = vmatprep.mubr.f32.mxu1 %v7641_v29  ;;  %v5278_v21 = vpop.f32.mrb[32].mxu0 }
 0x218   :  { %v1186_v24 = vpop.f32.mrb[33].mxu0 }
 0x219   :  { %5332 = vmatprep.mubr.f32.mxu0 %v1186_v24 }
 0x21a   :  { %5221 = vmatmul.mubr.f32.vlgmr.msra.gmra.mrb[16].mxu1 %v7638_v28  ;;  %5333 = vmatmul.mubr.f32.vlgmr.msra.gmra.mrb[48].mxu0 %v5278_v21 }
 0x21b   :  { %5223 = vmatprep.mubr.f32.mxu1 %v7657_v38  ;;  %v5281_v1 = vpop.f32.mrb[34].mxu0  ;;  %6381 = vmatpush3.bf16.msra.mxu0 %v7865_v56  ;;  %v6390_v56 = vpack.c.bf16 %v1111_v34, %v1110_v33 }
 0x21c   :  { %v1196_v29 = vpop.f32.mrb[35].mxu0  ;;  %6383 = vmatprep.subr.bf16.mxu0 %v6382_v22 }
 0x21d   :  { %5335 = vmatprep.mubr.f32.mxu0 %v1196_v29 }
 0x21e   :  { %5224 = vmatmul.mubr.f32.gmra.mrb[18].mxu1 %v7654_v37  ;;  %5336 = vmatmul.mubr.f32.gmra.mrb[50].mxu0 %v5281_v1 }
 0x21f   :  { %5226 = vmatprep.mubr.f32.mxu1 %v7668_v46  ;;  %v5284_v28 = vpop.f32.mrb[36].mxu0  ;;  %6385 = vmatpush3.bf16.msra.mxu0 %v6382_v22 }
 0x220   :  { %v1206_v38 = vpop.f32.mrb[37].mxu0  ;;  %6387 = vmatprep.subr.bf16.mxu0 %v6386_v31 }
 0x221   :  { %5338 = vmatprep.mubr.f32.mxu0 %v1206_v38 }
 0x222   :  { %5227 = vmatmul.mubr.f32.gmra.mrb[20].mxu1 %v7665_v44  ;;  %5339 = vmatmul.mubr.f32.gmra.mrb[52].mxu0 %v5284_v28 }
 0x223   :  { %5229 = vmatprep.mubr.f32.mxu1 %v7682_v53  ;;  %v5287_v37 = vpop.f32.mrb[38].mxu0  ;;  %6389 = vmatpush3.bf16.msra.mxu0 %v6386_v31 }
 0x224   :  { %v1216_v46 = vpop.f32.mrb[39].mxu0  ;;  %6391 = vmatprep.subr.bf16.mxu0 %v6390_v56 }
 0x225   :  { %5341 = vmatprep.mubr.f32.mxu0 %v1216_v46 }
 0x226   :  { %5230 = vmatmul.mubr.f32.gmra.mrb[22].mxu1 %v7679_v52  ;;  %5342 = vmatmul.mubr.f32.gmra.mrb[54].mxu0 %v5287_v37 }
 0x227   :  { %5232 = vmatprep.mubr.f32.mxu1 %v7696_v60  ;;  %v5290_v44 = vpop.f32.mrb[40].mxu0  ;;  %6393 = vmatpush3.bf16.msra.mxu0 %v6390_v56 }
 0x228   :  { %v1226_v53 = vpop.f32.mrb[41].mxu0  ;;  %6395 = vmatprep.subr.bf16.mxu0 %v6394_v39 }
 0x229   :  { %5344 = vmatprep.mubr.f32.mxu0 %v1226_v53 }
 0x22a   :  { %5233 = vmatmul.mubr.f32.gmra.mrb[24].mxu1 %v7693_v59  ;;  %5345 = vmatmul.mubr.f32.gmra.mrb[56].mxu0 %v5290_v44 }
 0x22b   :  { %5235 = vmatprep.mubr.f32.mxu1 %v7710_v3  ;;  %v5293_v52 = vpop.f32.mrb[42].mxu0  ;;  %6397 = vmatpush3.bf16.msra.mxu0 %v6394_v39 }
 0x22c   :  { %v1236_v60 = vpop.f32.mrb[43].mxu0  ;;  %6399 = vmatprep.subr.bf16.mxu0 %v6398_v42 }
 0x22d   :  { %5347 = vmatprep.mubr.f32.mxu0 %v1236_v60 }
 0x22e   :  { %5236 = vmatmul.mubr.f32.gmra.mrb[26].mxu1 %v7707_v2  ;;  %5348 = vmatmul.mubr.f32.gmra.mrb[58].mxu0 %v5293_v52 }
 0x22f   :  { %5238 = vmatprep.mubr.f32.mxu1 %v7724_v10  ;;  %v5296_v59 = vpop.f32.mrb[44].mxu0  ;;  %6401 = vmatpush3.bf16.msra.mxu0 %v6398_v42 }
 0x230   :  { %v1246_v3 = vpop.f32.mrb[45].mxu0  ;;  %6403 = vmatprep.subr.bf16.mxu0 %v6402_v51 }
 0x231   :  { %5350 = vmatprep.mubr.f32.mxu0 %v1246_v3 }
 0x232   :  { %5239 = vmatmul.mubr.f32.gmra.mrb[28].mxu1 %v7721_v9  ;;  %5351 = vmatmul.mubr.f32.gmra.mrb[60].mxu0 %v5296_v59  ;;  %v4150_v59 = vld [vmem:[%s9263_s9] ss:$0 sm:$0xff] }
 0x233   :  { %5241 = vmatprep.mubr.f32.mxu1 %v7738_v18  ;;  %v5299_v63 = vpop.f32.mrb[46].mxu0  ;;  %6405 = vmatpush3.bf16.msra.mxu0 %v6402_v51 }
 0x234   :  { %v1256_v4 = vpop.f32.mrb[47].mxu0  ;;  %6407 = vmatprep.subr.bf16.mxu0 %v6406_v61 }
 0x235   :  { %5353 = vmatprep.mubr.f32.mxu0 %v1256_v4 }
 0x236   :  { %5242 = vmatmul.mubr.f32.gmra.mrb[30].mxu1 %v7735_v17  ;;  %5354 = vmatmul.mubr.f32.gmra.mrb[62].mxu0 %v5299_v63 }
 0x237   :  { %6409 = vmatpush3.bf16.msra.mxu0 %v6406_v61  ;;  %5388 = vmatprep.mubr.f32.mxu0 %v7580_v45 }
 0x238   :  { %5444 = vmatprep.mubr.f32.mxu1 %v7520_v16 }
 0x23a   :  { %5389 = vmatmul.mubr.f32.vlgmr.msra.gmra.mrb[48].mxu0 %v7577_v43 }
 0x23b   :  { %5391 = vmatprep.mubr.f32.mxu0 %v7588_v50 }
 0x23e   :  { %5392 = vmatmul.mubr.f32.gmra.mrb[50].mxu0 %v7585_v48 }
 0x23f   :  { %5394 = vmatprep.mubr.f32.mxu0 %v7596_v57 }
 0x242   :  { %5395 = vmatmul.mubr.f32.gmra.mrb[52].mxu0 %v7593_v55 }
 0x243   :  { %5397 = vmatprep.mubr.f32.mxu0 %v7604_v0 }
 0x246   :  { %5398 = vmatmul.mubr.f32.gmra.mrb[54].mxu0 %v7601_v62 }
 0x247   :  { %5400 = vmatprep.mubr.f32.mxu0 %v7612_v7 }
 0x24a   :  { %5401 = vmatmul.mubr.f32.gmra.mrb[56].mxu0 %v7609_v5 }
 0x24b   :  { %5403 = vmatprep.mubr.f32.mxu0 %v7620_v14 }
 0x24e   :  { %5404 = vmatmul.mubr.f32.gmra.mrb[58].mxu0 %v7617_v12 }
 0x24f   :  { %5406 = vmatprep.mubr.f32.mxu0 %v7633_v23 }
 0x252   :  { %5407 = vmatmul.mubr.f32.gmra.mrb[60].mxu0 %v7625_v20 }
 0x253   :  { %5409 = vmatprep.mubr.f32.mxu0 %v7647_v32  ;;  %v4151_v32 = vld [vmem:[%s9262_s12] ss:$0 sm:$0xff] }
 0x256   :  { %5410 = vmatmul.mubr.f32.gmra.mrb[62].mxu0 %v7644_v30 }
 0x257   :  { %5612 = vmatprep.mubr.f32.mxu0 %v7757_v26 }
 0x2ed   :  { %v7987_v16 = vpop.f32.mrb[16].mxu1 }
 0x2ee   :  { %v7989_v43 = vpop.f32.mrb[17].mxu1 }
 0x2f1   :  { %v7991_v45 = vpop.f32.mrb[18].mxu1 }
 0x2f2   :  { %v7993_v48 = vpop.f32.mrb[19].mxu1 }
 0x2f5   :  { %v7995_v50 = vpop.f32.mrb[20].mxu1 }
 0x2f6   :  { %v7997_v55 = vpop.f32.mrb[21].mxu1 }
 0x2f9   :  { %v7999_v57 = vpop.f32.mrb[22].mxu1 }
 0x2fa   :  { %v8001_v62 = vpop.f32.mrb[23].mxu1 }
 0x2fd   :  { %v8003_v0 = vpop.f32.mrb[24].mxu1 }
 0x2fe   :  { %v8005_v5 = vpop.f32.mrb[25].mxu1 }
 0x301   :  { %v8007_v7 = vpop.f32.mrb[26].mxu1 }
 0x302   :  { %v8009_v12 = vpop.f32.mrb[27].mxu1 }
 0x305   :  { %v8011_v14 = vpop.f32.mrb[28].mxu1 }
 0x306   :  { %v8013_v20 = vpop.f32.mrb[29].mxu1 }
 0x309   :  { %v8015_v23 = vpop.f32.mrb[30].mxu1 }
 0x30a   :  { %v8017_v30 = vpop.f32.mrb[31].mxu1 }
 0x30d   :  { %v5390_v2 = vpop.f32.mrb[48].mxu0 }
 0x30e   :  { %v1482_v9 = vpop.f32.mrb[49].mxu0  ;;  %v8024_v17 = vadd.f32 %v5390_v2, %v4151_v32  ;;  %v8086_v2 = vadd.f32 %v4150_v59, %v7989_v43  ;;  %v8101_v43 = vadd.f32 %v7991_v45, %v4150_v59  ;;  %v8116_v45 = vadd.f32 %v4150_v59, %v8001_v62 }
 0x30f   :  { %v8022_v10 = vadd.f32 %v4151_v32, %v1482_v9  ;;  %v8131_v62 = vadd.f32 %v8003_v0, %v4150_v59  ;;  %v8146_v0 = vadd.f32 %v4150_v59, %v8013_v20  ;;  %v8161_v20 = vadd.f32 %v8015_v23, %v4150_v59 }
 0x310   :  { %v1578_v19 = vmul.f32 %v8024_v17, %v8024_v17 }
 0x311   :  { %v5393_v18 = vpop.f32.mrb[50].mxu0  ;;  %v1577_v26 = vmul.f32 %v8022_v10, %v8022_v10 }
 0x312   :  { %v8028_v6 = vadd.f32 %v5393_v18, %v4151_v32  ;;  %v1492_v8 = vpop.f32.mrb[51].mxu0  ;;  %v8091_v18 = vadd.f32 %v7987_v16, %v4150_v59  ;;  %v8106_v16 = vadd.f32 %v4150_v59, %v7997_v55  ;;  %v8121_v55 = vadd.f32 %v7999_v57, %v4150_v59 }
 0x313   :  { %1593 = vadd.xlane.f32.xlu0 %v1577_v26  ;;  %v8030_v11 = vadd.f32 %v4151_v32, %v1492_v8  ;;  %v943_v8 = vmul.f32 %v8086_v2, %v8086_v2  ;;  %v8136_v57 = vadd.f32 %v4150_v59, %v8009_v12  ;;  %v8151_v12 = vadd.f32 %v8011_v14, %v4150_v59 }
 0x314   :  { %v1580_v13 = vmul.f32 %v8028_v6, %v8028_v6 }
 0x315   :  { %v5396_v15 = vpop.f32.mrb[52].mxu0  ;;  %v1579_v25 = vmul.f32 %v8030_v11, %v8030_v11 }
 0x316   :  { %1599 = vadd.xlane.f32.xlu1 %v1580_v13  ;;  %v1502_v21 = vpop.f32.mrb[53].mxu0  ;;  %v8038_v22 = vadd.f32 %v5396_v15, %v4151_v32  ;;  %v944_v13 = vmul.f32 %v8091_v18, %v8091_v18 }
 0x317   :  { %v8036_v24 = vadd.f32 %v4151_v32, %v1502_v21  ;;  %1595 = vadd.xlane.f32.xlu0 %v1578_v19  ;;  %v946_v19 = vmul.f32 %v8101_v43, %v8101_v43  ;;  %v947_v21 = vmul.f32 %v8106_v16, %v8106_v16 }
 0x318   :  { %v1582_v34 = vmul.f32 %v8038_v22, %v8038_v22 }
 0x319   :  { %v5399_v27 = vpop.f32.mrb[54].mxu0  ;;  %v1581_v1 = vmul.f32 %v8036_v24, %v8036_v24 }
 0x31a   :  { %1597 = vadd.xlane.f32.xlu1 %v1579_v25  ;;  %v1512_v29 = vpop.f32.mrb[55].mxu0  ;;  %v8046_v33 = vadd.f32 %v5399_v27, %v4151_v32  ;;  %v949_v27 = vmul.f32 %v8116_v45, %v8116_v45 }
 0x31b   :  { %v8044_v31 = vadd.f32 %v4151_v32, %v1512_v29  ;;  %1601 = vadd.xlane.f32.xlu0 %v1581_v1  ;;  %v950_v1 = vmul.f32 %v8121_v55, %v8121_v55 }
 0x31c   :  { %v1584_v37 = vmul.f32 %v8046_v33, %v8046_v33 }
 0x31d   :  { %v5402_v28 = vpop.f32.mrb[56].mxu0  ;;  %v1583_v38 = vmul.f32 %v8044_v31, %v8044_v31 }
 0x31e   :  { %1603 = vadd.xlane.f32.xlu1 %v1582_v34  ;;  %v1522_v56 = vpop.f32.mrb[57].mxu0  ;;  %v8054_v36 = vadd.f32 %v5402_v28, %v4151_v32  ;;  %v952_v34 = vmul.f32 %v8131_v62, %v8131_v62  ;;  %v953_v28 = vmul.f32 %v8136_v57, %v8136_v57 }
 0x31f   :  { %v8052_v35 = vadd.f32 %v4151_v32, %v1522_v56  ;;  %1605 = vadd.xlane.f32.xlu0 %v1583_v38  ;;  %v955_v56 = vmul.f32 %v8146_v0, %v8146_v0 }
 0x320   :  { %v1586_v53 = vmul.f32 %v8054_v36, %v8054_v36 }
 0x321   :  { %v5405_v46 = vpop.f32.mrb[58].mxu0  ;;  %v1585_v39 = vmul.f32 %v8052_v35, %v8052_v35 }
 0x322   :  { %1607 = vadd.xlane.f32.xlu1 %v1584_v37  ;;  %v1532_v40 = vpop.f32.mrb[59].mxu0  ;;  %v8062_v44 = vadd.f32 %v5405_v46, %v4151_v32  ;;  %v956_v37 = vmul.f32 %v8151_v12, %v8151_v12 }
 0x323   :  { %v8060_v41 = vadd.f32 %v4151_v32, %v1532_v40  ;;  %1609 = vadd.xlane.f32.xlu0 %v1585_v39 }
 0x324   :  { %v1588_v51 = vmul.f32 %v8062_v44, %v8062_v44 }
 0x325   :  { %v5408_v42 = vpop.f32.mrb[60].mxu0  ;;  %v1587_v47 = vmul.f32 %v8060_v41, %v8060_v41 }
 0x326   :  { %1611 = vadd.xlane.f32.xlu1 %v1586_v53  ;;  %v1542_v49 = vpop.f32.mrb[61].mxu0  ;;  %v8070_v60 = vadd.f32 %v5408_v42, %v4151_v32 }
 0x327   :  { %v8068_v52 = vadd.f32 %v4151_v32, %v1542_v49  ;;  %1613 = vadd.xlane.f32.xlu0 %v1587_v47 }
 0x328   :  { %v1590_v4 = vmul.f32 %v8070_v60, %v8070_v60 }
 0x329   :  { %v5411_v54 = vpop.f32.mrb[62].mxu0  ;;  %v1589_v58 = vmul.f32 %v8068_v52, %v8068_v52 }
 0x32a   :  { %1615 = vadd.xlane.f32.xlu1 %v1588_v51  ;;  %v1552_v3 = vpop.f32.mrb[63].mxu0  ;;  %v8081_v63 = vadd.f32 %v5411_v54, %v4151_v32 }
 0x32b   :  { %v8079_v61 = vadd.f32 %v4151_v32, %v1552_v3  ;;  %1617 = vadd.xlane.f32.xlu0 %v1589_v58  ;;  %v8096_v32 = vadd.f32 %v4150_v59, %v7993_v48  ;;  %v8111_v48 = vadd.f32 %v7995_v50, %v4150_v59  ;;  %v8126_v50 = vadd.f32 %v4150_v59, %v8005_v5 }
 0x32c   :  { %v1592_v26 = vmul.f32 %v8081_v63, %v8081_v63  ;;  %v8141_v5 = vadd.f32 %v8007_v7, %v4150_v59  ;;  %v8156_v7 = vadd.f32 %v4150_v59, %v8017_v30  ;;  %v958_v30 = vmul.f32 %v8161_v20, %v8161_v20 }
 0x32d   :  { %v1591_v9 = vmul.f32 %v8079_v61, %v8079_v61  ;;  %v945_v15 = vmul.f32 %v8096_v32, %v8096_v32  ;;  %v948_v25 = vmul.f32 %v8111_v48, %v8111_v48  ;;  %v951_v29 = vmul.f32 %v8126_v50, %v8126_v50 }
 0x32e   :  { %1619 = vadd.xlane.f32.xlu1 %v1590_v4  ;;  %v954_v38 = vmul.f32 %v8141_v5, %v8141_v5  ;;  %v957_v14 = vmul.f32 %v8156_v7, %v8156_v7 }
 0x32f   :  { %1621 = vadd.xlane.f32.xlu0 %v1591_v9 }
 0x332   :  { %1623 = vadd.xlane.f32.xlu1 %v1592_v26 }
 0x333   :  { %959 = vadd.xlane.f32.xlu0 %v943_v8 }
 0x336   :  { %961 = vadd.xlane.f32.xlu1 %v944_v13 }
 0x337   :  { %963 = vadd.xlane.f32.xlu0 %v945_v15 }
 0x33a   :  { %965 = vadd.xlane.f32.xlu1 %v946_v19 }
 0x33b   :  { %967 = vadd.xlane.f32.xlu0 %v947_v21 }
 0x33e   :  { %969 = vadd.xlane.f32.xlu1 %v948_v25 }
 0x33f   :  { %971 = vadd.xlane.f32.xlu0 %v949_v27 }
 0x342   :  { %973 = vadd.xlane.f32.xlu1 %v950_v1 }
 0x343   :  { %975 = vadd.xlane.f32.xlu0 %v951_v29 }
 0x346   :  { %977 = vadd.xlane.f32.xlu1 %v952_v34 }
 0x347   :  { %979 = vadd.xlane.f32.xlu0 %v953_v28 }
 0x34a   :  { %981 = vadd.xlane.f32.xlu1 %v954_v38 }
 0x34b   :  { %983 = vadd.xlane.f32.xlu0 %v955_v56 }
 0x34e   :  { %985 = vadd.xlane.f32.xlu1 %v956_v37 }
 0x34f   :  { %987 = vadd.xlane.f32.xlu0 %v957_v14 }
 0x352   :  { %989 = vadd.xlane.f32.xlu1 %v958_v30 }
 0x3a0   :  { %v1594_v46 = vpop.xlane.xlu0 %1593 }
 0x3a1   :  { %v1625_v39 = vmax.f32 %v1594_v46, 1e-24 }
 0x3a3   :  { %7050 = vrsqrt.f32 %v1625_v39  ;;  %v1600_v40 = vpop.xlane.xlu1 %1599 }
 0x3a4   :  { %v1628_v53 = vmax.f32 %v1600_v40, 1e-24  ;;  %v1596_v42 = vpop.xlane.xlu0 %1595 }
 0x3a5   :  { %v1626_v23 = vmax.f32 %v1596_v42, 1e-24 }
 0x3a6   :  { %7052 = vrsqrt.f32 %v1628_v53 }
 0x3a7   :  { %7054 = vrsqrt.f32 %v1626_v23  ;;  %v1598_v47 = vpop.xlane.xlu1 %1597 }
 0x3a8   :  { %v1627_v49 = vmax.f32 %v1598_v47, 1e-24  ;;  %v1602_v51 = vpop.xlane.xlu0 %1601 }
 0x3a9   :  { %v1629_v54 = vmax.f32 %v1602_v51, 1e-24 }
 0x3aa   :  { %7056 = vrsqrt.f32 %v1627_v49 }
 0x3ab   :  { %7058 = vrsqrt.f32 %v1629_v54  ;;  %v1604_v58 = vpop.xlane.xlu1 %1603 }
 0x3ac   :  { %v1630_v59 = vmax.f32 %v1604_v58, 1e-24  ;;  %v1606_v3 = vpop.xlane.xlu0 %1605 }
 0x3ad   :  { %v7051_v4 = vpop.eup %7050  ;;  %v1631_v9 = vmax.f32 %v1606_v3, 1e-24 }
 0x3ae   :  { %7060 = vrsqrt.f32 %v1630_v59  ;;  %v1657_v26 = vmul.f32 %v7051_v4, %v8022_v10 }
 0x3af   :  { %7062 = vrsqrt.f32 %v1631_v9  ;;  %v1608_v8 = vpop.xlane.xlu1 %1607 }
 0x3b0   :  { %v7053_v13 = vpop.eup %7052  ;;  %v1632_v15 = vmax.f32 %v1608_v8, 1e-24  ;;  %v1610_v19 = vpop.xlane.xlu0 %1609  ;;  %v1689_v29 = vmul.f32 0.1, %v1657_v26  ;;  %vm1673_vm0 = vcmp.ge.f32.partialorder %v1657_v26, 0.0 }
 0x3b1   :  { %v7055_v21 = vpop.eup %7054  ;;  %v1633_v25 = vmax.f32 %v1610_v19, 1e-24  ;;  %v1660_v27 = vmul.f32 %v7053_v13, %v8028_v6 }
 0x3b2   :  { %7064 = vrsqrt.f32 %v1632_v15  ;;  %v1658_v1 = vmul.f32 %v7055_v21, %v8024_v17  ;;  %v8173_v6 = vsel %vm1673_vm0, %v1657_v26, %v1689_v29 }
 0x3b3   :  { %7066 = vrsqrt.f32 %v1633_v25  ;;  %v1612_v34 = vpop.xlane.xlu1 %1611  ;;  %v1692_v28 = vmul.f32 0.1, %v1660_v27  ;;  %vm1676_vm2 = vcmp.ge.f32.partialorder %v1660_v27, 0.0 }
 0x3b4   :  { %v7057_v38 = vpop.eup %7056  ;;  %v1634_v56 = vmax.f32 %v1612_v34, 1e-24  ;;  %v1614_v10 = vpop.xlane.xlu0 %1613  ;;  %vm1674_vm1 = vcmp.ge.f32.partialorder %v1658_v1, 0.0  ;;  %v1690_v37 = vmul.f32 0.1, %v1658_v1 }
 0x3b5   :  { %v7059_v14 = vpop.eup %7058  ;;  %v1635_v30 = vmax.f32 %v1614_v10, 1e-24  ;;  %v1659_v46 = vmul.f32 %v7057_v38, %v8030_v11  ;;  %v8180_v51 = vsel %vm1676_vm2, %v1660_v27, %v1692_v28 }
 0x3b6   :  { %7068 = vrsqrt.f32 %v1634_v56  ;;  %v8175_v39 = vsel %vm1674_vm1, %v1658_v1, %v1690_v37  ;;  %v1661_v17 = vmul.f32 %v7059_v14, %v8036_v24 }
 0x3b7   :  { %7070 = vrsqrt.f32 %v1635_v30  ;;  %v1616_v40 = vpop.xlane.xlu1 %1615  ;;  %v6410_v53 = vpack.c.bf16 %v8175_v39, %v8173_v6  ;;  %vm1675_vm3 = vcmp.ge.f32.partialorder %v1659_v46, 0.0  ;;  %v1691_v42 = vmul.f32 0.1, %v1659_v46 }
 0x3b8   :  { %v7061_v23 = vpop.eup %7060  ;;  %v1636_v47 = vmax.f32 %v1616_v40, 1e-24  ;;  %v1618_v49 = vpop.xlane.xlu0 %1617  ;;  %v1693_v11 = vmul.f32 0.1, %v1661_v17  ;;  %vm1677_vm4 = vcmp.ge.f32.partialorder %v1661_v17, 0.0 }
 0x3b9   :  { %v7063_v54 = vpop.eup %7062  ;;  %v1637_v58 = vmax.f32 %v1618_v49, 1e-24  ;;  %6411 = vmatprep.subr.bf16.mxu1 %v6410_v53  ;;  %v8182_v59 = vsel %vm1675_vm3, %v1659_v46, %v1691_v42  ;;  %v1662_v24 = vmul.f32 %v7061_v23, %v8038_v22 }
 0x3ba   :  { %7072 = vrsqrt.f32 %v1636_v47  ;;  %6413 = vmatpush3.bf16.msra.mxu1 %v6410_v53  ;;  %v6414_v3 = vpack.c.bf16 %v8180_v51, %v8182_v59  ;;  %v1663_v4 = vmul.f32 %v7063_v54, %v8044_v31  ;;  %v8188_v19 = vsel %vm1677_vm4, %v1661_v17, %v1693_v11 }
 0x3bb   :  { %7074 = vrsqrt.f32 %v1637_v58  ;;  %v1620_v9 = vpop.xlane.xlu1 %1619  ;;  %vm1678_vm5 = vcmp.ge.f32.partialorder %v1662_v24, 0.0  ;;  %v1694_v26 = vmul.f32 0.1, %v1662_v24 }
 0x3bc   :  { %v7065_v8 = vpop.eup %7064  ;;  %v1638_v13 = vmax.f32 %v1620_v9, 1e-24  ;;  %v1622_v15 = vpop.xlane.xlu0 %1621  ;;  %6415 = vmatprep.subr.bf16.mxu1 %v6414_v3  ;;  %v1695_v21 = vmul.f32 0.1, %v1663_v4  ;;  %vm1679_vm6 = vcmp.ge.f32.partialorder %v1663_v4, 0.0 }
 0x3bd   :  { %v7067_v22 = vpop.eup %7066  ;;  %v1639_v25 = vmax.f32 %v1622_v15, 1e-24  ;;  %v8190_v27 = vsel %vm1678_vm5, %v1662_v24, %v1694_v26  ;;  %v1664_v1 = vmul.f32 %v7065_v8, %v8046_v33 }
 0x3be   :  { %7076 = vrsqrt.f32 %v1638_v13  ;;  %6417 = vmatpush3.bf16.msra.mxu1 %v6414_v3  ;;  %v6418_v31 = vpack.c.bf16 %v8190_v27, %v8188_v19  ;;  %v1665_v29 = vmul.f32 %v7067_v22, %v8052_v35  ;;  %v8196_v37 = vsel %vm1679_vm6, %v1663_v4, %v1695_v21 }
 0x3bf   :  { %7078 = vrsqrt.f32 %v1639_v25  ;;  %v1624_v34 = vpop.xlane.xlu1 %1623  ;;  %vm1680_vm7 = vcmp.ge.f32.partialorder %v1664_v1, 0.0  ;;  %v1696_v28 = vmul.f32 0.1, %v1664_v1 }
 0x3c0   :  { %v7069_v38 = vpop.eup %7068  ;;  %v1640_v56 = vmax.f32 %v1624_v34, 1e-24  ;;  %6419 = vmatprep.subr.bf16.mxu1 %v6418_v31  ;;  %v960_v10 = vpop.xlane.xlu0 %959  ;;  %v1697_v14 = vmul.f32 0.1, %v1665_v29  ;;  %vm1681_vm8 = vcmp.ge.f32.partialorder %v1665_v29, 0.0 }
 0x3c1   :  { %v7071_v33 = vpop.eup %7070  ;;  %v991_v30 = vmax.f32 %v960_v10, 1e-24  ;;  %v8198_v46 = vsel %vm1680_vm7, %v1664_v1, %v1696_v28  ;;  %v1666_v17 = vmul.f32 %v7069_v38, %v8054_v36 }
 0x3c2   :  { %7080 = vrsqrt.f32 %v1640_v56  ;;  %6421 = vmatpush3.bf16.msra.mxu1 %v6418_v31  ;;  %v6422_v35 = vpack.c.bf16 %v8198_v46, %v8196_v37  ;;  %v1667_v40 = vmul.f32 %v7071_v33, %v8060_v41  ;;  %v8204_v11 = vsel %vm1681_vm8, %v1665_v29, %v1697_v14 }
 0x3c3   :  { %7082 = vrsqrt.f32 %v991_v30  ;;  %v962_v53 = vpop.xlane.xlu1 %961  ;;  %vm1682_vm9 = vcmp.ge.f32.partialorder %v1666_v17, 0.0  ;;  %v1698_v42 = vmul.f32 0.1, %v1666_v17 }
 0x3c4   :  { %v7073_v23 = vpop.eup %7072  ;;  %v992_v47 = vmax.f32 %v962_v53, 1e-24  ;;  %6423 = vmatprep.subr.bf16.mxu1 %v6422_v35  ;;  %v964_v49 = vpop.xlane.xlu0 %963  ;;  %v1699_v54 = vmul.f32 0.1, %v1667_v40  ;;  %vm1683_vm10 = vcmp.ge.f32.partialorder %v1667_v40, 0.0 }
 0x3c5   :  { %v7075_v36 = vpop.eup %7074  ;;  %v993_v58 = vmax.f32 %v964_v49, 1e-24  ;;  %v8206_v24 = vsel %vm1682_vm9, %v1666_v17, %v1698_v42  ;;  %v1668_v3 = vmul.f32 %v7073_v23, %v8062_v44 }
 0x3c6   :  { %7084 = vrsqrt.f32 %v992_v47  ;;  %6425 = vmatpush3.bf16.msra.mxu1 %v6422_v35  ;;  %v6426_v41 = vpack.c.bf16 %v8206_v24, %v8204_v11  ;;  %v1669_v4 = vmul.f32 %v7075_v36, %v8068_v52  ;;  %v8212_v21 = vsel %vm1683_vm10, %v1667_v40, %v1699_v54 }
 0x3c7   :  { %7086 = vrsqrt.f32 %v993_v58  ;;  %v966_v9 = vpop.xlane.xlu1 %965  ;;  %vm1684_vm11 = vcmp.ge.f32.partialorder %v1668_v3, 0.0  ;;  %v1700_v26 = vmul.f32 0.1, %v1668_v3  ;;  %v4153_v58 = vld [vmem:[%s9255_s8 + $0x88] sm:$0xff] }
 0x3c8   :  { %v7077_v8 = vpop.eup %7076  ;;  %v994_v13 = vmax.f32 %v966_v9, 1e-24  ;;  %6427 = vmatprep.subr.bf16.mxu1 %v6426_v41  ;;  %v968_v15 = vpop.xlane.xlu0 %967  ;;  %v1701_v22 = vmul.f32 0.1, %v1669_v4  ;;  %vm1685_vm12 = vcmp.ge.f32.partialorder %v1669_v4, 0.0 }
 0x3c9   :  { %v7079_v44 = vpop.eup %7078  ;;  %v995_v25 = vmax.f32 %v968_v15, 1e-24  ;;  %v8214_v1 = vsel %vm1684_vm11, %v1668_v3, %v1700_v26  ;;  %v1670_v31 = vmul.f32 %v7077_v8, %v8070_v60 }
 0x3ca   :  { %7088 = vrsqrt.f32 %v994_v13  ;;  %6429 = vmatpush3.bf16.msra.mxu1 %v6426_v41  ;;  %v6430_v52 = vpack.c.bf16 %v8214_v1, %v8212_v21  ;;  %v1671_v29 = vmul.f32 %v7079_v44, %v8079_v61  ;;  %v8220_v14 = vsel %vm1685_vm12, %v1669_v4, %v1701_v22 }
 0x3cb   :  { %7090 = vrsqrt.f32 %v995_v25  ;;  %v970_v34 = vpop.xlane.xlu1 %969  ;;  %vm1686_vm13 = vcmp.ge.f32.partialorder %v1670_v31, 0.0  ;;  %v1702_v28 = vmul.f32 0.1, %v1670_v31 }
 0x3cc   :  { %v7081_v38 = vpop.eup %7080  ;;  %v996_v56 = vmax.f32 %v970_v34, 1e-24  ;;  %6431 = vmatprep.subr.bf16.mxu1 %v6430_v52  ;;  %v972_v10 = vpop.xlane.xlu0 %971  ;;  %v1703_v33 = vmul.f32 0.1, %v1671_v29  ;;  %vm1687_vm14 = vcmp.ge.f32.partialorder %v1671_v29, 0.0 }
 0x3cd   :  { %v7083_v60 = vpop.eup %7082  ;;  %v997_v30 = vmax.f32 %v972_v10, 1e-24  ;;  %v8222_v17 = vsel %vm1686_vm13, %v1670_v31, %v1702_v28  ;;  %v1672_v35 = vmul.f32 %v7081_v38, %v8081_v63  ;;  %v4152_v63 = vld [vmem:[%s9255_s8 + $0x80] sm:$0xff] }
 0x3ce   :  { %7092 = vrsqrt.f32 %v996_v56  ;;  %6433 = vmatpush3.bf16.msra.mxu1 %v6430_v52  ;;  %v6434_v61 = vpack.c.bf16 %v8222_v17, %v8220_v14  ;;  %v1023_v40 = vmul.f32 %v7083_v60, %v8086_v2  ;;  %v8228_v54 = vsel %vm1687_vm14, %v1671_v29, %v1703_v33  ;;  %v4154_v52 = vld [vmem:[%s9255_s8 + $0x90] sm:$0xff] }
 0x3cf   :  { %7094 = vrsqrt.f32 %v997_v30  ;;  %v974_v53 = vpop.xlane.xlu1 %973  ;;  %vm1688_vm15 = vcmp.ge.f32.partialorder %v1672_v35, 0.0  ;;  %v1704_v42 = vmul.f32 0.1, %v1672_v35  ;;  %v6442_v15 = vpack.c.bf16 %v4153_v58, %v4152_v63  ;;  %v7179_v58 = vld [vmem:[%s9254_s0 + $0x10] sm:$0xff] }
 0x3d0   :  { %v7085_v23 = vpop.eup %7084  ;;  %v998_v47 = vmax.f32 %v974_v53, 1e-24  ;;  %6435 = vmatprep.subr.bf16.mxu1 %v6434_v61  ;;  %v976_v49 = vpop.xlane.xlu0 %975  ;;  %v1055_v36 = vmul.f32 0.1, %v1023_v40  ;;  %vm1039_vm0 = vcmp.ge.f32.partialorder %v1023_v40, 0.0 }
 0x3d1   :  { %v7087_v2 = vpop.eup %7086  ;;  %v999_v3 = vmax.f32 %v976_v49, 1e-24  ;;  %v8236_v41 = vsel %vm1688_vm15, %v1672_v35, %v1704_v42  ;;  %v1024_v4 = vmul.f32 %v7085_v23, %v8091_v18  ;;  %v4156_v42 = vld [vmem:[%s9255_s8 + $0xa0] sm:$0xff]  ;;  %v7178_v49 = vld [vmem:[%s9254_s0 + $0x8] sm:$0xff] }
 0x3d2   :  { %7096 = vrsqrt.f32 %v998_v47  ;;  %6437 = vmatpush3.bf16.msra.mxu1 %v6434_v61  ;;  %v6438_v9 = vpack.c.bf16 %v8236_v41, %v8228_v54  ;;  %v1025_v26 = vmul.f32 %v7087_v2, %v8096_v32  ;;  %v8242_v31 = vsel %vm1039_vm0, %v1023_v40, %v1055_v36  ;;  %v4155_v32 = vld [vmem:[%s9255_s8 + $0x98] sm:$0xff] }
 0x3d3   :  { %7098 = vrsqrt.f32 %v999_v3  ;;  %v978_v8 = vpop.xlane.xlu1 %977  ;;  %vm1040_vm1 = vcmp.ge.f32.partialorder %v1024_v4, 0.0  ;;  %v1056_v13 = vmul.f32 0.1, %v1024_v4  ;;  %v6446_v30 = vpack.c.bf16 %v4155_v32, %v4154_v52 }
 0x3d4   :  { %v7089_v22 = vpop.eup %7088  ;;  %v1000_v44 = vmax.f32 %v978_v8, 1e-24  ;;  %6439 = vmatprep.subr.bf16.mxu1 %v6438_v9  ;;  %v980_v25 = vpop.xlane.xlu0 %979  ;;  %v1057_v18 = vmul.f32 0.1, %v1025_v26  ;;  %vm1041_vm2 = vcmp.ge.f32.partialorder %v1025_v26, 0.0 }
 0x3d5   :  { %v7091_v29 = vpop.eup %7090  ;;  %v1001_v34 = vmax.f32 %v980_v25, 1e-24  ;;  %v8250_v28 = vsel %vm1040_vm1, %v1024_v4, %v1056_v13  ;;  %v1026_v38 = vmul.f32 %v7089_v22, %v8101_v43 }
 0x3d6   :  { %7100 = vrsqrt.f32 %v1000_v44  ;;  %6441 = vmatpush3.bf16.msra.mxu1 %v6438_v9  ;;  %v6506_v56 = vpack.c.bf16 %v8250_v28, %v8242_v31  ;;  %v1027_v10 = vmul.f32 %v7091_v29, %v8106_v16  ;;  %v8256_v53 = vsel %vm1041_vm2, %v1025_v26, %v1057_v18  ;;  %v4157_v16 = vld [vmem:[%s9255_s8 + $0xa8] sm:$0xff]  ;;  %v4158_v44 = vld [vmem:[%s9255_s8 + $0xb0] sm:$0xff]  ;;  %v7180_v18 = vld [vmem:[%s9254_s0 + $0x18] sm:$0xff] }
 0x3d7   :  { %7102 = vrsqrt.f32 %v1001_v34  ;;  %v982_v33 = vpop.xlane.xlu1 %981  ;;  %vm1042_vm3 = vcmp.ge.f32.partialorder %v1026_v38, 0.0  ;;  %v1058_v60 = vmul.f32 0.1, %v1026_v38  ;;  %6443 = vmatprep.subr.bf16.mxu1 %v6442_v15  ;;  %v6450_v26 = vpack.c.bf16 %v4157_v16, %v4156_v42  ;;  %v7181_v34 = vld [vmem:[%s9254_s0 + $0x20] sm:$0xff] }
 0x3d8   :  { %v7093_v35 = vpop.eup %7092  ;;  %v1002_v61 = vmax.f32 %v982_v33, 1e-24  ;;  %6507 = vmatprep.subr.bf16.mxu0 %v6506_v56  ;;  %v984_v40 = vpop.xlane.xlu0 %983  ;;  %v1059_v43 = vmul.f32 0.1, %v1027_v10  ;;  %vm1043_vm4 = vcmp.ge.f32.partialorder %v1027_v10, 0.0 }
 0x3d9   :  { %v7095_v23 = vpop.eup %7094  ;;  %v1003_v47 = vmax.f32 %v984_v40, 1e-24  ;;  %5445 = vmatmul.mubr.f32.vlgmr.msra.gmra.mrb[32].mxu1 %v7178_v49  ;;  %6509 = vmatpush3.bf16.msra.mxu0 %v6506_v56  ;;  %v8268_v36 = vsel %vm1042_vm3, %v1026_v38, %v1058_v60  ;;  %v1028_v63 = vmul.f32 %v7093_v35, %v8111_v48  ;;  %v4161_v40 = vld [vmem:[%s9255_s8 + $0xc8] sm:$0xff] }
 0x3da   :  { %7104 = vrsqrt.f32 %v1002_v61  ;;  %5447 = vmatprep.mubr.f32.mxu1 %v7179_v58  ;;  %v6510_v2 = vpack.c.bf16 %v8268_v36, %v8256_v53  ;;  %v1029_v3 = vmul.f32 %v7095_v23, %v8116_v45  ;;  %6445 = vmatpush3.bf16.msra.mxu1 %v6442_v15  ;;  %v8278_v22 = vsel %vm1043_vm4, %v1027_v10, %v1059_v43  ;;  %v4159_v45 = vld [vmem:[%s9255_s8 + $0xb8] sm:$0xff]  ;;  %v4160_v61 = vld [vmem:[%s9255_s8 + $0xc0] sm:$0xff] }
 0x3db   :  { %7106 = vrsqrt.f32 %v1003_v47  ;;  %v986_v4 = vpop.xlane.xlu1 %985  ;;  %vm1044_vm5 = vcmp.ge.f32.partialorder %v1028_v63, 0.0  ;;  %v1060_v9 = vmul.f32 0.1, %v1028_v63  ;;  %6447 = vmatprep.subr.bf16.mxu1 %v6446_v30  ;;  %v7183_v47 = vld [vmem:[%s9254_s0 + $0x30] sm:$0xff] }
 0x3dc   :  { %v7097_v48 = vpop.eup %7096  ;;  %v1004_v8 = vmax.f32 %v986_v4, 1e-24  ;;  %6511 = vmatprep.subr.bf16.mxu0 %v6510_v2  ;;  %v988_v13 = vpop.xlane.xlu0 %987  ;;  %v1061_v29 = vmul.f32 0.1, %v1029_v3  ;;  %vm1045_vm6 = vcmp.ge.f32.partialorder %v1029_v3, 0.0  ;;  %v4163_v4 = vld [vmem:[%s9255_s8 + $0xd8] sm:$0xff] }
 0x3dd   :  { %v7099_v15 = vpop.eup %7098  ;;  %v1005_v25 = vmax.f32 %v988_v13, 1e-24  ;;  %5448 = vmatmul.mubr.f32.gmra.mrb[34].mxu1 %v7180_v18  ;;  %6513 = vmatpush3.bf16.msra.mxu0 %v6510_v2  ;;  %v8290_v52 = vsel %vm1044_vm5, %v1028_v63, %v1060_v9  ;;  %v1030_v32 = vmul.f32 %v7097_v48, %v8121_v55  ;;  %v6454_v55 = vpack.c.bf16 %v4159_v45, %v4158_v44  ;;  %v7185_v44 = vld [vmem:[%s9254_s0 + $0x40] sm:$0xff] }
 0x3de   :  { %7108 = vrsqrt.f32 %v1004_v8  ;;  %5450 = vmatprep.mubr.f32.mxu1 %v7181_v34  ;;  %v6514_v38 = vpack.c.bf16 %v8290_v52, %v8278_v22  ;;  %v1031_v56 = vmul.f32 %v7099_v15, %v8126_v50  ;;  %6449 = vmatpush3.bf16.msra.mxu1 %v6446_v30  ;;  %v7182_v50 = vld [vmem:[%s9254_s0 + $0x28] sm:$0xff]  ;;  %v8309_v30 = vsel %vm1045_vm6, %v1029_v3, %v1061_v29 }
 0x3df   :  { %7110 = vrsqrt.f32 %v1005_v25  ;;  %v990_v10 = vpop.xlane.xlu1 %989  ;;  %vm1046_vm7 = vcmp.ge.f32.partialorder %v1030_v32, 0.0  ;;  %v1062_v33 = vmul.f32 0.1, %v1030_v32  ;;  %6451 = vmatprep.subr.bf16.mxu1 %v6450_v26  ;;  %v6458_v2 = vpack.c.bf16 %v4161_v40, %v4160_v61  ;;  %v4165_v29 = vld [vmem:[%s9255_s8 + $0xe8] sm:$0xff] }
 0x3e0   :  { %v7101_v60 = vpop.eup %7100  ;;  %v1006_v35 = vmax.f32 %v990_v10, 1e-24  ;;  %6515 = vmatprep.subr.bf16.mxu0 %v6514_v38  ;;  %v1063_v23 = vmul.f32 0.1, %v1031_v56  ;;  %vm1047_vm8 = vcmp.ge.f32.partialorder %v1031_v56, 0.0 }
 0x3e1   :  { %v7103_v43 = vpop.eup %7102  ;;  %5451 = vmatmul.mubr.f32.gmra.mrb[36].mxu1 %v7182_v50  ;;  %6517 = vmatpush3.bf16.msra.mxu0 %v6514_v38  ;;  %v8311_v42 = vsel %vm1046_vm7, %v1030_v32, %v1062_v33  ;;  %v1032_v16 = vmul.f32 %v7101_v60, %v8131_v62  ;;  %v4162_v62 = vld [vmem:[%s9255_s8 + $0xd0] sm:$0xff]  ;;  %v4167_v50 = vld [vmem:[%s9255_s8 + $0xf8] sm:$0xff] }
 0x3e2   :  { %7112 = vrsqrt.f32 %v1006_v35  ;;  %5453 = vmatprep.mubr.f32.mxu1 %v7183_v47  ;;  %v6518_v49 = vpack.c.bf16 %v8311_v42, %v8309_v30  ;;  %v1033_v63 = vmul.f32 %v7103_v43, %v8136_v57  ;;  %6453 = vmatpush3.bf16.msra.mxu1 %v6450_v26  ;;  %v7184_v57 = vld [vmem:[%s9254_s0 + $0x38] sm:$0xff]  ;;  %v8329_v26 = vsel %vm1047_vm8, %v1031_v56, %v1063_v23 }
 0x3e3   :  { %vm1048_vm9 = vcmp.ge.f32.partialorder %v1032_v16, 0.0  ;;  %v1064_v58 = vmul.f32 0.1, %v1032_v16  ;;  %6455 = vmatprep.subr.bf16.mxu1 %v6454_v55  ;;  %v6462_v18 = vpack.c.bf16 %v4163_v4, %v4162_v62 }
 0x3e4   :  { %v7105_v3 = vpop.eup %7104  ;;  %6519 = vmatprep.subr.bf16.mxu0 %v6518_v49  ;;  %v1065_v13 = vmul.f32 0.1, %v1033_v63  ;;  %vm1049_vm10 = vcmp.ge.f32.partialorder %v1033_v63, 0.0 }
 0x3e5   :  { %v7107_v9 = vpop.eup %7106  ;;  %5454 = vmatmul.mubr.f32.gmra.mrb[38].mxu1 %v7184_v57  ;;  %6521 = vmatpush3.bf16.msra.mxu0 %v6518_v49  ;;  %v8331_v48 = vsel %vm1048_vm9, %v1032_v16, %v1064_v58  ;;  %v1034_v8 = vmul.f32 %v7105_v3, %v8141_v5  ;;  %v4164_v5 = vld [vmem:[%s9255_s8 + $0xe0] sm:$0xff]  ;;  %v7188_v16 = vld [vmem:[%s9254_s0 + $0x58] sm:$0xff] }
 0x3e6   :  { %5456 = vmatprep.mubr.f32.mxu1 %v7185_v44  ;;  %v6522_v45 = vpack.c.bf16 %v8331_v48, %v8329_v26  ;;  %v1035_v15 = vmul.f32 %v7107_v9, %v8146_v0  ;;  %6457 = vmatpush3.bf16.msra.mxu1 %v6454_v55  ;;  %v7186_v0 = vld [vmem:[%s9254_s0 + $0x48] sm:$0xff]  ;;  %v8349_v38 = vsel %vm1049_vm10, %v1033_v63, %v1065_v13  ;;  %v7187_v55 = vld [vmem:[%s9254_s0 + $0x50] sm:$0xff]  ;;  %v7189_v63 = vld [vmem:[%s9254_s0 + $0x60] sm:$0xff] }
 0x3e7   :  { %vm1050_vm11 = vcmp.ge.f32.partialorder %v1034_v8, 0.0  ;;  %v1066_v25 = vmul.f32 0.1, %v1034_v8  ;;  %6459 = vmatprep.subr.bf16.mxu1 %v6458_v2  ;;  %v6466_v40 = vpack.c.bf16 %v4165_v29, %v4164_v5  ;;  %v7191_v9 = vld [vmem:[%s9254_s0 + $0x70] sm:$0xff]  ;;  %v7193_v13 = vld [vmem:[%s9258_s1 + $0x8] sm:$0xff]  ;;  %v7200_v5 = vld [vmem:[%s9258_s1 + $0x40] sm:$0xff] }
 0x3e8   :  { %v7109_v32 = vpop.eup %7108  ;;  %6523 = vmatprep.subr.bf16.mxu0 %v6522_v45  ;;  %v1067_v33 = vmul.f32 0.1, %v1035_v15  ;;  %vm1051_vm12 = vcmp.ge.f32.partialorder %v1035_v15, 0.0  ;;  %v7194_v44 = vld [vmem:[%s9258_s1 + $0x10] sm:$0xff]  ;;  %v7201_v29 = vld [vmem:[%s9258_s1 + $0x48] sm:$0xff] }
 0x3e9   :  { %v7111_v34 = vpop.eup %7110  ;;  %5457 = vmatmul.mubr.f32.gmra.mrb[40].mxu1 %v7186_v0  ;;  %6525 = vmatpush3.bf16.msra.mxu0 %v6522_v45  ;;  %v8351_v56 = vsel %vm1050_vm11, %v1034_v8, %v1066_v25  ;;  %v1036_v10 = vmul.f32 %v7109_v32, %v8151_v12  ;;  %v4166_v12 = vld [vmem:[%s9255_s8 + $0xf0] sm:$0xff]  ;;  %v7192_v8 = vld [vmem:[%s9254_s0 + $0x78] sm:$0xff]  ;;  %v7197_v25 = vld [vmem:[%s9258_s1 + $0x28] sm:$0xff] }
 0x3ea   :  { %5459 = vmatprep.mubr.f32.mxu1 %v7187_v55  ;;  %v6526_v60 = vpack.c.bf16 %v8351_v56, %v8349_v38  ;;  %v1037_v35 = vmul.f32 %v7111_v34, %v8156_v7  ;;  %6461 = vmatpush3.bf16.msra.mxu1 %v6458_v2  ;;  %v8369_v7 = vsel %vm1051_vm12, %v1035_v15, %v1067_v33  ;;  %v7195_v45 = vld [vmem:[%s9258_s1 + $0x18] sm:$0xff]  ;;  %v7196_v15 = vld [vmem:[%s9258_s1 + $0x20] sm:$0xff]  ;;  %v7202_v34 = vld [vmem:[%s9258_s1 + $0x50] sm:$0xff] }
 0x3eb   :  { %vm1052_vm13 = vcmp.ge.f32.partialorder %v1036_v10, 0.0  ;;  %v1068_v61 = vmul.f32 0.1, %v1036_v10  ;;  %6463 = vmatprep.subr.bf16.mxu1 %v6462_v18  ;;  %v6470_v3 = vpack.c.bf16 %v4167_v50, %v4166_v12  ;;  %v7199_v32 = vld [vmem:[%s9258_s1 + $0x38] sm:$0xff]  ;;  %v7205_v33 = vld [vmem:[%s9258_s1 + $0x68] sm:$0xff]  ;;  %v7206_v55 = vld [vmem:[%s9258_s1 + $0x70] sm:$0xff] }
 0x3ec   :  { %v7113_v43 = vpop.eup %7112  ;;  %6527 = vmatprep.subr.bf16.mxu0 %v6526_v60  ;;  %v1069_v49 = vmul.f32 0.1, %v1037_v35  ;;  %vm1053_vm14 = vcmp.ge.f32.partialorder %v1037_v35, 0.0  ;;  %v7203_v0 = vld [vmem:[%s9258_s1 + $0x58] sm:$0xff]  ;;  %v4170_v12 = vld [vmem:[%s9259_s10 + $0x88] sm:$0xff] }
 0x3ed   :  { %5460 = vmatmul.mubr.f32.gmra.mrb[42].mxu1 %v7188_v16  ;;  %6529 = vmatpush3.bf16.msra.mxu0 %v6526_v60  ;;  %v8371_v23 = vsel %vm1052_vm13, %v1036_v10, %v1068_v61  ;;  %v1038_v47 = vmul.f32 %v7113_v43, %v8161_v20  ;;  %v7190_v20 = vld [vmem:[%s9254_s0 + $0x68] sm:$0xff]  ;;  %v7204_v10 = vld [vmem:[%s9258_s1 + $0x60] sm:$0xff]  ;;  %v7207_v60 = vld [vmem:[%s9258_s1 + $0x78] sm:$0xff] }
 0x3ee   :  { %5462 = vmatprep.mubr.f32.mxu1 %v7189_v63  ;;  %v6530_v58 = vpack.c.bf16 %v8371_v23, %v8369_v7  ;;  %6465 = vmatpush3.bf16.msra.mxu1 %v6462_v18  ;;  %v8382_v62 = vsel %vm1053_vm14, %v1037_v35, %v1069_v49  ;;  %v7198_v18 = vld [vmem:[%s9258_s1 + $0x30] sm:$0xff]  ;;  %v4186_v35 = vld [vmem:[%s9260_s11 + $0x80] sm:$0xff]  ;;  %v4187_v61 = vld [vmem:[%s9260_s11 + $0x88] sm:$0xff] }
 0x3ef   :  { %vm1054_vm15 = vcmp.ge.f32.partialorder %v1038_v47, 0.0  ;;  %v1070_v2 = vmul.f32 0.1, %v1038_v47  ;;  %6467 = vmatprep.subr.bf16.mxu1 %v6466_v40  ;;  %v4169_v43 = vld [vmem:[%s9259_s10 + $0x80] sm:$0xff]  ;;  %v4188_v16 = vld [vmem:[%s9260_s11 + $0x90] sm:$0xff] }
 0x3f0   :  { %6531 = vmatprep.subr.bf16.mxu0 %v6530_v58  ;;  %v6474_v50 = vpack.c.bf16 %v4170_v12, %v4169_v43  ;;  %v4190_v63 = vld [vmem:[%s9260_s11 + $0xa0] sm:$0xff]  ;;  %v4174_v12 = vld [vmem:[%s9259_s10 + $0xa8] sm:$0xff] }
 0x3f1   :  { %5463 = vmatmul.mubr.f32.gmra.mrb[44].mxu1 %v7190_v20  ;;  %6533 = vmatpush3.bf16.msra.mxu0 %v6530_v58  ;;  %v8384_v4 = vsel %vm1054_vm15, %v1038_v47, %v1070_v2  ;;  %v4189_v47 = vld [vmem:[%s9260_s11 + $0x98] sm:$0xff]  ;;  %v4191_v58 = vld [vmem:[%s9260_s11 + $0xa8] sm:$0xff]  ;;  %v4173_v43 = vld [vmem:[%s9259_s10 + $0xa0] sm:$0xff] }
 0x3f2   :  { %5465 = vmatprep.mubr.f32.mxu1 %v7191_v9  ;;  %v6534_v57 = vpack.c.bf16 %v8384_v4, %v8382_v62  ;;  %6469 = vmatpush3.bf16.msra.mxu1 %v6466_v40  ;;  %v6538_v40 = vpack.c.bf16 %v4187_v61, %v4186_v35  ;;  %v6542_v49 = vpack.c.bf16 %v4189_v47, %v4188_v16  ;;  %v4193_v20 = vld [vmem:[%s9260_s11 + $0xb8] sm:$0xff] }
 0x3f3   :  { %6471 = vmatprep.subr.bf16.mxu1 %v6470_v3  ;;  %v6546_v2 = vpack.c.bf16 %v4191_v58, %v4190_v63  ;;  %v4175_v63 = vld [vmem:[%s9259_s10 + $0xb0] sm:$0xff]  ;;  %v4176_v58 = vld [vmem:[%s9259_s10 + $0xb8] sm:$0xff] }
 0x3f4   :  { %6535 = vmatprep.subr.bf16.mxu0 %v6534_v57 }
 0x3f5   :  { %5466 = vmatmul.mubr.f32.gmra.mrb[46].mxu1 %v7192_v8  ;;  %6537 = vmatpush3.bf16.msra.mxu0 %v6534_v57  ;;  %v4194_v57 = vld [vmem:[%s9260_s11 + $0xc0] sm:$0xff]  ;;  %v4195_v8 = vld [vmem:[%s9260_s11 + $0xc8] sm:$0xff] }
 0x3f6   :  { %6473 = vmatpush3.bf16.msra.mxu1 %v6470_v3  ;;  %6539 = vmatprep.subr.bf16.mxu0 %v6538_v40  ;;  %v4192_v3 = vld [vmem:[%s9260_s11 + $0xb0] sm:$0xff] }
 0x3f7   :  { %6475 = vmatprep.subr.bf16.mxu1 %v6474_v50  ;;  %v6550_v9 = vpack.c.bf16 %v4193_v20, %v4192_v3  ;;  %v6486_v20 = vpack.c.bf16 %v4176_v58, %v4175_v63  ;;  %v4207_v58 = vld [vmem:[%s9261_s13 + $0xa0] sm:$0xff] }
 0x3f8   :  { %5613 = vmatmul.mubr.f32.vlgmr.msra.gmra.mrb[64].mxu0 %v7193_v13  ;;  %v6554_v13 = vpack.c.bf16 %v4195_v8, %v4194_v57 }
 0x3f9   :  { %5615 = vmatprep.mubr.f32.mxu0 %v7194_v44  ;;  %6541 = vmatpush3.bf16.msra.mxu0 %v6538_v40  ;;  %v4196_v44 = vld [vmem:[%s9260_s11 + $0xd0] sm:$0xff] }
 0x3fa   :  { %6543 = vmatprep.subr.bf16.mxu0 %v6542_v49 }
 0x3fc   :  { %5616 = vmatmul.mubr.f32.gmra.mrb[66].mxu0 %v7195_v45  ;;  %v4197_v45 = vld [vmem:[%s9260_s11 + $0xd8] sm:$0xff] }
 0x3fd   :  { %5618 = vmatprep.mubr.f32.mxu0 %v7196_v15  ;;  %6545 = vmatpush3.bf16.msra.mxu0 %v6542_v49  ;;  %v6558_v15 = vpack.c.bf16 %v4197_v45, %v4196_v44  ;;  %v6482_v49 = vpack.c.bf16 %v4174_v12, %v4173_v43  ;;  %v4179_v44 = vld [vmem:[%s9259_s10 + $0xd0] sm:$0xff]  ;;  %v4180_v45 = vld [vmem:[%s9259_s10 + $0xd8] sm:$0xff] }
 0x3fe   :  { %6547 = vmatprep.subr.bf16.mxu0 %v6546_v2  ;;  %v4205_v12 = vld [vmem:[%s9261_s13 + $0x90] sm:$0xff] }
 0x400   :  { %5619 = vmatmul.mubr.f32.gmra.mrb[68].mxu0 %v7197_v25  ;;  %v4198_v25 = vld [vmem:[%s9260_s11 + $0xe0] sm:$0xff] }
 0x401   :  { %5621 = vmatprep.mubr.f32.mxu0 %v7198_v18  ;;  %6549 = vmatpush3.bf16.msra.mxu0 %v6546_v2  ;;  %v4199_v18 = vld [vmem:[%s9260_s11 + $0xe8] sm:$0xff] }
 0x402   :  { %6551 = vmatprep.subr.bf16.mxu0 %v6550_v9 }
 0x404   :  { %5622 = vmatmul.mubr.f32.gmra.mrb[70].mxu0 %v7199_v32  ;;  %v6562_v32 = vpack.c.bf16 %v4199_v18, %v4198_v25  ;;  %v6494_v18 = vpack.c.bf16 %v4180_v45, %v4179_v44  ;;  %v4213_v44 = vld [vmem:[%s9261_s13 + $0xd0] sm:$0xff]  ;;  %v4214_v45 = vld [vmem:[%s9261_s13 + $0xd8] sm:$0xff] }
 0x405   :  { %5624 = vmatprep.mubr.f32.mxu0 %v7200_v5  ;;  %6553 = vmatpush3.bf16.msra.mxu0 %v6550_v9  ;;  %v4200_v5 = vld [vmem:[%s9260_s11 + $0xf0] sm:$0xff]  ;;  %v4178_v9 = vld [vmem:[%s9259_s10 + $0xc8] sm:$0xff] }
 0x406   :  { %6555 = vmatprep.subr.bf16.mxu0 %v6554_v13 }
 0x408   :  { %5625 = vmatmul.mubr.f32.gmra.mrb[72].mxu0 %v7201_v29  ;;  %v4201_v29 = vld [vmem:[%s9260_s11 + $0xf8] sm:$0xff] }
 0x409   :  { %5627 = vmatprep.mubr.f32.mxu0 %v7202_v34  ;;  %6557 = vmatpush3.bf16.msra.mxu0 %v6554_v13  ;;  %v6566_v34 = vpack.c.bf16 %v4201_v29, %v4200_v5  ;;  %v4182_v5 = vld [vmem:[%s9259_s10 + $0xe8] sm:$0xff] }
 0x40a   :  { %6559 = vmatprep.subr.bf16.mxu0 %v6558_v15 }
 0x40c   :  { %5628 = vmatmul.mubr.f32.gmra.mrb[74].mxu0 %v7203_v0  ;;  %v4203_v0 = vld [vmem:[%s9261_s13 + $0x80] sm:$0xff] }
 0x40d   :  { %5630 = vmatprep.mubr.f32.mxu0 %v7204_v10  ;;  %6561 = vmatpush3.bf16.msra.mxu0 %v6558_v15  ;;  %v4204_v10 = vld [vmem:[%s9261_s13 + $0x88] sm:$0xff] }
 0x40e   :  { %6563 = vmatprep.subr.bf16.mxu0 %v6562_v32 }
 0x410   :  { %5631 = vmatmul.mubr.f32.gmra.mrb[76].mxu0 %v7205_v33  ;;  %v8499_v33 = vpack.c.bf16 %v4204_v10, %v4203_v0  ;;  %v4183_v10 = vld [vmem:[%s9259_s10 + $0xf0] sm:$0xff] }
 0x411   :  { %5633 = vmatprep.mubr.f32.mxu0 %v7206_v55  ;;  %6565 = vmatpush3.bf16.msra.mxu0 %v6562_v32  ;;  %v4171_v55 = vld [vmem:[%s9259_s10 + $0x90] sm:$0xff]  ;;  %v4181_v32 = vld [vmem:[%s9259_s10 + $0xe0] sm:$0xff] }
 0x412   :  { %6567 = vmatprep.subr.bf16.mxu0 %v6566_v34  ;;  %v6498_v0 = vpack.c.bf16 %v4182_v5, %v4181_v32  ;;  %v4217_v5 = vld [vmem:[%s9261_s13 + $0xf0] sm:$0xff] }
 0x414   :  { %5634 = vmatmul.mubr.f32.gmra.mrb[78].mxu0 %v7207_v60  ;;  %v4172_v60 = vld [vmem:[%s9259_s10 + $0x98] sm:$0xff] }
 0x415   :  { %6569 = vmatpush3.bf16.msra.mxu0 %v6566_v34  ;;  %v6478_v40 = vpack.c.bf16 %v4172_v60, %v4171_v55  ;;  %v4184_v55 = vld [vmem:[%s9259_s10 + $0xf8] sm:$0xff] }
 0x416   :  { %6571 = vmatprep.subr.bf16.mxu0 %v8499_v33 }
 0x4ac   :  { %v5446_v35 = vpop.f32.mrb[32].mxu1 }
 0x4ad   :  { %v1823_v61 = vpop.f32.mrb[33].mxu1 }
 0x4ae   :  { %5500 = vmatprep.mubr.f32.mxu1 %v1823_v61  ;;  %v6502_v61 = vpack.c.bf16 %v4184_v55, %v4183_v10 }
 0x4af   :  { %5501 = vmatmul.mubr.f32.vlgmr.msra.gmra.mrb[48].mxu1 %v5446_v35 }
 0x4b0   :  { %v5449_v16 = vpop.f32.mrb[34].mxu1  ;;  %6477 = vmatpush3.bf16.msra.mxu1 %v6474_v50  ;;  %v4177_v50 = vld [vmem:[%s9259_s10 + $0xc0] sm:$0xff] }
 0x4b1   :  { %v1833_v47 = vpop.f32.mrb[35].mxu1  ;;  %6479 = vmatprep.subr.bf16.mxu1 %v6478_v40  ;;  %v6490_v13 = vpack.c.bf16 %v4178_v9, %v4177_v50  ;;  %v4209_v50 = vld [vmem:[%s9261_s13 + $0xb0] sm:$0xff]  ;;  %v4210_v9 = vld [vmem:[%s9261_s13 + $0xb8] sm:$0xff] }
 0x4b2   :  { %5503 = vmatprep.mubr.f32.mxu1 %v1833_v47 }
 0x4b3   :  { %5504 = vmatmul.mubr.f32.gmra.mrb[50].mxu1 %v5449_v16  ;;  %v4206_v16 = vld [vmem:[%s9261_s13 + $0x98] sm:$0xff] }
 0x4b4   :  { %v5452_v2 = vpop.f32.mrb[36].mxu1  ;;  %6481 = vmatpush3.bf16.msra.mxu1 %v6478_v40  ;;  %v6574_v63 = vpack.c.bf16 %v4206_v16, %v4205_v12 }
 0x4b5   :  { %v1843_v3 = vpop.f32.mrb[37].mxu1  ;;  %6483 = vmatprep.subr.bf16.mxu1 %v6482_v49 }
 0x4b6   :  { %5506 = vmatprep.mubr.f32.mxu1 %v1843_v3 }
 0x4b7   :  { %5507 = vmatmul.mubr.f32.gmra.mrb[52].mxu1 %v5452_v2  ;;  %v4208_v2 = vld [vmem:[%s9261_s13 + $0xa8] sm:$0xff] }
 0x4b8   :  { %v5455_v57 = vpop.f32.mrb[38].mxu1  ;;  %6485 = vmatpush3.bf16.msra.mxu1 %v6482_v49 }
 0x4b9   :  { %v1853_v8 = vpop.f32.mrb[39].mxu1  ;;  %6487 = vmatprep.subr.bf16.mxu1 %v6486_v20 }
 0x4ba   :  { %5509 = vmatprep.mubr.f32.mxu1 %v1853_v8  ;;  %v4212_v8 = vld [vmem:[%s9261_s13 + $0xc8] sm:$0xff] }
 0x4bb   :  { %5510 = vmatmul.mubr.f32.gmra.mrb[54].mxu1 %v5455_v57  ;;  %v4211_v57 = vld [vmem:[%s9261_s13 + $0xc0] sm:$0xff] }
 0x4bc   :  { %v5458_v15 = vpop.f32.mrb[40].mxu1  ;;  %6489 = vmatpush3.bf16.msra.mxu1 %v6486_v20  ;;  %v6578_v20 = vpack.c.bf16 %v4208_v2, %v4207_v58 }
 0x4bd   :  { %v1863_v25 = vpop.f32.mrb[41].mxu1  ;;  %6491 = vmatprep.subr.bf16.mxu1 %v6490_v13 }
 0x4be   :  { %5512 = vmatprep.mubr.f32.mxu1 %v1863_v25  ;;  %v4215_v25 = vld [vmem:[%s9261_s13 + $0xe0] sm:$0xff] }
 0x4bf   :  { %5513 = vmatmul.mubr.f32.gmra.mrb[56].mxu1 %v5458_v15  ;;  %v6590_v15 = vpack.c.bf16 %v4214_v45, %v4213_v44  ;;  %v8689_v45 = vld [vmem:[%s9262_s12 + $0x1] ss:$0 sm:$0xff] }
 0x4c0   :  { %v5461_v29 = vpop.f32.mrb[42].mxu1  ;;  %6493 = vmatpush3.bf16.msra.mxu1 %v6490_v13  ;;  %v6586_v13 = vpack.c.bf16 %v4212_v8, %v4211_v57 }
 0x4c1   :  { %v1873_v34 = vpop.f32.mrb[43].mxu1  ;;  %6495 = vmatprep.subr.bf16.mxu1 %v6494_v18 }
 0x4c2   :  { %5515 = vmatprep.mubr.f32.mxu1 %v1873_v34 }
 0x4c3   :  { %5516 = vmatmul.mubr.f32.gmra.mrb[58].mxu1 %v5461_v29  ;;  %v4218_v29 = vld [vmem:[%s9261_s13 + $0xf8] sm:$0xff] }
 0x4c4   :  { %v5464_v60 = vpop.f32.mrb[44].mxu1  ;;  %6497 = vmatpush3.bf16.msra.mxu1 %v6494_v18  ;;  %v4216_v18 = vld [vmem:[%s9261_s13 + $0xe8] sm:$0xff]  ;;  %v6598_v34 = vpack.c.bf16 %v4218_v29, %v4217_v5 }
 0x4c5   :  { %v1883_v35 = vpop.f32.mrb[45].mxu1  ;;  %6499 = vmatprep.subr.bf16.mxu1 %v6498_v0  ;;  %v6594_v32 = vpack.c.bf16 %v4216_v18, %v4215_v25 }
 0x4c6   :  { %5518 = vmatprep.mubr.f32.mxu1 %v1883_v35 }
 0x4c7   :  { %5519 = vmatmul.mubr.f32.gmra.mrb[60].mxu1 %v5464_v60 }
 0x4c8   :  { %v5467_v40 = vpop.f32.mrb[46].mxu1  ;;  %6501 = vmatpush3.bf16.msra.mxu1 %v6498_v0 }
 0x4c9   :  { %v1893_v43 = vpop.f32.mrb[47].mxu1  ;;  %6503 = vmatprep.subr.bf16.mxu1 %v6502_v61 }
 0x4ca   :  { %5521 = vmatprep.mubr.f32.mxu1 %v1893_v43 }
 0x4cb   :  { %5522 = vmatmul.mubr.f32.gmra.mrb[62].mxu1 %v5467_v40  ;;  %v5614_v47 = vpop.f32.mrb[64].mxu0 }
 0x4cc   :  { %6505 = vmatpush3.bf16.msra.mxu1 %v6502_v61  ;;  %5556 = vmatprep.mubr.f32.mxu1 %v8242_v31  ;;  %v2460_v49 = vpop.f32.mrb[65].mxu0 }
 0x4cd   :  { %5668 = vmatprep.mubr.f32.mxu0 %v2460_v49 }
 0x4ce   :  { %5669 = vmatmul.mubr.f32.vlgmr.msra.gmra.mrb[80].mxu0 %v5614_v47 }
 0x4cf   :  { %5557 = vmatmul.mubr.f32.vlgmr.msra.gmra.mrb[48].mxu1 %v8250_v28  ;;  %v5617_v3 = vpop.f32.mrb[66].mxu0  ;;  %6573 = vmatpush3.bf16.msra.mxu0 %v8499_v33  ;;  %v6582_v33 = vpack.c.bf16 %v4210_v9, %v4209_v50 }
 0x4d0   :  { %5559 = vmatprep.mubr.f32.mxu1 %v8256_v53  ;;  %v2470_v31 = vpop.f32.mrb[67].mxu0  ;;  %6575 = vmatprep.subr.bf16.mxu0 %v6574_v63 }
 0x4d1   :  { %5671 = vmatprep.mubr.f32.mxu0 %v2470_v31 }
 0x4d2   :  { %5672 = vmatmul.mubr.f32.gmra.mrb[82].mxu0 %v5617_v3 }
 0x4d3   :  { %5560 = vmatmul.mubr.f32.gmra.mrb[50].mxu1 %v8268_v36  ;;  %v5620_v28 = vpop.f32.mrb[68].mxu0  ;;  %6577 = vmatpush3.bf16.msra.mxu0 %v6574_v63 }
 0x4d4   :  { %5562 = vmatprep.mubr.f32.mxu1 %v8278_v22  ;;  %v2480_v53 = vpop.f32.mrb[69].mxu0  ;;  %6579 = vmatprep.subr.bf16.mxu0 %v6578_v20 }
 0x4d5   :  { %5674 = vmatprep.mubr.f32.mxu0 %v2480_v53 }
 0x4d6   :  { %5675 = vmatmul.mubr.f32.gmra.mrb[84].mxu0 %v5620_v28 }
 0x4d7   :  { %5563 = vmatmul.mubr.f32.gmra.mrb[52].mxu1 %v8290_v52  ;;  %v5623_v36 = vpop.f32.mrb[70].mxu0  ;;  %6581 = vmatpush3.bf16.msra.mxu0 %v6578_v20 }
 0x4d8   :  { %5565 = vmatprep.mubr.f32.mxu1 %v8309_v30  ;;  %v2490_v22 = vpop.f32.mrb[71].mxu0  ;;  %6583 = vmatprep.subr.bf16.mxu0 %v6582_v33 }
 0x4d9   :  { %5677 = vmatprep.mubr.f32.mxu0 %v2490_v22 }
 0x4da   :  { %5678 = vmatmul.mubr.f32.gmra.mrb[86].mxu0 %v5623_v36 }
 0x4db   :  { %5566 = vmatmul.mubr.f32.gmra.mrb[54].mxu1 %v8311_v42  ;;  %v5626_v52 = vpop.f32.mrb[72].mxu0  ;;  %6585 = vmatpush3.bf16.msra.mxu0 %v6582_v33 }
 0x4dc   :  { %5568 = vmatprep.mubr.f32.mxu1 %v8329_v26  ;;  %v2500_v30 = vpop.f32.mrb[73].mxu0  ;;  %6587 = vmatprep.subr.bf16.mxu0 %v6586_v13 }
 0x4dd   :  { %5680 = vmatprep.mubr.f32.mxu0 %v2500_v30 }
 0x4de   :  { %5681 = vmatmul.mubr.f32.gmra.mrb[88].mxu0 %v5626_v52 }
 0x4df   :  { %5569 = vmatmul.mubr.f32.gmra.mrb[56].mxu1 %v8331_v48  ;;  %v5629_v42 = vpop.f32.mrb[74].mxu0  ;;  %6589 = vmatpush3.bf16.msra.mxu0 %v6586_v13 }
 0x4e0   :  { %5571 = vmatprep.mubr.f32.mxu1 %v8349_v38  ;;  %v2510_v26 = vpop.f32.mrb[75].mxu0  ;;  %6591 = vmatprep.subr.bf16.mxu0 %v6590_v15 }
 0x4e1   :  { %5683 = vmatprep.mubr.f32.mxu0 %v2510_v26 }
 0x4e2   :  { %5684 = vmatmul.mubr.f32.gmra.mrb[90].mxu0 %v5629_v42 }
 0x4e3   :  { %5572 = vmatmul.mubr.f32.gmra.mrb[58].mxu1 %v8351_v56  ;;  %v5632_v48 = vpop.f32.mrb[76].mxu0  ;;  %6593 = vmatpush3.bf16.msra.mxu0 %v6590_v15  ;;  %v7208_v56 = vld [vmem:[%s9254_s0] sm:$0xff] }
 0x4e4   :  { %5574 = vmatprep.mubr.f32.mxu1 %v8369_v7  ;;  %v2520_v38 = vpop.f32.mrb[77].mxu0  ;;  %6595 = vmatprep.subr.bf16.mxu0 %v6594_v32 }
 0x4e5   :  { %5686 = vmatprep.mubr.f32.mxu0 %v2520_v38 }
 0x4e6   :  { %5687 = vmatmul.mubr.f32.gmra.mrb[92].mxu0 %v5632_v48 }
 0x4e7   :  { %5575 = vmatmul.mubr.f32.gmra.mrb[60].mxu1 %v8371_v23  ;;  %v5635_v0 = vpop.f32.mrb[78].mxu0  ;;  %6597 = vmatpush3.bf16.msra.mxu0 %v6594_v32 }
 0x4e8   :  { %5577 = vmatprep.mubr.f32.mxu1 %v8382_v62  ;;  %v2530_v10 = vpop.f32.mrb[79].mxu0  ;;  %6599 = vmatprep.subr.bf16.mxu0 %v6598_v34 }
 0x4e9   :  { %5689 = vmatprep.mubr.f32.mxu0 %v2530_v10 }
 0x4ea   :  { %5690 = vmatmul.mubr.f32.gmra.mrb[94].mxu0 %v5635_v0 }
 0x4eb   :  { %5578 = vmatmul.mubr.f32.gmra.mrb[62].mxu1 %v8384_v4  ;;  %6601 = vmatpush3.bf16.msra.mxu0 %v6598_v34 }
 0x4ec   :  { %5724 = vmatprep.mubr.f32.mxu0 %v8173_v6  ;;  %5780 = vmatprep.mubr.f32.mxu1 %v7208_v56  ;;  %v7209_v6 = vld [vmem:[%s9258_s1] sm:$0xff] }
 0x4ee   :  { %5725 = vmatmul.mubr.f32.vlgmr.msra.gmra.mrb[80].mxu0 %v8175_v39  ;;  %v4185_v39 = vld [vmem:[%s9263_s9 + $0x1] ss:$0 sm:$0xff] }
 0x4ef   :  { %5727 = vmatprep.mubr.f32.mxu0 %v8182_v59 }
 0x4f2   :  { %5728 = vmatmul.mubr.f32.gmra.mrb[82].mxu0 %v8180_v51 }
 0x4f3   :  { %5730 = vmatprep.mubr.f32.mxu0 %v8188_v19 }
 0x4f6   :  { %5731 = vmatmul.mubr.f32.gmra.mrb[84].mxu0 %v8190_v27 }
 0x4f7   :  { %5733 = vmatprep.mubr.f32.mxu0 %v8196_v37 }
 0x4fa   :  { %5734 = vmatmul.mubr.f32.gmra.mrb[86].mxu0 %v8198_v46 }
 0x4fb   :  { %5736 = vmatprep.mubr.f32.mxu0 %v8204_v11 }
 0x4fe   :  { %5737 = vmatmul.mubr.f32.gmra.mrb[88].mxu0 %v8206_v24 }
 0x4ff   :  { %5739 = vmatprep.mubr.f32.mxu0 %v8212_v21 }
 0x502   :  { %5740 = vmatmul.mubr.f32.gmra.mrb[90].mxu0 %v8214_v1 }
 0x503   :  { %5742 = vmatprep.mubr.f32.mxu0 %v8220_v14 }
 0x506   :  { %5743 = vmatmul.mubr.f32.gmra.mrb[92].mxu0 %v8222_v17 }
 0x507   :  { %5745 = vmatprep.mubr.f32.mxu0 %v8228_v54 }
 0x50a   :  { %5746 = vmatmul.mubr.f32.gmra.mrb[94].mxu0 %v8236_v41 }
 0x50b   :  { %5948 = vmatprep.mubr.f32.mxu0 %v7209_v6 }
 0x5a2   :  { %v5558_v51 = vpop.f32.mrb[48].mxu1 }
 0x5a3   :  { %v8628_v59 = vadd.f32 %v5558_v51, %v4185_v39  ;;  %v2119_v19 = vpop.f32.mrb[49].mxu1 }
 0x5a4   :  { %v8630_v27 = vadd.f32 %v4185_v39, %v2119_v19 }
 0x5a5   :  { %v2215_v37 = vmul.f32 %v8628_v59, %v8628_v59 }
 0x5a6   :  { %v5561_v46 = vpop.f32.mrb[50].mxu1  ;;  %v2214_v11 = vmul.f32 %v8630_v27, %v8630_v27 }
 0x5a7   :  { %v8636_v24 = vadd.f32 %v5561_v46, %v4185_v39  ;;  %2232 = vadd.xlane.f32.xlu1 %v2215_v37  ;;  %v2129_v21 = vpop.f32.mrb[51].mxu1 }
 0x5a8   :  { %v8638_v1 = vadd.f32 %v4185_v39, %v2129_v21  ;;  %2230 = vadd.xlane.f32.xlu0 %v2214_v11 }
 0x5a9   :  { %v2217_v14 = vmul.f32 %v8636_v24, %v8636_v24 }
 0x5aa   :  { %v5564_v17 = vpop.f32.mrb[52].mxu1  ;;  %v2216_v54 = vmul.f32 %v8638_v1, %v8638_v1 }
 0x5ab   :  { %v8644_v41 = vadd.f32 %v5564_v17, %v4185_v39  ;;  %2236 = vadd.xlane.f32.xlu1 %v2217_v14  ;;  %v2139_v7 = vpop.f32.mrb[53].mxu1 }
 0x5ac   :  { %v8646_v23 = vadd.f32 %v4185_v39, %v2139_v7  ;;  %2234 = vadd.xlane.f32.xlu0 %v2216_v54 }
 0x5ad   :  { %v2219_v62 = vmul.f32 %v8644_v41, %v8644_v41 }
 0x5ae   :  { %v5567_v4 = vpop.f32.mrb[54].mxu1  ;;  %v2218_v55 = vmul.f32 %v8646_v23, %v8646_v23 }
 0x5af   :  { %v8652_v60 = vadd.f32 %v5567_v4, %v4185_v39  ;;  %2240 = vadd.xlane.f32.xlu1 %v2219_v62  ;;  %v2149_v35 = vpop.f32.mrb[55].mxu1 }
 0x5b0   :  { %v8654_v61 = vadd.f32 %v4185_v39, %v2149_v35  ;;  %2238 = vadd.xlane.f32.xlu0 %v2218_v55 }
 0x5b1   :  { %v2221_v40 = vmul.f32 %v8652_v60, %v8652_v60 }
 0x5b2   :  { %v5570_v43 = vpop.f32.mrb[56].mxu1  ;;  %v2220_v12 = vmul.f32 %v8654_v61, %v8654_v61 }
 0x5b3   :  { %v8660_v16 = vadd.f32 %v5570_v43, %v4185_v39  ;;  %2244 = vadd.xlane.f32.xlu1 %v2221_v40  ;;  %v2159_v47 = vpop.f32.mrb[57].mxu1 }
 0x5b4   :  { %v8662_v49 = vadd.f32 %v4185_v39, %v2159_v47  ;;  %2242 = vadd.xlane.f32.xlu0 %v2220_v12 }
 0x5b5   :  { %v2223_v63 = vmul.f32 %v8660_v16, %v8660_v16 }
 0x5b6   :  { %v5573_v58 = vpop.f32.mrb[58].mxu1  ;;  %v2222_v2 = vmul.f32 %v8662_v49, %v8662_v49 }
 0x5b7   :  { %v8668_v3 = vadd.f32 %v5573_v58, %v4185_v39  ;;  %2248 = vadd.xlane.f32.xlu1 %v2223_v63  ;;  %v2169_v31 = vpop.f32.mrb[59].mxu1 }
 0x5b8   :  { %v8670_v20 = vadd.f32 %v4185_v39, %v2169_v31  ;;  %2246 = vadd.xlane.f32.xlu0 %v2222_v2 }
 0x5b9   :  { %v2225_v50 = vmul.f32 %v8668_v3, %v8668_v3 }
 0x5ba   :  { %v5576_v9 = vpop.f32.mrb[60].mxu1  ;;  %v2224_v28 = vmul.f32 %v8670_v20, %v8670_v20 }
 0x5bb   :  { %v8676_v53 = vadd.f32 %v5576_v9, %v4185_v39  ;;  %2252 = vadd.xlane.f32.xlu1 %v2225_v50  ;;  %v2179_v33 = vpop.f32.mrb[61].mxu1 }
 0x5bc   :  { %v8678_v57 = vadd.f32 %v4185_v39, %v2179_v33  ;;  %2250 = vadd.xlane.f32.xlu0 %v2224_v28 }
 0x5bd   :  { %v2227_v8 = vmul.f32 %v8676_v53, %v8676_v53 }
 0x5be   :  { %v5579_v36 = vpop.f32.mrb[62].mxu1  ;;  %v2226_v22 = vmul.f32 %v8678_v57, %v8678_v57 }
 0x5bf   :  { %v8684_v13 = vadd.f32 %v5579_v36, %v4185_v39  ;;  %2256 = vadd.xlane.f32.xlu1 %v2227_v8  ;;  %v2189_v44 = vpop.f32.mrb[63].mxu1 }
 0x5c0   :  { %v8691_v52 = vadd.f32 %v4185_v39, %v2189_v44  ;;  %2254 = vadd.xlane.f32.xlu0 %v2226_v22 }
 0x5c1   :  { %v5726_v30 = vpop.f32.mrb[80].mxu0  ;;  %v2229_v15 = vmul.f32 %v8684_v13, %v8684_v13 }
 0x5c2   :  { %v8696_v25 = vadd.f32 %v5726_v30, %v8689_v45  ;;  %v2756_v18 = vpop.f32.mrb[81].mxu0  ;;  %v2228_v42 = vmul.f32 %v8691_v52, %v8691_v52 }
 0x5c3   :  { %v8701_v26 = vadd.f32 %v8689_v45, %v2756_v18  ;;  %2260 = vadd.xlane.f32.xlu1 %v2229_v15 }
 0x5c4   :  { %2258 = vadd.xlane.f32.xlu0 %v2228_v42  ;;  %v2852_v32 = vmul.f32 %v8696_v25, %v8696_v25 }
 0x5c5   :  { %v5729_v5 = vpop.f32.mrb[82].mxu0  ;;  %v2851_v29 = vmul.f32 %v8701_v26, %v8701_v26 }
 0x5c6   :  { %v8708_v48 = vadd.f32 %v5729_v5, %v8689_v45  ;;  %v2766_v38 = vpop.f32.mrb[83].mxu0 }
 0x5c7   :  { %v8711_v34 = vadd.f32 %v8689_v45, %v2766_v38  ;;  %2869 = vadd.xlane.f32.xlu1 %v2852_v32 }
 0x5c8   :  { %2867 = vadd.xlane.f32.xlu0 %v2851_v29  ;;  %v2854_v0 = vmul.f32 %v8708_v48, %v8708_v48 }
 0x5c9   :  { %v5732_v10 = vpop.f32.mrb[84].mxu0  ;;  %v2853_v56 = vmul.f32 %v8711_v34, %v8711_v34 }
 0x5ca   :  { %v8718_v6 = vadd.f32 %v5732_v10, %v8689_v45  ;;  %v2776_v39 = vpop.f32.mrb[85].mxu0 }
 0x5cb   :  { %v8721_v51 = vadd.f32 %v8689_v45, %v2776_v39  ;;  %2873 = vadd.xlane.f32.xlu1 %v2854_v0 }
 0x5cc   :  { %2871 = vadd.xlane.f32.xlu0 %v2853_v56  ;;  %v2856_v19 = vmul.f32 %v8718_v6, %v8718_v6 }
 0x5cd   :  { %v5735_v37 = vpop.f32.mrb[86].mxu0  ;;  %v2855_v46 = vmul.f32 %v8721_v51, %v8721_v51 }
 0x5ce   :  { %v8728_v11 = vadd.f32 %v5735_v37, %v8689_v45  ;;  %v2786_v21 = vpop.f32.mrb[87].mxu0 }
 0x5cf   :  { %v8731_v14 = vadd.f32 %v8689_v45, %v2786_v21  ;;  %2877 = vadd.xlane.f32.xlu1 %v2856_v19 }
 0x5d0   :  { %2875 = vadd.xlane.f32.xlu0 %v2855_v46  ;;  %v2858_v17 = vmul.f32 %v8728_v11, %v8728_v11 }
 0x5d1   :  { %v5738_v54 = vpop.f32.mrb[88].mxu0  ;;  %v2857_v7 = vmul.f32 %v8731_v14, %v8731_v14 }
 0x5d2   :  { %v8738_v62 = vadd.f32 %v5738_v54, %v8689_v45  ;;  %v2796_v4 = vpop.f32.mrb[89].mxu0 }
 0x5d3   :  { %v8741_v55 = vadd.f32 %v8689_v45, %v2796_v4  ;;  %2881 = vadd.xlane.f32.xlu1 %v2858_v17 }
 0x5d4   :  { %2879 = vadd.xlane.f32.xlu0 %v2857_v7  ;;  %v2860_v35 = vmul.f32 %v8738_v62, %v8738_v62 }
 0x5d5   :  { %v5741_v40 = vpop.f32.mrb[90].mxu0  ;;  %v2859_v43 = vmul.f32 %v8741_v55, %v8741_v55 }
 0x5d6   :  { %v8748_v12 = vadd.f32 %v5741_v40, %v8689_v45  ;;  %v2806_v47 = vpop.f32.mrb[91].mxu0 }
 0x5d7   :  { %v8751_v63 = vadd.f32 %v8689_v45, %v2806_v47  ;;  %2885 = vadd.xlane.f32.xlu1 %v2860_v35 }
 0x5d8   :  { %2883 = vadd.xlane.f32.xlu0 %v2859_v43  ;;  %v2862_v58 = vmul.f32 %v8748_v12, %v8748_v12 }
 0x5d9   :  { %v5744_v2 = vpop.f32.mrb[92].mxu0  ;;  %v2861_v31 = vmul.f32 %v8751_v63, %v8751_v63 }
 0x5da   :  { %v8758_v50 = vadd.f32 %v5744_v2, %v8689_v45  ;;  %v2816_v9 = vpop.f32.mrb[93].mxu0 }
 0x5db   :  { %v8761_v28 = vadd.f32 %v8689_v45, %v2816_v9  ;;  %2889 = vadd.xlane.f32.xlu1 %v2862_v58 }
 0x5dc   :  { %2887 = vadd.xlane.f32.xlu0 %v2861_v31  ;;  %v2864_v33 = vmul.f32 %v8758_v50, %v8758_v50 }
 0x5dd   :  { %v5747_v8 = vpop.f32.mrb[94].mxu0  ;;  %v2863_v36 = vmul.f32 %v8761_v28, %v8761_v28 }
 0x5de   :  { %v8768_v22 = vadd.f32 %v5747_v8, %v8689_v45  ;;  %v2826_v44 = vpop.f32.mrb[95].mxu0 }
 0x5df   :  { %v8771_v30 = vadd.f32 %v8689_v45, %v2826_v44  ;;  %2893 = vadd.xlane.f32.xlu1 %v2864_v33 }
 0x5e0   :  { %2891 = vadd.xlane.f32.xlu0 %v2863_v36  ;;  %v2866_v15 = vmul.f32 %v8768_v22, %v8768_v22 }
 0x5e1   :  { %v2865_v18 = vmul.f32 %v8771_v30, %v8771_v30 }
 0x5e3   :  { %2897 = vadd.xlane.f32.xlu1 %v2866_v15 }
 0x5e4   :  { %2895 = vadd.xlane.f32.xlu0 %v2865_v18 }
 0x634   :  { %v2233_v42 = vpop.xlane.xlu1 %2232 }
 0x635   :  { %v2263_v32 = vmax.f32 %v2233_v42, 1e-24  ;;  %v2231_v5 = vpop.xlane.xlu0 %2230 }
 0x636   :  { %v2262_v29 = vmax.f32 %v2231_v5, 1e-24 }
 0x637   :  { %7114 = vrsqrt.f32 %v2263_v32 }
 0x638   :  { %7116 = vrsqrt.f32 %v2262_v29  ;;  %v2237_v38 = vpop.xlane.xlu1 %2236 }
 0x639   :  { %v2265_v0 = vmax.f32 %v2237_v38, 1e-24  ;;  %v2235_v45 = vpop.xlane.xlu0 %2234 }
 0x63a   :  { %v2264_v10 = vmax.f32 %v2235_v45, 1e-24 }
 0x63b   :  { %7118 = vrsqrt.f32 %v2265_v0 }
 0x63c   :  { %7120 = vrsqrt.f32 %v2264_v10  ;;  %v2241_v56 = vpop.xlane.xlu1 %2240 }
 0x63d   :  { %v2267_v39 = vmax.f32 %v2241_v56, 1e-24  ;;  %v2239_v19 = vpop.xlane.xlu0 %2238 }
 0x63e   :  { %v2266_v37 = vmax.f32 %v2239_v19, 1e-24 }
 0x63f   :  { %7122 = vrsqrt.f32 %v2267_v39 }
 0x640   :  { %7124 = vrsqrt.f32 %v2266_v37  ;;  %v2245_v46 = vpop.xlane.xlu1 %2244 }
 0x641   :  { %v7115_v21 = vpop.eup %7114  ;;  %v2269_v17 = vmax.f32 %v2245_v46, 1e-24  ;;  %v2243_v54 = vpop.xlane.xlu0 %2242 }
 0x642   :  { %v7117_v7 = vpop.eup %7116  ;;  %v2268_v4 = vmax.f32 %v2243_v54, 1e-24  ;;  %v2295_v35 = vmul.f32 %v7115_v21, %v8628_v59 }
 0x643   :  { %7126 = vrsqrt.f32 %v2269_v17  ;;  %v2294_v40 = vmul.f32 %v7117_v7, %v8630_v27 }
 0x644   :  { %7128 = vrsqrt.f32 %v2268_v4  ;;  %v2249_v43 = vpop.xlane.xlu1 %2248  ;;  %vm2311_vm0 = vcmp.ge.f32.partialorder %v2295_v35, 0.0  ;;  %v2327_v47 = vmul.f32 0.1, %v2295_v35 }
 0x645   :  { %v7119_v58 = vpop.eup %7118  ;;  %v2271_v2 = vmax.f32 %v2249_v43, 1e-24  ;;  %v2247_v31 = vpop.xlane.xlu0 %2246  ;;  %vm2310_vm1 = vcmp.ge.f32.partialorder %v2294_v40, 0.0  ;;  %v2326_v9 = vmul.f32 0.1, %v2294_v40 }
 0x646   :  { %v7121_v33 = vpop.eup %7120  ;;  %v2270_v8 = vmax.f32 %v2247_v31, 1e-24  ;;  %v8779_v36 = vsel %vm2311_vm0, %v2295_v35, %v2327_v47  ;;  %v2297_v44 = vmul.f32 %v7119_v58, %v8636_v24 }
 0x647   :  { %7130 = vrsqrt.f32 %v2271_v2  ;;  %v8782_v59 = vsel %vm2310_vm1, %v2294_v40, %v2326_v9  ;;  %v2296_v27 = vmul.f32 %v7121_v33, %v8638_v1 }
 0x648   :  { %7132 = vrsqrt.f32 %v2270_v8  ;;  %v2253_v15 = vpop.xlane.xlu1 %2252  ;;  %v6698_v18 = vpack.c.bf16 %v8779_v36, %v8782_v59  ;;  %vm2313_vm2 = vcmp.ge.f32.partialorder %v2297_v44, 0.0  ;;  %v2329_v42 = vmul.f32 0.1, %v2297_v44 }
 0x649   :  { %v7123_v32 = vpop.eup %7122  ;;  %v2273_v5 = vmax.f32 %v2253_v15, 1e-24  ;;  %v2251_v29 = vpop.xlane.xlu0 %2250  ;;  %vm2312_vm3 = vcmp.ge.f32.partialorder %v2296_v27, 0.0  ;;  %v2328_v38 = vmul.f32 0.1, %v2296_v27 }
 0x64a   :  { %v7125_v0 = vpop.eup %7124  ;;  %v2272_v45 = vmax.f32 %v2251_v29, 1e-24  ;;  %6699 = vmatprep.subr.bf16.mxu0 %v6698_v18  ;;  %v8787_v24 = vsel %vm2313_vm2, %v2297_v44, %v2329_v42  ;;  %v2299_v10 = vmul.f32 %v7123_v32, %v8644_v41 }
 0x64b   :  { %7134 = vrsqrt.f32 %v2273_v5  ;;  %6701 = vmatpush3.bf16.msra.mxu0 %v6698_v18  ;;  %v8790_v1 = vsel %vm2312_vm3, %v2296_v27, %v2328_v38  ;;  %v2298_v56 = vmul.f32 %v7125_v0, %v8646_v23 }
 0x64c   :  { %7136 = vrsqrt.f32 %v2272_v45  ;;  %v2257_v39 = vpop.xlane.xlu1 %2256  ;;  %v6702_v19 = vpack.c.bf16 %v8787_v24, %v8790_v1  ;;  %vm2315_vm4 = vcmp.ge.f32.partialorder %v2299_v10, 0.0  ;;  %v2331_v37 = vmul.f32 0.1, %v2299_v10 }
 0x64d   :  { %v7127_v46 = vpop.eup %7126  ;;  %v2275_v21 = vmax.f32 %v2257_v39, 1e-24  ;;  %v2255_v17 = vpop.xlane.xlu0 %2254  ;;  %vm2314_vm5 = vcmp.ge.f32.partialorder %v2298_v56, 0.0  ;;  %v2330_v54 = vmul.f32 0.1, %v2298_v56 }
 0x64e   :  { %v7129_v7 = vpop.eup %7128  ;;  %v2274_v41 = vmax.f32 %v2255_v17, 1e-24  ;;  %6703 = vmatprep.subr.bf16.mxu0 %v6702_v19  ;;  %v8795_v4 = vsel %vm2315_vm4, %v2299_v10, %v2331_v37  ;;  %v2301_v35 = vmul.f32 %v7127_v46, %v8652_v60 }
 0x64f   :  { %7138 = vrsqrt.f32 %v2275_v21  ;;  %6705 = vmatpush3.bf16.msra.mxu0 %v6702_v19  ;;  %v8798_v23 = vsel %vm2314_vm5, %v2298_v56, %v2330_v54  ;;  %v2300_v40 = vmul.f32 %v7129_v7, %v8654_v61 }
 0x650   :  { %7140 = vrsqrt.f32 %v2274_v41  ;;  %v2261_v43 = vpop.xlane.xlu1 %2260  ;;  %v6706_v47 = vpack.c.bf16 %v8795_v4, %v8798_v23  ;;  %vm2317_vm6 = vcmp.ge.f32.partialorder %v2301_v35, 0.0  ;;  %v2333_v58 = vmul.f32 0.1, %v2301_v35 }
 0x651   :  { %v7131_v2 = vpop.eup %7130  ;;  %v2277_v31 = vmax.f32 %v2261_v43, 1e-24  ;;  %v2259_v9 = vpop.xlane.xlu0 %2258  ;;  %vm2316_vm7 = vcmp.ge.f32.partialorder %v2300_v40, 0.0  ;;  %v2332_v33 = vmul.f32 0.1, %v2300_v40 }
 0x652   :  { %v7133_v8 = vpop.eup %7132  ;;  %v2276_v60 = vmax.f32 %v2259_v9, 1e-24  ;;  %6707 = vmatprep.subr.bf16.mxu0 %v6706_v47  ;;  %v8803_v44 = vsel %vm2317_vm6, %v2301_v35, %v2333_v58  ;;  %v2303_v27 = vmul.f32 %v7131_v2, %v8660_v16 }
 0x653   :  { %7142 = vrsqrt.f32 %v2277_v31  ;;  %6709 = vmatpush3.bf16.msra.mxu0 %v6706_v47  ;;  %v8806_v61 = vsel %vm2316_vm7, %v2300_v40, %v2332_v33  ;;  %v2302_v15 = vmul.f32 %v7133_v8, %v8662_v49 }
 0x654   :  { %7144 = vrsqrt.f32 %v2276_v60  ;;  %v2870_v18 = vpop.xlane.xlu1 %2869  ;;  %v6710_v42 = vpack.c.bf16 %v8803_v44, %v8806_v61  ;;  %vm2319_vm8 = vcmp.ge.f32.partialorder %v2303_v27, 0.0  ;;  %v2335_v32 = vmul.f32 0.1, %v2303_v27 }
 0x655   :  { %v7135_v5 = vpop.eup %7134  ;;  %v2900_v29 = vmax.f32 %v2870_v18, 1e-24  ;;  %v2868_v38 = vpop.xlane.xlu0 %2867  ;;  %vm2318_vm9 = vcmp.ge.f32.partialorder %v2302_v15, 0.0  ;;  %v2334_v0 = vmul.f32 0.1, %v2302_v15 }
 0x656   :  { %v7137_v45 = vpop.eup %7136  ;;  %v2899_v16 = vmax.f32 %v2868_v38, 1e-24  ;;  %6711 = vmatprep.subr.bf16.mxu0 %v6710_v42  ;;  %v8811_v10 = vsel %vm2319_vm8, %v2303_v27, %v2335_v32  ;;  %v2305_v56 = vmul.f32 %v7135_v5, %v8668_v3 }
 0x657   :  { %7146 = vrsqrt.f32 %v2900_v29  ;;  %6713 = vmatpush3.bf16.msra.mxu0 %v6710_v42  ;;  %v8814_v49 = vsel %vm2318_vm9, %v2302_v15, %v2334_v0  ;;  %v2304_v39 = vmul.f32 %v7137_v45, %v8670_v20  ;;  %v4254_v29 = vld [vmem:[%s9260_s11 + $0x100] sm:$0xff] }
 0x658   :  { %7148 = vrsqrt.f32 %v2899_v16  ;;  %v2874_v19 = vpop.xlane.xlu1 %2873  ;;  %v6714_v37 = vpack.c.bf16 %v8811_v10, %v8814_v49  ;;  %vm2321_vm10 = vcmp.ge.f32.partialorder %v2305_v56, 0.0  ;;  %v2337_v46 = vmul.f32 0.1, %v2305_v56 }
 0x659   :  { %v7139_v21 = vpop.eup %7138  ;;  %v2902_v17 = vmax.f32 %v2874_v19, 1e-24  ;;  %v2872_v54 = vpop.xlane.xlu0 %2871  ;;  %vm2320_vm11 = vcmp.ge.f32.partialorder %v2304_v39, 0.0  ;;  %v2336_v7 = vmul.f32 0.1, %v2304_v39 }
 0x65a   :  { %v7141_v41 = vpop.eup %7140  ;;  %v2901_v3 = vmax.f32 %v2872_v54, 1e-24  ;;  %6715 = vmatprep.subr.bf16.mxu0 %v6714_v37  ;;  %v8819_v35 = vsel %vm2321_vm10, %v2305_v56, %v2337_v46  ;;  %v2307_v40 = vmul.f32 %v7139_v21, %v8676_v53 }
 0x65b   :  { %7150 = vrsqrt.f32 %v2902_v17  ;;  %6717 = vmatpush3.bf16.msra.mxu0 %v6714_v37  ;;  %v8822_v20 = vsel %vm2320_vm11, %v2304_v39, %v2336_v7  ;;  %v2306_v43 = vmul.f32 %v7141_v41, %v8678_v57 }
 0x65c   :  { %7152 = vrsqrt.f32 %v2901_v3  ;;  %v2878_v47 = vpop.xlane.xlu1 %2877  ;;  %v6718_v58 = vpack.c.bf16 %v8819_v35, %v8822_v20  ;;  %vm2323_vm12 = vcmp.ge.f32.partialorder %v2307_v40, 0.0  ;;  %v2339_v2 = vmul.f32 0.1, %v2307_v40 }
 0x65d   :  { %v7143_v31 = vpop.eup %7142  ;;  %v2904_v9 = vmax.f32 %v2878_v47, 1e-24  ;;  %v2876_v33 = vpop.xlane.xlu0 %2875  ;;  %vm2322_vm13 = vcmp.ge.f32.partialorder %v2306_v43, 0.0  ;;  %v2338_v8 = vmul.f32 0.1, %v2306_v43 }
 0x65e   :  { %v7145_v60 = vpop.eup %7144  ;;  %v2903_v53 = vmax.f32 %v2876_v33, 1e-24  ;;  %6719 = vmatprep.subr.bf16.mxu0 %v6718_v58  ;;  %v8827_v27 = vsel %vm2323_vm12, %v2307_v40, %v2339_v2  ;;  %v2309_v15 = vmul.f32 %v7143_v31, %v8684_v13  ;;  %v4255_v13 = vld [vmem:[%s9260_s11 + $0x108] sm:$0xff]  ;;  %v4256_v2 = vld [vmem:[%s9260_s11 + $0x110] sm:$0xff]  ;;  %v4257_v31 = vld [vmem:[%s9260_s11 + $0x118] sm:$0xff] }
 0x65f   :  { %7154 = vrsqrt.f32 %v2904_v9  ;;  %6721 = vmatpush3.bf16.msra.mxu0 %v6718_v58  ;;  %v8830_v57 = vsel %vm2322_vm13, %v2306_v43, %v2338_v8  ;;  %v2308_v18 = vmul.f32 %v7145_v60, %v8691_v52  ;;  %v6730_v21 = vpack.c.bf16 %v4255_v13, %v4254_v29 }
 0x660   :  { %7156 = vrsqrt.f32 %v2903_v53  ;;  %v2882_v42 = vpop.xlane.xlu1 %2881  ;;  %v6722_v32 = vpack.c.bf16 %v8827_v27, %v8830_v57  ;;  %vm2325_vm14 = vcmp.ge.f32.partialorder %v2309_v15, 0.0  ;;  %v2341_v5 = vmul.f32 0.1, %v2309_v15 }
 0x661   :  { %v7147_v38 = vpop.eup %7146  ;;  %v2906_v0 = vmax.f32 %v2882_v42, 1e-24  ;;  %v2880_v45 = vpop.xlane.xlu0 %2879  ;;  %vm2324_vm15 = vcmp.ge.f32.partialorder %v2308_v18, 0.0  ;;  %v2340_v52 = vmul.f32 0.1, %v2308_v18 }
 0x662   :  { %v7149_v16 = vpop.eup %7148  ;;  %v2905_v56 = vmax.f32 %v2880_v45, 1e-24  ;;  %6723 = vmatprep.subr.bf16.mxu0 %v6722_v32  ;;  %v8841_v39 = vsel %vm2325_vm14, %v2309_v15, %v2341_v5  ;;  %v2932_v19 = vmul.f32 %v7147_v38, %v8696_v25  ;;  %v4259_v45 = vld [vmem:[%s9260_s11 + $0x128] sm:$0xff] }
 0x663   :  { %7158 = vrsqrt.f32 %v2906_v0  ;;  %6725 = vmatpush3.bf16.msra.mxu0 %v6722_v32  ;;  %v8844_v37 = vsel %vm2324_vm15, %v2308_v18, %v2340_v52  ;;  %v2931_v46 = vmul.f32 %v7149_v16, %v8701_v26  ;;  %v6734_v32 = vpack.c.bf16 %v4257_v31, %v4256_v2  ;;  %v4258_v0 = vld [vmem:[%s9260_s11 + $0x120] sm:$0xff]  ;;  %v7211_v52 = vld [vmem:[%s9258_s1 + $0x10] sm:$0xff] }
 0x664   :  { %7160 = vrsqrt.f32 %v2905_v56  ;;  %v2886_v17 = vpop.xlane.xlu1 %2885  ;;  %v6726_v54 = vpack.c.bf16 %v8841_v39, %v8844_v37  ;;  %vm2948_vm0 = vcmp.ge.f32.partialorder %v2932_v19, 0.0  ;;  %v2964_v7 = vmul.f32 0.1, %v2932_v19  ;;  %v7213_v2 = vld [vmem:[%s9258_s1 + $0x20] sm:$0xff] }
 0x665   :  { %v7151_v41 = vpop.eup %7150  ;;  %v2908_v3 = vmax.f32 %v2886_v17, 1e-24  ;;  %v2884_v40 = vpop.xlane.xlu0 %2883  ;;  %vm2947_vm1 = vcmp.ge.f32.partialorder %v2931_v46, 0.0  ;;  %v2963_v43 = vmul.f32 0.1, %v2931_v46 }
 0x666   :  { %v7153_v25 = vpop.eup %7152  ;;  %v2907_v47 = vmax.f32 %v2884_v40, 1e-24  ;;  %6727 = vmatprep.subr.bf16.mxu0 %v6726_v54  ;;  %v8849_v58 = vsel %vm2948_vm0, %v2932_v19, %v2964_v7  ;;  %v2934_v26 = vmul.f32 %v7151_v41, %v8708_v48  ;;  %vm4141_vm0 = vcmask 7168  }
 0x667   :  { %7162 = vrsqrt.f32 %v2908_v3  ;;  %6729 = vmatpush3.bf16.msra.mxu0 %v6726_v54  ;;  %v8858_v9 = vsel %vm2947_vm1, %v2931_v46, %v2963_v43  ;;  %v2933_v33 = vmul.f32 %v7153_v25, %v8711_v34  ;;  %v7210_v34 = vld [vmem:[%s9258_s1 + $0x8] sm:$0xff]  ;;  %v6738_v3 = vpack.c.bf16 %v4259_v45, %v4258_v0  ;;  %v7215_v45 = vld [vmem:[%s9258_s1 + $0x30] sm:$0xff] }
 0x668   :  { %7164 = vrsqrt.f32 %v2907_v47  ;;  %v2890_v8 = vpop.xlane.xlu1 %2889  ;;  %v6602_v60 = vpack.c.bf16 %v8849_v58, %v8858_v9  ;;  %vm2950_vm2 = vcmp.ge.f32.partialorder %v2934_v26, 0.0  ;;  %v2966_v48 = vmul.f32 0.1, %v2934_v26  ;;  %6731 = vmatprep.subr.bf16.mxu0 %v6730_v21  ;;  %v4263_v0 = vld [vmem:[%s9260_s11 + $0x148] sm:$0xff] }
 0x669   :  { %v7155_v53 = vpop.eup %7154  ;;  %v2910_v15 = vmax.f32 %v2890_v8, 1e-24  ;;  %v2888_v18 = vpop.xlane.xlu0 %2887  ;;  %vm2949_vm3 = vcmp.ge.f32.partialorder %v2933_v33, 0.0  ;;  %v2965_v42 = vmul.f32 0.1, %v2933_v33 }
 0x66a   :  { %v7157_v5 = vpop.eup %7156  ;;  %v2909_v29 = vmax.f32 %v2888_v18, 1e-24  ;;  %6603 = vmatprep.subr.bf16.mxu1 %v6602_v60  ;;  %5949 = vmatmul.mubr.f32.vlgmr.msra.gmra.mrb[96].mxu0 %v7210_v34  ;;  %v8866_v13 = vsel %vm2950_vm2, %v2934_v26, %v2966_v48  ;;  %v2936_v38 = vmul.f32 %v7155_v53, %v8718_v6  ;;  %v4261_v26 = vld [vmem:[%s9260_s11 + $0x138] sm:$0xff] }
 0x66b   :  { %7166 = vrsqrt.f32 %v2910_v15  ;;  %6605 = vmatpush3.bf16.msra.mxu1 %v6602_v60  ;;  %5951 = vmatprep.mubr.f32.mxu0 %v7211_v52  ;;  %v8879_v16 = vsel %vm2949_vm3, %v2933_v33, %v2965_v42  ;;  %v2935_v6 = vmul.f32 %v7157_v5, %v8721_v51  ;;  %v7212_v51 = vld [vmem:[%s9258_s1 + $0x18] sm:$0xff] }
 0x66c   :  { %7168 = vrsqrt.f32 %v2909_v29  ;;  %v2894_v56 = vpop.xlane.xlu1 %2893  ;;  %v6606_v19 = vpack.c.bf16 %v8866_v13, %v8879_v16  ;;  %vm2952_vm4 = vcmp.ge.f32.partialorder %v2936_v38, 0.0  ;;  %v2968_v46 = vmul.f32 0.1, %v2936_v38  ;;  %6733 = vmatpush3.bf16.msra.mxu0 %v6730_v21  ;;  %v4260_v21 = vld [vmem:[%s9260_s11 + $0x130] sm:$0xff] }
 0x66d   :  { %v7159_v17 = vpop.eup %7158  ;;  %v2912_v54 = vmax.f32 %v2894_v56, 1e-24  ;;  %v2892_v7 = vpop.xlane.xlu0 %2891  ;;  %vm2951_vm5 = vcmp.ge.f32.partialorder %v2935_v6, 0.0  ;;  %v2967_v41 = vmul.f32 0.1, %v2935_v6  ;;  %6735 = vmatprep.subr.bf16.mxu0 %v6734_v32  ;;  %v6742_v42 = vpack.c.bf16 %v4261_v26, %v4260_v21 }
 0x66e   :  { %v7161_v40 = vpop.eup %7160  ;;  %v2911_v43 = vmax.f32 %v2892_v7, 1e-24  ;;  %6607 = vmatprep.subr.bf16.mxu1 %v6606_v19  ;;  %5952 = vmatmul.mubr.f32.gmra.mrb[98].mxu0 %v7212_v51  ;;  %v8887_v25 = vsel %vm2952_vm4, %v2936_v38, %v2968_v46  ;;  %v2938_v47 = vmul.f32 %v7159_v17, %v8728_v11  ;;  %v7216_v7 = vld [vmem:[%s9258_s1 + $0x38] sm:$0xff] }
 0x66f   :  { %7170 = vrsqrt.f32 %v2912_v54  ;;  %6609 = vmatpush3.bf16.msra.mxu1 %v6606_v19  ;;  %5954 = vmatprep.mubr.f32.mxu0 %v7213_v2  ;;  %v8900_v31 = vsel %vm2951_vm5, %v2935_v6, %v2967_v41  ;;  %v2937_v11 = vmul.f32 %v7161_v40, %v8731_v14  ;;  %v7214_v14 = vld [vmem:[%s9258_s1 + $0x28] sm:$0xff]  ;;  %v4265_v40 = vld [vmem:[%s9260_s11 + $0x158] sm:$0xff] }
 0x670   :  { %7172 = vrsqrt.f32 %v2911_v43  ;;  %v2898_v33 = vpop.xlane.xlu1 %2897  ;;  %v6610_v8 = vpack.c.bf16 %v8887_v25, %v8900_v31  ;;  %vm2954_vm6 = vcmp.ge.f32.partialorder %v2938_v47, 0.0  ;;  %v2970_v60 = vmul.f32 0.1, %v2938_v47  ;;  %6737 = vmatpush3.bf16.msra.mxu0 %v6734_v32  ;;  %v4262_v32 = vld [vmem:[%s9260_s11 + $0x140] sm:$0xff] }
 0x671   :  { %v7163_v48 = vpop.eup %7162  ;;  %v2914_v53 = vmax.f32 %v2898_v33, 1e-24  ;;  %v2896_v15 = vpop.xlane.xlu0 %2895  ;;  %vm2953_vm7 = vcmp.ge.f32.partialorder %v2937_v11, 0.0  ;;  %v2969_v18 = vmul.f32 0.1, %v2937_v11  ;;  %6739 = vmatprep.subr.bf16.mxu0 %v6738_v3  ;;  %v6746_v17 = vpack.c.bf16 %v4263_v0, %v4262_v32  ;;  %v7217_v43 = vld [vmem:[%s9258_s1 + $0x40] sm:$0xff] }
 0x672   :  { %v7165_v5 = vpop.eup %7164  ;;  %v2913_v29 = vmax.f32 %v2896_v15, 1e-24  ;;  %6611 = vmatprep.subr.bf16.mxu1 %v6610_v8  ;;  %5955 = vmatmul.mubr.f32.gmra.mrb[100].mxu0 %v7214_v14  ;;  %v8908_v34 = vsel %vm2954_vm6, %v2938_v47, %v2970_v60  ;;  %v2940_v38 = vmul.f32 %v7163_v48, %v8738_v62  ;;  %v4266_v48 = vld [vmem:[%s9260_s11 + $0x160] sm:$0xff]  ;;  %v7219_v15 = vld [vmem:[%s9258_s1 + $0x50] sm:$0xff]  ;;  %v7220_v0 = vld [vmem:[%s9258_s1 + $0x58] sm:$0xff] }
 0x673   :  { %7174 = vrsqrt.f32 %v2914_v53  ;;  %6613 = vmatpush3.bf16.msra.mxu1 %v6610_v8  ;;  %5957 = vmatprep.mubr.f32.mxu0 %v7215_v45  ;;  %v8921_v52 = vsel %vm2953_vm7, %v2937_v11, %v2969_v18  ;;  %v2939_v62 = vmul.f32 %v7165_v5, %v8741_v55  ;;  %v7218_v8 = vld [vmem:[%s9258_s1 + $0x48] sm:$0xff] }
 0x674   :  { %7176 = vrsqrt.f32 %v2913_v29  ;;  %v6614_v6 = vpack.c.bf16 %v8908_v34, %v8921_v52  ;;  %vm2956_vm8 = vcmp.ge.f32.partialorder %v2940_v38, 0.0  ;;  %v2972_v56 = vmul.f32 0.1, %v2940_v38  ;;  %6741 = vmatpush3.bf16.msra.mxu0 %v6738_v3  ;;  %v4264_v3 = vld [vmem:[%s9260_s11 + $0x150] sm:$0xff]  ;;  %v4267_v53 = vld [vmem:[%s9260_s11 + $0x168] sm:$0xff] }
 0x675   :  { %v7167_v19 = vpop.eup %7166  ;;  %vm2955_vm9 = vcmp.ge.f32.partialorder %v2939_v62, 0.0  ;;  %v2971_v46 = vmul.f32 0.1, %v2939_v62  ;;  %6743 = vmatprep.subr.bf16.mxu0 %v6742_v42  ;;  %v6750_v11 = vpack.c.bf16 %v4265_v40, %v4264_v3 }
 0x676   :  { %v7169_v54 = vpop.eup %7168  ;;  %6615 = vmatprep.subr.bf16.mxu1 %v6614_v6  ;;  %5958 = vmatmul.mubr.f32.gmra.mrb[102].mxu0 %v7216_v7  ;;  %v8929_v55 = vsel %vm2956_vm8, %v2940_v38, %v2972_v56  ;;  %v2942_v41 = vmul.f32 %v7167_v19, %v8748_v12  ;;  %v6754_v38 = vpack.c.bf16 %v4267_v53, %v4266_v48  ;;  %v7221_v56 = vld [vmem:[%s9258_s1 + $0x60] sm:$0xff]  ;;  %v7233_v48 = vld [vmem:[%s9254_s0 + $0x48] sm:$0xff]  ;;  %v7234_v53 = vld [vmem:[%s9254_s0 + $0x50] sm:$0xff] }
 0x677   :  { %6617 = vmatpush3.bf16.msra.mxu1 %v6614_v6  ;;  %5960 = vmatprep.mubr.f32.mxu0 %v7217_v43  ;;  %v8941_v51 = vsel %vm2955_vm9, %v2939_v62, %v2971_v46  ;;  %v2941_v47 = vmul.f32 %v7169_v54, %v8751_v63  ;;  %v4268_v62 = vld [vmem:[%s9260_s11 + $0x170] sm:$0xff]  ;;  %v4269_v6 = vld [vmem:[%s9260_s11 + $0x178] sm:$0xff] }
 0x678   :  { %v6618_v12 = vpack.c.bf16 %v8929_v55, %v8941_v51  ;;  %vm2958_vm10 = vcmp.ge.f32.partialorder %v2942_v41, 0.0  ;;  %v2974_v21 = vmul.f32 0.1, %v2942_v41  ;;  %6745 = vmatpush3.bf16.msra.mxu0 %v6742_v42  ;;  %v6758_v7 = vpack.c.bf16 %v4269_v6, %v4268_v62  ;;  %v4222_v6 = vld [vmem:[%s9255_s8 + $0x110] sm:$0xff] }
 0x679   :  { %v7171_v26 = vpop.eup %7170  ;;  %vm2957_vm11 = vcmp.ge.f32.partialorder %v2941_v47, 0.0  ;;  %v2973_v2 = vmul.f32 0.1, %v2941_v47  ;;  %6747 = vmatprep.subr.bf16.mxu0 %v6746_v17 }
 0x67a   :  { %v7173_v33 = vpop.eup %7172  ;;  %6619 = vmatprep.subr.bf16.mxu1 %v6618_v12  ;;  %5961 = vmatmul.mubr.f32.gmra.mrb[104].mxu0 %v7218_v8  ;;  %v8949_v60 = vsel %vm2958_vm10, %v2942_v41, %v2974_v21  ;;  %v2944_v63 = vmul.f32 %v7171_v26, %v8758_v50  ;;  %v7222_v41 = vld [vmem:[%s9258_s1 + $0x68] sm:$0xff]  ;;  %v7226_v21 = vld [vmem:[%s9254_s0 + $0x10] sm:$0xff]  ;;  %v7227_v26 = vld [vmem:[%s9254_s0 + $0x18] sm:$0xff] }
 0x67b   :  { %6621 = vmatpush3.bf16.msra.mxu1 %v6618_v12  ;;  %5963 = vmatprep.mubr.f32.mxu0 %v7219_v15  ;;  %v8961_v18 = vsel %vm2957_vm11, %v2941_v47, %v2973_v2  ;;  %v2943_v42 = vmul.f32 %v7173_v33, %v8761_v28  ;;  %v7224_v47 = vld [vmem:[%s9258_s1 + $0x78] sm:$0xff]  ;;  %v7225_v12 = vld [vmem:[%s9254_s0 + $0x8] sm:$0xff]  ;;  %v7228_v2 = vld [vmem:[%s9254_s0 + $0x20] sm:$0xff] }
 0x67c   :  { %v6622_v50 = vpack.c.bf16 %v8949_v60, %v8961_v18  ;;  %vm2960_vm12 = vcmp.ge.f32.partialorder %v2944_v63, 0.0  ;;  %v2976_v5 = vmul.f32 0.1, %v2944_v63  ;;  %6749 = vmatpush3.bf16.msra.mxu0 %v6746_v17  ;;  %v7230_v33 = vld [vmem:[%s9254_s0 + $0x30] sm:$0xff]  ;;  %v7231_v8 = vld [vmem:[%s9254_s0 + $0x38] sm:$0xff] }
 0x67d   :  { %v7175_v29 = vpop.eup %7174  ;;  %vm2959_vm13 = vcmp.ge.f32.partialorder %v2943_v42, 0.0  ;;  %v2975_v14 = vmul.f32 0.1, %v2943_v42  ;;  %6751 = vmatprep.subr.bf16.mxu0 %v6750_v11  ;;  %v7235_v15 = vld [vmem:[%s9254_s0 + $0x58] sm:$0xff] }
 0x67e   :  { %v7177_v32 = vpop.eup %7176  ;;  %6623 = vmatprep.subr.bf16.mxu1 %v6622_v50  ;;  %5964 = vmatmul.mubr.f32.gmra.mrb[106].mxu0 %v7220_v0  ;;  %v8969_v45 = vsel %vm2960_vm12, %v2944_v63, %v2976_v5  ;;  %v2946_v28 = vmul.f32 %v7175_v29, %v8768_v22  ;;  %v7232_v63 = vld [vmem:[%s9254_s0 + $0x40] sm:$0xff]  ;;  %v7238_v5 = vld [vmem:[%s9254_s0 + $0x70] sm:$0xff]  ;;  %v7239_v29 = vld [vmem:[%s9254_s0 + $0x78] sm:$0xff] }
 0x67f   :  { %6625 = vmatpush3.bf16.msra.mxu1 %v6622_v50  ;;  %5966 = vmatprep.mubr.f32.mxu0 %v7221_v56  ;;  %v8981_v19 = vsel %vm2959_vm13, %v2943_v42, %v2975_v14  ;;  %v2945_v46 = vmul.f32 %v7177_v32, %v8771_v30  ;;  %v7223_v30 = vld [vmem:[%s9258_s1 + $0x70] sm:$0xff]  ;;  %v7236_v42 = vld [vmem:[%s9254_s0 + $0x60] sm:$0xff]  ;;  %v7237_v50 = vld [vmem:[%s9254_s0 + $0x68] sm:$0xff] }
 0x680   :  { %v6626_v22 = vpack.c.bf16 %v8969_v45, %v8981_v19  ;;  %vm2962_vm14 = vcmp.ge.f32.partialorder %v2946_v28, 0.0  ;;  %v2978_v17 = vmul.f32 0.1, %v2946_v28  ;;  %6753 = vmatpush3.bf16.msra.mxu0 %v6750_v11  ;;  %v7229_v11 = vld [vmem:[%s9254_s0 + $0x28] sm:$0xff]  ;;  %v4220_v14 = vld [vmem:[%s9255_s8 + $0x100] sm:$0xff]  ;;  %v4223_v56 = vld [vmem:[%s9255_s8 + $0x118] sm:$0xff] }
 0x681   :  { %vm2961_vm15 = vcmp.ge.f32.partialorder %v2945_v46, 0.0  ;;  %v2977_v54 = vmul.f32 0.1, %v2945_v46  ;;  %6755 = vmatprep.subr.bf16.mxu0 %v6754_v38  ;;  %v4271_v32 = vld [vmem:[%s9261_s13 + $0x100] sm:$0xff] }
 0x682   :  { %6627 = vmatprep.subr.bf16.mxu1 %v6626_v22  ;;  %5967 = vmatmul.mubr.f32.gmra.mrb[108].mxu0 %v7222_v41  ;;  %v8989_v3 = vsel %vm2962_vm14, %v2946_v28, %v2978_v17  ;;  %v4272_v28 = vld [vmem:[%s9261_s13 + $0x108] sm:$0xff]  ;;  %v4227_v41 = vld [vmem:[%s9255_s8 + $0x138] sm:$0xff] }
 0x683   :  { %6629 = vmatpush3.bf16.msra.mxu1 %v6626_v22  ;;  %5969 = vmatprep.mubr.f32.mxu0 %v7223_v30  ;;  %v8994_v40 = vsel %vm2961_vm15, %v2945_v46, %v2977_v54  ;;  %v6762_v62 = vpack.c.bf16 %v4272_v28, %v4271_v32  ;;  %v6638_v46 = vpack.c.bf16 %v4223_v56, %v4222_v6  ;;  %v4224_v22 = vld [vmem:[%s9255_s8 + $0x120] sm:$0xff]  ;;  %v4225_v17 = vld [vmem:[%s9255_s8 + $0x128] sm:$0xff] }
 0x684   :  { %v6630_v43 = vpack.c.bf16 %v8989_v3, %v8994_v40  ;;  %6757 = vmatpush3.bf16.msra.mxu0 %v6754_v38  ;;  %v4221_v38 = vld [vmem:[%s9255_s8 + $0x108] sm:$0xff]  ;;  %v6642_v54 = vpack.c.bf16 %v4225_v17, %v4224_v22  ;;  %v4277_v22 = vld [vmem:[%s9261_s13 + $0x130] sm:$0xff]  ;;  %v4278_v17 = vld [vmem:[%s9261_s13 + $0x138] sm:$0xff] }
 0x685   :  { %6759 = vmatprep.subr.bf16.mxu0 %v6758_v7  ;;  %v6634_v0 = vpack.c.bf16 %v4221_v38, %v4220_v14  ;;  %v4276_v28 = vld [vmem:[%s9261_s13 + $0x128] sm:$0xff] }
 0x686   :  { %6631 = vmatprep.subr.bf16.mxu1 %v6630_v43  ;;  %5970 = vmatmul.mubr.f32.gmra.mrb[110].mxu0 %v7224_v47  ;;  %v4229_v47 = vld [vmem:[%s9255_s8 + $0x148] sm:$0xff] }
 0x687   :  { %6633 = vmatpush3.bf16.msra.mxu1 %v6630_v43  ;;  %v4228_v43 = vld [vmem:[%s9255_s8 + $0x140] sm:$0xff] }
 0x688   :  { %6761 = vmatpush3.bf16.msra.mxu0 %v6758_v7  ;;  %6635 = vmatprep.subr.bf16.mxu1 %v6634_v0  ;;  %v4226_v7 = vld [vmem:[%s9255_s8 + $0x130] sm:$0xff] }
 0x689   :  { %6763 = vmatprep.subr.bf16.mxu0 %v6762_v62  ;;  %v6646_v30 = vpack.c.bf16 %v4227_v41, %v4226_v7  ;;  %v6774_v41 = vpack.c.bf16 %v4278_v17, %v4277_v22  ;;  %v4241_v17 = vld [vmem:[%s9259_s10 + $0x120] sm:$0xff] }
 0x68a   :  { %5781 = vmatmul.mubr.f32.vlgmr.msra.gmra.mrb[64].mxu1 %v7225_v12  ;;  %v6650_v12 = vpack.c.bf16 %v4229_v47, %v4228_v43 }
 0x68b   :  { %5783 = vmatprep.mubr.f32.mxu1 %v7226_v21  ;;  %6637 = vmatpush3.bf16.msra.mxu1 %v6634_v0  ;;  %v4230_v21 = vld [vmem:[%s9255_s8 + $0x150] sm:$0xff]  ;;  %v4275_v0 = vld [vmem:[%s9261_s13 + $0x120] sm:$0xff] }
 0x68c   :  { %6639 = vmatprep.subr.bf16.mxu1 %v6638_v46 }
 0x68e   :  { %5784 = vmatmul.mubr.f32.gmra.mrb[66].mxu1 %v7227_v26  ;;  %v4231_v26 = vld [vmem:[%s9255_s8 + $0x158] sm:$0xff] }
 0x68f   :  { %5786 = vmatprep.mubr.f32.mxu1 %v7228_v2  ;;  %6641 = vmatpush3.bf16.msra.mxu1 %v6638_v46  ;;  %v6654_v2 = vpack.c.bf16 %v4231_v26, %v4230_v21  ;;  %v6770_v46 = vpack.c.bf16 %v4276_v28, %v4275_v0  ;;  %v4281_v21 = vld [vmem:[%s9261_s13 + $0x150] sm:$0xff]  ;;  %v4282_v26 = vld [vmem:[%s9261_s13 + $0x158] sm:$0xff] }
 0x690   :  { %6643 = vmatprep.subr.bf16.mxu1 %v6642_v54  ;;  %v4239_v28 = vld [vmem:[%s9259_s10 + $0x110] sm:$0xff] }
 0x692   :  { %5787 = vmatmul.mubr.f32.gmra.mrb[68].mxu1 %v7229_v11  ;;  %v4232_v11 = vld [vmem:[%s9255_s8 + $0x160] sm:$0xff] }
 0x693   :  { %5789 = vmatprep.mubr.f32.mxu1 %v7230_v33  ;;  %6645 = vmatpush3.bf16.msra.mxu1 %v6642_v54  ;;  %v4233_v33 = vld [vmem:[%s9255_s8 + $0x168] sm:$0xff] }
 0x694   :  { %6647 = vmatprep.subr.bf16.mxu1 %v6646_v30 }
 0x696   :  { %5790 = vmatmul.mubr.f32.gmra.mrb[70].mxu1 %v7231_v8  ;;  %v6658_v8 = vpack.c.bf16 %v4233_v33, %v4232_v11  ;;  %v6782_v33 = vpack.c.bf16 %v4282_v26, %v4281_v21  ;;  %v4247_v21 = vld [vmem:[%s9259_s10 + $0x150] sm:$0xff]  ;;  %v4248_v26 = vld [vmem:[%s9259_s10 + $0x158] sm:$0xff] }
 0x697   :  { %5792 = vmatprep.mubr.f32.mxu1 %v7232_v63  ;;  %6649 = vmatpush3.bf16.msra.mxu1 %v6646_v30  ;;  %v4234_v63 = vld [vmem:[%s9255_s8 + $0x170] sm:$0xff]  ;;  %v4280_v30 = vld [vmem:[%s9261_s13 + $0x148] sm:$0xff] }
 0x698   :  { %6651 = vmatprep.subr.bf16.mxu1 %v6650_v12 }
 0x69a   :  { %5793 = vmatmul.mubr.f32.gmra.mrb[72].mxu1 %v7233_v48  ;;  %v4235_v48 = vld [vmem:[%s9255_s8 + $0x178] sm:$0xff] }
 0x69b   :  { %5795 = vmatprep.mubr.f32.mxu1 %v7234_v53  ;;  %6653 = vmatpush3.bf16.msra.mxu1 %v6650_v12  ;;  %v6662_v53 = vpack.c.bf16 %v4235_v48, %v4234_v63  ;;  %v4284_v63 = vld [vmem:[%s9261_s13 + $0x168] sm:$0xff] }
 0x69c   :  { %6655 = vmatprep.subr.bf16.mxu1 %v6654_v2 }
 0x69e   :  { %5796 = vmatmul.mubr.f32.gmra.mrb[74].mxu1 %v7235_v15  ;;  %v4237_v15 = vld [vmem:[%s9259_s10 + $0x100] sm:$0xff] }
 0x69f   :  { %5798 = vmatprep.mubr.f32.mxu1 %v7236_v42  ;;  %6657 = vmatpush3.bf16.msra.mxu1 %v6654_v2  ;;  %v4238_v42 = vld [vmem:[%s9259_s10 + $0x108] sm:$0xff] }
 0x6a0   :  { %6659 = vmatprep.subr.bf16.mxu1 %v6658_v8 }
 0x6a2   :  { %5799 = vmatmul.mubr.f32.gmra.mrb[76].mxu1 %v7237_v50  ;;  %v9106_v50 = vpack.c.bf16 %v4238_v42, %v4237_v15  ;;  %v4285_v42 = vld [vmem:[%s9261_s13 + $0x170] sm:$0xff] }
 0x6a3   :  { %5801 = vmatprep.mubr.f32.mxu1 %v7238_v5  ;;  %6661 = vmatpush3.bf16.msra.mxu1 %v6658_v8  ;;  %v4273_v5 = vld [vmem:[%s9261_s13 + $0x110] sm:$0xff]  ;;  %v4283_v8 = vld [vmem:[%s9261_s13 + $0x160] sm:$0xff] }
 0x6a4   :  { %6663 = vmatprep.subr.bf16.mxu1 %v6662_v53  ;;  %v6786_v15 = vpack.c.bf16 %v4284_v63, %v4283_v8  ;;  %v4251_v63 = vld [vmem:[%s9259_s10 + $0x170] sm:$0xff] }
 0x6a6   :  { %5802 = vmatmul.mubr.f32.gmra.mrb[78].mxu1 %v7239_v29  ;;  %v4274_v29 = vld [vmem:[%s9261_s13 + $0x118] sm:$0xff] }
 0x6a7   :  { %6665 = vmatpush3.bf16.msra.mxu1 %v6662_v53  ;;  %v6766_v32 = vpack.c.bf16 %v4274_v29, %v4273_v5  ;;  %v4286_v5 = vld [vmem:[%s9261_s13 + $0x178] sm:$0xff] }
 0x6a8   :  { %6667 = vmatprep.subr.bf16.mxu1 %v9106_v50 }
 0x73d   :  { %v5950_v14 = vpop.f32.mrb[96].mxu0 }
 0x73e   :  { %v3590_v38 = vpop.f32.mrb[97].mxu0 }
 0x73f   :  { %6004 = vmatprep.mubr.f32.mxu0 %v3590_v38  ;;  %v6790_v38 = vpack.c.bf16 %v4286_v5, %v4285_v42 }
 0x740   :  { %6005 = vmatmul.mubr.f32.vlgmr.msra.gmra.mrb[112].mxu0 %v5950_v14 }
 0x741   :  { %v5953_v6 = vpop.f32.mrb[98].mxu0  ;;  %6765 = vmatpush3.bf16.msra.mxu0 %v6762_v62  ;;  %v4279_v62 = vld [vmem:[%s9261_s13 + $0x140] sm:$0xff] }
 0x742   :  { %v3600_v56 = vpop.f32.mrb[99].mxu0  ;;  %6767 = vmatprep.subr.bf16.mxu0 %v6766_v32  ;;  %v6778_v12 = vpack.c.bf16 %v4280_v30, %v4279_v62  ;;  %v4243_v62 = vld [vmem:[%s9259_s10 + $0x130] sm:$0xff]  ;;  %v4244_v30 = vld [vmem:[%s9259_s10 + $0x138] sm:$0xff] }
 0x743   :  { %6007 = vmatprep.mubr.f32.mxu0 %v3600_v56 }
 0x744   :  { %6008 = vmatmul.mubr.f32.gmra.mrb[114].mxu0 %v5953_v6  ;;  %v4240_v6 = vld [vmem:[%s9259_s10 + $0x118] sm:$0xff] }
 0x745   :  { %v5956_v54 = vpop.f32.mrb[100].mxu0  ;;  %6769 = vmatpush3.bf16.msra.mxu0 %v6766_v32  ;;  %v6670_v22 = vpack.c.bf16 %v4240_v6, %v4239_v28 }
 0x746   :  { %v3610_v7 = vpop.f32.mrb[101].mxu0  ;;  %6771 = vmatprep.subr.bf16.mxu0 %v6770_v46 }
 0x747   :  { %6010 = vmatprep.mubr.f32.mxu0 %v3610_v7 }
 0x748   :  { %6011 = vmatmul.mubr.f32.gmra.mrb[116].mxu0 %v5956_v54  ;;  %v4242_v54 = vld [vmem:[%s9259_s10 + $0x128] sm:$0xff] }
 0x749   :  { %v5959_v43 = vpop.f32.mrb[102].mxu0  ;;  %6773 = vmatpush3.bf16.msra.mxu0 %v6770_v46 }
 0x74a   :  { %v3620_v47 = vpop.f32.mrb[103].mxu0  ;;  %6775 = vmatprep.subr.bf16.mxu0 %v6774_v41 }
 0x74b   :  { %6013 = vmatprep.mubr.f32.mxu0 %v3620_v47  ;;  %v4246_v47 = vld [vmem:[%s9259_s10 + $0x148] sm:$0xff] }
 0x74c   :  { %6014 = vmatmul.mubr.f32.gmra.mrb[118].mxu0 %v5959_v43  ;;  %v4245_v43 = vld [vmem:[%s9259_s10 + $0x140] sm:$0xff] }
 0x74d   :  { %v5962_v2 = vpop.f32.mrb[104].mxu0  ;;  %6777 = vmatpush3.bf16.msra.mxu0 %v6774_v41  ;;  %v6674_v41 = vpack.c.bf16 %v4242_v54, %v4241_v17 }
 0x74e   :  { %v3630_v11 = vpop.f32.mrb[105].mxu0  ;;  %6779 = vmatprep.subr.bf16.mxu0 %v6778_v12 }
 0x74f   :  { %6016 = vmatprep.mubr.f32.mxu0 %v3630_v11  ;;  %v4249_v11 = vld [vmem:[%s9259_s10 + $0x160] sm:$0xff] }
 0x750   :  { %6017 = vmatmul.mubr.f32.gmra.mrb[120].mxu0 %v5962_v2  ;;  %v6686_v2 = vpack.c.bf16 %v4248_v26, %v4247_v21  ;;  %v3982_v21 = vld [vmem:[%s9264_s14 + $0x8] sm:$0xff] }
 0x751   :  { %v5965_v48 = vpop.f32.mrb[106].mxu0  ;;  %6781 = vmatpush3.bf16.msra.mxu0 %v6778_v12  ;;  %v6682_v12 = vpack.c.bf16 %v4246_v47, %v4245_v43 }
 0x752   :  { %v3640_v53 = vpop.f32.mrb[107].mxu0  ;;  %6783 = vmatprep.subr.bf16.mxu0 %v6782_v33 }
 0x753   :  { %6019 = vmatprep.mubr.f32.mxu0 %v3640_v53 }
 0x754   :  { %6020 = vmatmul.mubr.f32.gmra.mrb[122].mxu0 %v5965_v48  ;;  %v4252_v48 = vld [vmem:[%s9259_s10 + $0x178] sm:$0xff] }
 0x755   :  { %v5968_v29 = vpop.f32.mrb[108].mxu0  ;;  %6785 = vmatpush3.bf16.msra.mxu0 %v6782_v33  ;;  %v4250_v33 = vld [vmem:[%s9259_s10 + $0x168] sm:$0xff]  ;;  %v6694_v53 = vpack.c.bf16 %v4252_v48, %v4251_v63 }
 0x756   :  { %v3650_v14 = vpop.f32.mrb[109].mxu0  ;;  %6787 = vmatprep.subr.bf16.mxu0 %v6786_v15  ;;  %v6690_v8 = vpack.c.bf16 %v4250_v33, %v4249_v11 }
 0x757   :  { %6022 = vmatprep.mubr.f32.mxu0 %v3650_v14 }
 0x758   :  { %6023 = vmatmul.mubr.f32.gmra.mrb[124].mxu0 %v5968_v29 }
 0x759   :  { %v5971_v32 = vpop.f32.mrb[110].mxu0  ;;  %6789 = vmatpush3.bf16.msra.mxu0 %v6786_v15 }
 0x75a   :  { %v3660_v0 = vpop.f32.mrb[111].mxu0  ;;  %6791 = vmatprep.subr.bf16.mxu0 %v6790_v38 }
 0x75b   :  { %6025 = vmatprep.mubr.f32.mxu0 %v3660_v0 }
 0x75c   :  { %6026 = vmatmul.mubr.f32.gmra.mrb[126].mxu0 %v5971_v32 }
 0x75d   :  { %v5782_v56 = vpop.f32.mrb[64].mxu1  ;;  %6793 = vmatpush3.bf16.msra.mxu0 %v6790_v38  ;;  %6060 = vmatprep.mubr.f32.mxu0 %v8858_v9 }
 0x75e   :  { %v3097_v46 = vpop.f32.mrb[65].mxu1 }
 0x75f   :  { %5836 = vmatprep.mubr.f32.mxu1 %v3097_v46 }
 0x760   :  { %5837 = vmatmul.mubr.f32.vlgmr.msra.gmra.mrb[80].mxu1 %v5782_v56  ;;  %6061 = vmatmul.mubr.f32.vlgmr.msra.gmra.mrb[112].mxu0 %v8849_v58 }
 0x761   :  { %v5785_v7 = vpop.f32.mrb[66].mxu1  ;;  %6669 = vmatpush3.bf16.msra.mxu1 %v9106_v50  ;;  %6063 = vmatprep.mubr.f32.mxu0 %v8879_v16  ;;  %v6678_v50 = vpack.c.bf16 %v4244_v30, %v4243_v62 }
 0x762   :  { %v3107_v9 = vpop.f32.mrb[67].mxu1  ;;  %6671 = vmatprep.subr.bf16.mxu1 %v6670_v22 }
 0x763   :  { %5839 = vmatprep.mubr.f32.mxu1 %v3107_v9 }
 0x764   :  { %5840 = vmatmul.mubr.f32.gmra.mrb[82].mxu1 %v5785_v7  ;;  %6064 = vmatmul.mubr.f32.gmra.mrb[114].mxu0 %v8866_v13 }
 0x765   :  { %v5788_v58 = vpop.f32.mrb[68].mxu1  ;;  %6673 = vmatpush3.bf16.msra.mxu1 %v6670_v22  ;;  %6066 = vmatprep.mubr.f32.mxu0 %v8900_v31 }
 0x766   :  { %v3117_v16 = vpop.f32.mrb[69].mxu1  ;;  %6675 = vmatprep.subr.bf16.mxu1 %v6674_v41 }
 0x767   :  { %5842 = vmatprep.mubr.f32.mxu1 %v3117_v16 }
 0x768   :  { %5843 = vmatmul.mubr.f32.gmra.mrb[84].mxu1 %v5788_v58  ;;  %6067 = vmatmul.mubr.f32.gmra.mrb[116].mxu0 %v8887_v25 }
 0x769   :  { %v5791_v13 = vpop.f32.mrb[70].mxu1  ;;  %6677 = vmatpush3.bf16.msra.mxu1 %v6674_v41  ;;  %6069 = vmatprep.mubr.f32.mxu0 %v8921_v52 }
 0x76a   :  { %v3127_v31 = vpop.f32.mrb[71].mxu1  ;;  %6679 = vmatprep.subr.bf16.mxu1 %v6678_v50 }
 0x76b   :  { %5845 = vmatprep.mubr.f32.mxu1 %v3127_v31 }
 0x76c   :  { %5846 = vmatmul.mubr.f32.gmra.mrb[86].mxu1 %v5791_v13  ;;  %6070 = vmatmul.mubr.f32.gmra.mrb[118].mxu0 %v8908_v34 }
 0x76d   :  { %v5794_v25 = vpop.f32.mrb[72].mxu1  ;;  %6681 = vmatpush3.bf16.msra.mxu1 %v6678_v50  ;;  %6072 = vmatprep.mubr.f32.mxu0 %v8941_v51  ;;  %v4253_v50 = vld [vmem:[%s9263_s9 + $0x2] ss:$0 sm:$0xff] }
 0x76e   :  { %v3137_v52 = vpop.f32.mrb[73].mxu1  ;;  %6683 = vmatprep.subr.bf16.mxu1 %v6682_v12 }
 0x76f   :  { %5848 = vmatprep.mubr.f32.mxu1 %v3137_v52  ;;  %v4058_v52 = vld [vmem:[%s9265_s15] sm:$0xff] }
 0x770   :  { %5849 = vmatmul.mubr.f32.gmra.mrb[88].mxu1 %v5794_v25  ;;  %6073 = vmatmul.mubr.f32.gmra.mrb[120].mxu0 %v8929_v55 }
 0x771   :  { %v5797_v34 = vpop.f32.mrb[74].mxu1  ;;  %6685 = vmatpush3.bf16.msra.mxu1 %v6682_v12  ;;  %6075 = vmatprep.mubr.f32.mxu0 %v8961_v18 }
 0x772   :  { %v3147_v51 = vpop.f32.mrb[75].mxu1  ;;  %6687 = vmatprep.subr.bf16.mxu1 %v6686_v2 }
 0x773   :  { %5851 = vmatprep.mubr.f32.mxu1 %v3147_v51 }
 0x774   :  { %5852 = vmatmul.mubr.f32.gmra.mrb[90].mxu1 %v5797_v34  ;;  %6076 = vmatmul.mubr.f32.gmra.mrb[122].mxu0 %v8949_v60 }
 0x775   :  { %v5800_v55 = vpop.f32.mrb[76].mxu1  ;;  %6689 = vmatpush3.bf16.msra.mxu1 %v6686_v2  ;;  %6078 = vmatprep.mubr.f32.mxu0 %v8981_v19 }
 0x776   :  { %v3157_v18 = vpop.f32.mrb[77].mxu1  ;;  %6691 = vmatprep.subr.bf16.mxu1 %v6690_v8 }
 0x777   :  { %5854 = vmatprep.mubr.f32.mxu1 %v3157_v18 }
 0x778   :  { %5855 = vmatmul.mubr.f32.gmra.mrb[92].mxu1 %v5800_v55  ;;  %6079 = vmatmul.mubr.f32.gmra.mrb[124].mxu0 %v8969_v45 }
 0x779   :  { %v5803_v15 = vpop.f32.mrb[78].mxu1  ;;  %6693 = vmatpush3.bf16.msra.mxu1 %v6690_v8  ;;  %6081 = vmatprep.mubr.f32.mxu0 %v8994_v40 }
 0x77a   :  { %v3167_v42 = vpop.f32.mrb[79].mxu1  ;;  %6695 = vmatprep.subr.bf16.mxu1 %v6694_v53 }
 0x77b   :  { %5857 = vmatprep.mubr.f32.mxu1 %v3167_v42 }
 0x77c   :  { %5858 = vmatmul.mubr.f32.gmra.mrb[94].mxu1 %v5803_v15  ;;  %6082 = vmatmul.mubr.f32.gmra.mrb[126].mxu0 %v8989_v3 }
 0x77d   :  { %6697 = vmatpush3.bf16.msra.mxu1 %v6694_v53  ;;  %5892 = vmatprep.mubr.f32.mxu1 %v8782_v59  ;;  %v4287_v59 = vld [vmem:[%s9262_s12 + $0x2] ss:$0 sm:$0xff] }
 0x780   :  { %5893 = vmatmul.mubr.f32.vlgmr.msra.gmra.mrb[80].mxu1 %v8779_v36  ;;  %v3981_v36 = vld [vmem:[%s9264_s14] sm:$0xff] }
 0x781   :  { %5895 = vmatprep.mubr.f32.mxu1 %v8790_v1 }
 0x784   :  { %5896 = vmatmul.mubr.f32.gmra.mrb[82].mxu1 %v8787_v24 }
 0x785   :  { %5898 = vmatprep.mubr.f32.mxu1 %v8798_v23 }
 0x788   :  { %5899 = vmatmul.mubr.f32.gmra.mrb[84].mxu1 %v8795_v4 }
 0x789   :  { %5901 = vmatprep.mubr.f32.mxu1 %v8806_v61 }
 0x78c   :  { %5902 = vmatmul.mubr.f32.gmra.mrb[86].mxu1 %v8803_v44 }
 0x78d   :  { %5904 = vmatprep.mubr.f32.mxu1 %v8814_v49 }
 0x790   :  { %5905 = vmatmul.mubr.f32.gmra.mrb[88].mxu1 %v8811_v10 }
 0x791   :  { %5907 = vmatprep.mubr.f32.mxu1 %v8822_v20 }
 0x794   :  { %5908 = vmatmul.mubr.f32.gmra.mrb[90].mxu1 %v8819_v35 }
 0x795   :  { %5910 = vmatprep.mubr.f32.mxu1 %v8830_v57 }
 0x798   :  { %5911 = vmatmul.mubr.f32.gmra.mrb[92].mxu1 %v8827_v27 }
 0x799   :  { %5913 = vmatprep.mubr.f32.mxu1 %v8844_v37 }
 0x79c   :  { %5914 = vmatmul.mubr.f32.gmra.mrb[94].mxu1 %v8841_v39 }
 0x79d   :  { %6116 = vmatprep.mubr.f32.mxu1 %v3981_v36 }
 0x833   :  { %v6062_v24 = vpop.f32.mrb[112].mxu0 }
 0x834   :  { %v6938_v1 = vadd.f32 %v6062_v24, %v4287_v59  ;;  %v3886_v4 = vpop.f32.mrb[113].mxu0 }
 0x835   :  { %v6939_v23 = vadd.f32 %v4287_v59, %v3886_v4 }
 0x837   :  { %v6794_v44 = vpack.c.bf16 %v6938_v1, %v6939_v23  ;;  %v6065_v61 = vpop.f32.mrb[114].mxu0 }
 0x838   :  { %v6940_v10 = vadd.f32 %v6065_v61, %v4287_v59  ;;  %v3896_v49 = vpop.f32.mrb[115].mxu0 }
 0x839   :  { %v6941_v35 = vadd.f32 %v4287_v59, %v3896_v49  ;;  %6795 = vmatprep.subr.bf16.mxu1 %v6794_v44 }
 0x83a   :  { %6797 = vmatpush3.bf16.msra.mxu1 %v6794_v44 }
 0x83b   :  { %v6798_v20 = vpack.c.bf16 %v6940_v10, %v6941_v35  ;;  %v6068_v27 = vpop.f32.mrb[116].mxu0 }
 0x83c   :  { %v6942_v57 = vadd.f32 %v6068_v27, %v4287_v59  ;;  %v3906_v39 = vpop.f32.mrb[117].mxu0 }
 0x83d   :  { %v6943_v37 = vadd.f32 %v4287_v59, %v3906_v39  ;;  %6799 = vmatprep.subr.bf16.mxu1 %v6798_v20 }
 0x83e   :  { %6801 = vmatpush3.bf16.msra.mxu1 %v6798_v20 }
 0x83f   :  { %v6802_v60 = vpack.c.bf16 %v6942_v57, %v6943_v37  ;;  %v6071_v45 = vpop.f32.mrb[118].mxu0 }
 0x840   :  { %v6944_v19 = vadd.f32 %v6071_v45, %v4287_v59  ;;  %v3916_v3 = vpop.f32.mrb[119].mxu0 }
 0x841   :  { %v6945_v40 = vadd.f32 %v4287_v59, %v3916_v3  ;;  %6803 = vmatprep.subr.bf16.mxu1 %v6802_v60 }
 0x842   :  { %6805 = vmatpush3.bf16.msra.mxu1 %v6802_v60 }
 0x843   :  { %v6806_v5 = vpack.c.bf16 %v6944_v19, %v6945_v40  ;;  %v6074_v29 = vpop.f32.mrb[120].mxu0 }
 0x844   :  { %v6946_v14 = vadd.f32 %v6074_v29, %v4287_v59  ;;  %v3926_v38 = vpop.f32.mrb[121].mxu0 }
 0x845   :  { %v6947_v32 = vadd.f32 %v4287_v59, %v3926_v38  ;;  %6807 = vmatprep.subr.bf16.mxu1 %v6806_v5 }
 0x846   :  { %6809 = vmatpush3.bf16.msra.mxu1 %v6806_v5  ;;  %v4059_v5 = vld [vmem:[%s9265_s15 + $0x8] sm:$0xff] }
 0x847   :  { %v6810_v0 = vpack.c.bf16 %v6946_v14, %v6947_v32  ;;  %v6077_v28 = vpop.f32.mrb[122].mxu0 }
 0x848   :  { %v6948_v6 = vadd.f32 %v6077_v28, %v4287_v59  ;;  %v3936_v56 = vpop.f32.mrb[123].mxu0 }
 0x849   :  { %v6949_v46 = vadd.f32 %v4287_v59, %v3936_v56  ;;  %6811 = vmatprep.subr.bf16.mxu1 %v6810_v0 }
 0x84a   :  { %6813 = vmatpush3.bf16.msra.mxu1 %v6810_v0 }
 0x84b   :  { %v6814_v22 = vpack.c.bf16 %v6948_v6, %v6949_v46  ;;  %v6080_v17 = vpop.f32.mrb[124].mxu0 }
 0x84c   :  { %v6950_v54 = vadd.f32 %v6080_v17, %v4287_v59  ;;  %v3946_v7 = vpop.f32.mrb[125].mxu0 }
 0x84d   :  { %v6951_v9 = vadd.f32 %v4287_v59, %v3946_v7  ;;  %6815 = vmatprep.subr.bf16.mxu1 %v6814_v22 }
 0x84e   :  { %6817 = vmatpush3.bf16.msra.mxu1 %v6814_v22 }
 0x84f   :  { %v6818_v41 = vpack.c.bf16 %v6950_v54, %v6951_v9  ;;  %v6083_v62 = vpop.f32.mrb[126].mxu0 }
 0x850   :  { %v6952_v30 = vadd.f32 %v6083_v62, %v4287_v59  ;;  %v3956_v58 = vpop.f32.mrb[127].mxu0 }
 0x851   :  { %v6953_v16 = vadd.f32 %v4287_v59, %v3956_v58  ;;  %6819 = vmatprep.subr.bf16.mxu1 %v6818_v41 }
 0x852   :  { %6821 = vmatpush3.bf16.msra.mxu1 %v6818_v41 }
 0x853   :  { %v6822_v43 = vpack.c.bf16 %v6952_v30, %v6953_v16  ;;  %v5894_v47 = vpop.f32.mrb[80].mxu1 }
 0x854   :  { %v6922_v13 = vadd.f32 %v5894_v47, %v4253_v50  ;;  %v3393_v31 = vpop.f32.mrb[81].mxu1 }
 0x855   :  { %v6923_v12 = vadd.f32 %v4253_v50, %v3393_v31  ;;  %6823 = vmatprep.subr.bf16.mxu1 %v6822_v43 }
 0x856   :  { %6825 = vmatpush3.bf16.msra.mxu1 %v6822_v43 }
 0x857   :  { %v6826_v26 = vpack.c.bf16 %v6922_v13, %v6923_v12  ;;  %v5897_v25 = vpop.f32.mrb[82].mxu1 }
 0x858   :  { %v6924_v2 = vadd.f32 %v5897_v25, %v4253_v50  ;;  %v3403_v11 = vpop.f32.mrb[83].mxu1 }
 0x859   :  { %v6925_v33 = vadd.f32 %v4253_v50, %v3403_v11  ;;  %6827 = vmatprep.subr.bf16.mxu1 %v6826_v26  ;;  %6117 = vmatmul.mubr.f32.vlgmr.msra.gmra.mrb[96].mxu1 %v3982_v21 }
 0x85a   :  { %6829 = vmatpush3.bf16.msra.mxu1 %v6826_v26  ;;  %6151 = vmatprep.mubr.f32.mxu1 %v4058_v52 }
 0x85b   :  { %v6830_v34 = vpack.c.bf16 %v6924_v2, %v6925_v33  ;;  %v5900_v51 = vpop.f32.mrb[84].mxu1 }
 0x85c   :  { %v6926_v8 = vadd.f32 %v5900_v51, %v4253_v50  ;;  %v3413_v63 = vpop.f32.mrb[85].mxu1 }
 0x85d   :  { %v6927_v48 = vadd.f32 %v4253_v50, %v3413_v63  ;;  %6831 = vmatprep.subr.bf16.mxu1 %v6830_v34 }
 0x85e   :  { %6833 = vmatpush3.bf16.msra.mxu1 %v6830_v34 }
 0x85f   :  { %v6834_v55 = vpack.c.bf16 %v6926_v8, %v6927_v48  ;;  %v5903_v18 = vpop.f32.mrb[86].mxu1 }
 0x860   :  { %v6928_v53 = vadd.f32 %v5903_v18, %v4253_v50  ;;  %v3423_v15 = vpop.f32.mrb[87].mxu1 }
 0x861   :  { %v6929_v42 = vadd.f32 %v4253_v50, %v3423_v15  ;;  %6835 = vmatprep.subr.bf16.mxu1 %v6834_v55 }
 0x862   :  { %6837 = vmatpush3.bf16.msra.mxu1 %v6834_v55 }
 0x863   :  { %v6838_v36 = vpack.c.bf16 %v6928_v53, %v6929_v42  ;;  %v5906_v59 = vpop.f32.mrb[88].mxu1 }
 0x864   :  { %v6930_v24 = vadd.f32 %v5906_v59, %v4253_v50  ;;  %v3433_v1 = vpop.f32.mrb[89].mxu1 }
 0x865   :  { %v6931_v4 = vadd.f32 %v4253_v50, %v3433_v1  ;;  %6839 = vmatprep.subr.bf16.mxu1 %v6838_v36 }
 0x866   :  { %6841 = vmatpush3.bf16.msra.mxu1 %v6838_v36 }
 0x867   :  { %v6842_v23 = vpack.c.bf16 %v6930_v24, %v6931_v4  ;;  %v5909_v44 = vpop.f32.mrb[90].mxu1 }
 0x868   :  { %v6932_v61 = vadd.f32 %v5909_v44, %v4253_v50  ;;  %v3443_v10 = vpop.f32.mrb[91].mxu1 }
 0x869   :  { %v6933_v49 = vadd.f32 %v4253_v50, %v3443_v10  ;;  %6843 = vmatprep.subr.bf16.mxu1 %v6842_v23 }
 0x86a   :  { %6845 = vmatpush3.bf16.msra.mxu1 %v6842_v23 }
 0x86b   :  { %v6846_v35 = vpack.c.bf16 %v6932_v61, %v6933_v49  ;;  %v5912_v20 = vpop.f32.mrb[92].mxu1 }
 0x86c   :  { %v6934_v27 = vadd.f32 %v5912_v20, %v4253_v50  ;;  %v3453_v57 = vpop.f32.mrb[93].mxu1 }
 0x86d   :  { %v6935_v39 = vadd.f32 %v4253_v50, %v3453_v57  ;;  %6847 = vmatprep.subr.bf16.mxu1 %v6846_v35 }
 0x86e   :  { %6849 = vmatpush3.bf16.msra.mxu1 %v6846_v35 }
 0x86f   :  { %v6850_v37 = vpack.c.bf16 %v6934_v27, %v6935_v39  ;;  %v5915_v60 = vpop.f32.mrb[94].mxu1 }
 0x870   :  { %v6936_v45 = vadd.f32 %v5915_v60, %v4253_v50  ;;  %v3463_v19 = vpop.f32.mrb[95].mxu1 }
 0x871   :  { %v6937_v3 = vadd.f32 %v4253_v50, %v3463_v19  ;;  %6851 = vmatprep.subr.bf16.mxu1 %v6850_v37 }
 0x872   :  { %6853 = vmatpush3.bf16.msra.mxu1 %v6850_v37 }
 0x873   :  { %v6854_v40 = vpack.c.bf16 %v6936_v45, %v6937_v3 }
 0x875   :  { %6855 = vmatprep.subr.bf16.mxu1 %v6854_v40 }
 0x876   :  { %6857 = vmatpush3.bf16.msra.mxu1 %v6854_v40 }
 0x879   :  { %6152 = vmatmul.mubr.f32.vlgmr.msra.gmra.mrb[98].mxu1 %v4059_v5 }
 0x92c   :  { %v6118_v29 = vpop.f32.mrb[96].mxu1 }
 0x92d   :  { %v4049_v14 = vpop.f32.mrb[97].mxu1 }
 0x94c   :  { %v6153_v38 = vpop.f32.mrb[98].mxu1 }
 0x94d   :  { %v4136_v32 = vmul.f32 %v6153_v38, %v6118_v29  ;;  %v4126_v0 = vpop.f32.mrb[99].mxu1 }
 0x94e   :  { %v4135_v28 = vmul.f32 %v4126_v0, %v4049_v14 }
 0x94f   :  { %4139 = vadd.xlane.f32.xlu1 %v4136_v32 }
 0x950   :  { %4137 = vadd.xlane.f32.xlu0 %v4135_v28 }
 0x9dc   :  { %v4140_v6 = vpop.xlane.xlu1 %4139 }
 0x9dd   :  { %4143 = vst.msk [vmem:[%s9266_s16 + $0x8] sm:$0xff] %vm4141_vm0, %v4140_v6  ;;  %v4138_v56 = vpop.xlane.xlu0 %4137 }
 0x9de   :  { %4142 = vst.msk [vmem:[%s9266_s16] sm:$0xff] %vm4141_vm0, %v4138_v56 }

</bundles_post_ra>
